<compile_context>
chip_gen: v6e
topology: v6e:2x2x1
jax: 0.10.0
libtpu: 0.0.40
codegen_flags: <defaults>
</compile_context>

<pallas_src>
import jax
import jax.numpy as jnp
from jax import lax
from jax.experimental import pallas as pl
from jax.experimental.pallas import tpu as pltpu

_LANE = 128
_ONEHOT_SELECTOR_BYTES_MAX = 16 * 1024 * 1024   # crossover: <=16 MiB of bf16 selectors


def _round_up(v, m):
    return (v + m - 1) // m * m


def _use_onehot(N, K, neighbor_impl):
    if neighbor_impl == "onehot":
        return True
    if neighbor_impl == "gather":
        return False
    assert neighbor_impl == "auto"
    return K * N * N * 2 <= _ONEHOT_SELECTOR_BYTES_MAX


# ----------------------------------------------------------------------------
# Fused Block kernel (one grid step == one batch element)
# ----------------------------------------------------------------------------
def _make_block_kernel(depth, use_onehot):
    def kernel(x_ref, knn_ref,
               w1m_ref, b1m_ref, w2m_ref, shm_ref,      # main Mlp (BN scale folded in w2)
               wp_ref, scl_ref, shl_ref,                 # depth x LFP
               w1s_ref, b1s_ref, w2s_ref, shs_ref,       # depth//2 x Mlp
               o_ref, *scratch):
        x = x_ref[0].astype(jnp.float32)                 # (N, Cp) residual stream, f32
        knn = knn_ref[0]                                 # (K, N) int32, lane-dense
        N, Cp = x.shape
        K = knn.shape[0]

        def mlp(xb, w1, b1, w2, shift):
            h = jax.nn.gelu(jnp.dot(xb, w1, preferred_element_type=jnp.float32) + b1,
                            approximate=True)
            return jnp.dot(h.astype(jnp.bfloat16), w2,
                           preferred_element_type=jnp.float32) + shift

        # --- build the K one-hot neighbour selectors ONCE; reused by every LFP --------
        if use_onehot:
            sel_ref = scratch[0]                         # (K, N, N) bf16 VMEM scratch
            row = lax.broadcasted_iota(jnp.int32, (N, N), 0)
            for kk in range(K):
                # selT[i, j] = (i == knn[kk][j]) : built with a cheap lane broadcast
                # (no lane->sublane relayout), then transposed once (f32 XLU transpose)
                # into gather orientation onehot[i, j] = (j == knn[kk][i]).
                selT = (row == knn[kk][None, :]).astype(jnp.float32)
                sel_ref[kk] = selT.T.astype(jnp.bfloat16)

        def neighbor_max(f):                             # (N, Cp) -> max_{j in knn_i} f[j]
            m = None
            if use_onehot:
                fb = f.astype(jnp.bfloat16)              # exact one-hot row selection
                for kk in range(K):
                    g = jnp.dot(sel_ref[kk], fb, preferred_element_type=jnp.float32)
                    m = g if m is None else jnp.maximum(m, g)
            else:
                # Scene-scale N: rank-1 row gather, no (N, Cp) index slabs.
                for kk in range(K):
                    g = jnp.take(f, knn[kk], axis=0, mode="promise_in_bounds")
                    m = g if m is None else jnp.maximum(m, g)
            return m

        # x = x + Mlp_main(x)
        xb = x.astype(jnp.bfloat16)                      # bf16 shadow of the residual
        x = x + mlp(xb, w1m_ref[...], b1m_ref[...], w2m_ref[...], shm_ref[...])
        xb = x.astype(jnp.bfloat16)

        for i in range(depth):                           # static unroll over sub-layers
            f = jnp.dot(xb, wp_ref[i], preferred_element_type=jnp.float32)   # LFP proj
            x = x + (neighbor_max(f) - f) * scl_ref[i] + shl_ref[i]
            xb = x.astype(jnp.bfloat16)
            if i % 2 == 1:
                j = i // 2
                x = x + mlp(xb, w1s_ref[j], b1s_ref[j], w2s_ref[j], shs_ref[j])
                xb = x.astype(jnp.bfloat16)

        o_ref[0] = x.astype(o_ref.dtype)

    return kernel


def block_forward(x, knn, kp, depth, neighbor_impl="auto"):
    B, N, C = x.shape
    K = knn.shape[2]
    Cp, Hp = kp["w1m"].shape
    n_sub = kp["w1s"].shape[0]
    use_onehot = _use_onehot(N, K, neighbor_impl)

    # Lane-dense activations: zero-pad channels to Cp (exact; padded lanes stay 0).
    x_p = jnp.pad(x, ((0, 0), (0, 0), (0, Cp - C))) if Cp != C else x
    # knn as (B, K, N): N on the lane axis (16x less VMEM padding than (B, N, K=8)).
    knn_t = jnp.swapaxes(knn, 1, 2).astype(jnp.int32)

    def full(shape):                                     # whole (small) weight array in VMEM
        return pl.BlockSpec(shape, lambda b, _n=len(shape): (0,) * _n)

    grid_spec = pltpu.PrefetchScalarGridSpec(
        num_scalar_prefetch=0,
        grid=(B,),
        in_specs=[
            pl.BlockSpec((1, N, Cp), lambda b: (b, 0, 0)),          # x
            pl.BlockSpec((1, K, N), lambda b: (b, 0, 0)),           # knn (K, N) layout
            full((Cp, Hp)), full((1, Hp)), full((Hp, Cp)), full((1, Cp)),        # main Mlp
            full((depth, Cp, Cp)), full((depth, 1, Cp)), full((depth, 1, Cp)),   # LFPs
            full((n_sub, Cp, Hp)), full((n_sub, 1, Hp)),
            full((n_sub, Hp, Cp)), full((n_sub, 1, Cp)),                         # sub Mlps
        ],
        out_specs=pl.BlockSpec((1, N, Cp), lambda b: (b, 0, 0)),
        scratch_shapes=(
            [pltpu.VMEM((K, N, N), jnp.bfloat16)] if use_onehot else []),
    )

    # Advisory cost estimate so XLA can schedule surrounding HLO around the fused call.
    mlp_flops = 4 * N * Cp * Hp * (1 + depth // 2)
    lfp_flops = depth * 2 * N * Cp * Cp
    sel_flops = depth * K * 2 * N * N * Cp if use_onehot else 0
    weight_bytes = sum(int(v.size) * v.dtype.itemsize for v in kp.values())
    cost = pl.CostEstimate(
        flops=B * (mlp_flops + lfp_flops + sel_flops),
        transcendentals=B * (1 + depth // 2) * N * Hp,
        bytes_accessed=2 * int(x_p.size) * x_p.dtype.itemsize
        + int(knn_t.size) * 4 + weight_bytes)

    out_p = pl.pallas_call(
        _make_block_kernel(depth, use_onehot),
        out_shape=jax.ShapeDtypeStruct((B, N, Cp), x.dtype),
        grid_spec=grid_spec,
        compiler_params=pltpu.CompilerParams(
            dimension_semantics=("parallel",),
            vmem_limit_bytes=64 * 1024 * 1024),
        cost_estimate=cost,
    )(x_p, knn_t,
      kp["w1m"], kp["b1m"], kp["w2m"], kp["shm"],
      kp["wp"], kp["scl"], kp["shl"],
      kp["w1s"], kp["b1s"], kp["w2s"], kp["shs"])
    return out_p[..., :C] if Cp != C else out_p


# ----------------------------------------------------------------------------
# Parameter init (torch-like, f32) + one-time kernel-param preparation
# ----------------------------------------------------------------------------
def _init_bn(key, dim):
    # NOTE: gamma is randomised (module inits it to 0.0 / 0.2) so every branch
    # actually contributes to the output and the self-check is meaningful.
    kg, kb, km = jax.random.split(key, 3)
    return {"gamma": 1.0 + 0.1 * jax.random.normal(kg, (dim,), jnp.float32),
            "beta": 0.02 * jax.random.normal(kb, (dim,), jnp.float32),
            "mean": 0.02 * jax.random.normal(km, (dim,), jnp.float32),
            "var": jnp.ones((dim,), jnp.float32)}


def _init_mlp(key, dim, hid):
    k1, k2, k3, k4 = jax.random.split(key, 4)
    p = {"w1": 0.05 * jax.random.normal(k1, (dim, hid), jnp.float32),
         "b1": 0.05 * jax.random.normal(k2, (hid,), jnp.float32),
         "w2": 0.05 * jax.random.normal(k3, (hid, dim), jnp.float32)}
    p.update(_init_bn(k4, dim))
    return p


def _init_lfp(key, dim):
    k1, k2 = jax.random.split(key, 2)
    p = {"wp": 0.05 * jax.random.normal(k1, (dim, dim), jnp.float32)}
    p.update(_init_bn(k2, dim))
    return p


def init_block_params(key, dim, depth, mlp_ratio):
    hid = round(dim * mlp_ratio)
    keys = jax.random.split(key, 1 + depth + max(depth // 2, 1))
    return {"mlp": _init_mlp(keys[0], dim, hid),
            "lfps": [_init_lfp(keys[1 + i], dim) for i in range(depth)],
            "mlps": [_init_mlp(keys[1 + depth + i], dim, hid) for i in range(depth // 2)]}


def _fold_bn(p, eps=1e-5):
    scale = p["gamma"] / jnp.sqrt(p["var"] + eps)
    shift = p["beta"] - p["mean"] * scale
    return scale, shift


def prepare_kernel_params(params, lane=_LANE):
    """One-time weight transform: fold BN, cast matmul weights to bf16, zero-pad the
    channel / hidden dims to lane multiples (exact), stack per layer type."""
    C, H = params["mlp"]["w1"].shape
    Cp, Hp = _round_up(C, lane), _round_up(H, lane)

    def pad2(a, r, c):
        return jnp.pad(a, ((0, r - a.shape[0]), (0, c - a.shape[1])))

    def pad1(a, n):
        return jnp.pad(a, ((0, n - a.shape[0]),))

    def prep_mlp(p):
        scale, shift = _fold_bn(p)
        return (pad2(p["w1"], Cp, Hp).astype(jnp.bfloat16),
                pad1(p["b1"], Hp).reshape(1, Hp).astype(jnp.float32),
                pad2(p["w2"] * scale[None, :], Hp, Cp).astype(jnp.bfloat16),  # exact fold
                pad1(shift, Cp).reshape(1, Cp).astype(jnp.float32))

    w1m, b1m, w2m, shm = prep_mlp(params["mlp"])

    wp, scl, shl = [], [], []
    for p in params["lfps"]:
        scale, shift = _fold_bn(p)
        wp.append(pad2(p["wp"], Cp, Cp).astype(jnp.bfloat16))
        scl.append(pad1(scale, Cp).reshape(1, Cp).astype(jnp.float32))
        shl.append(pad1(shift, Cp).reshape(1, Cp).astype(jnp.float32))

    if params["mlps"]:
        subs = [prep_mlp(p) for p in params["mlps"]]
    else:  # keep the kernel signature fixed when depth < 2 (dummy, never read)
        subs = [(jnp.zeros((Cp, Hp), jnp.bfloat16), jnp.zeros((1, Hp), jnp.float32),
                 jnp.zeros((Hp, Cp), jnp.bfloat16), jnp.zeros((1, Cp), jnp.float32))]

    return {"w1m": w1m, "b1m": b1m, "w2m": w2m, "shm": shm,
            "wp": jnp.stack(wp), "scl": jnp.stack(scl), "shl": jnp.stack(shl),
            "w1s": jnp.stack([s[0] for s in subs]),
            "b1s": jnp.stack([s[1] for s in subs]),
            "w2s": jnp.stack([s[2] for s in subs]),
            "shs": jnp.stack([s[3] for s in subs])}


# ----------------------------------------------------------------------------
# Pure-JAX references
# ----------------------------------------------------------------------------
def _ref_bn(y, p, eps=1e-5):
    return (y - p["mean"]) / jnp.sqrt(p["var"] + eps) * p["gamma"] + p["beta"]


def ref_block_f32(x, knn, params, depth):
    """Original-module math in full f32 (unfolded BN, no bf16, no padding)."""
    def mlp(v, p):
        h = jax.nn.gelu(v @ p["w1"] + p["b1"], approximate=True)
        return _ref_bn(h @ p["w2"], p)

    def lfp(v, p):
        f = v @ p["wp"]
        gathered = jax.vmap(lambda fb, kb: fb[kb])(f, knn)         # (B, N, K, C)
        return _ref_bn(gathered.max(axis=2) - f, p)

    x = x + mlp(x, params["mlp"])
    for i in range(depth):
        x = x + lfp(x, params["lfps"][i])
        if i % 2 == 1:
            x = x + mlp(x, params["mlps"][i // 2])
    return x


def ref_block_mixed(x, knn, kp, depth, onehot_path):
    """Same precision policy as the kernel (bf16 matmuls, f32 accumulate/elementwise,
    bf16-rounded neighbour values when the one-hot MXU path is used)."""
    C = x.shape[-1]
    Cp = kp["w1m"].shape[0]
    x = jnp.pad(x.astype(jnp.float32), ((0, 0), (0, 0), (0, Cp - C)))

    def mm(a, w):
        return jnp.dot(a.astype(jnp.bfloat16), w, preferred_element_type=jnp.float32)

    def mlp(v, w1, b1, w2, shift):
        h = jax.nn.gelu(mm(v, w1) + b1, approximate=True)
        return mm(h, w2) + shift

    x = x + mlp(x, kp["w1m"], kp["b1m"], kp["w2m"], kp["shm"])
    for i in range(depth):
        f = mm(x, kp["wp"][i])
        fg = f.astype(jnp.bfloat16).astype(jnp.float32) if onehot_path else f
        gathered = jax.vmap(lambda fb, kb: fb[kb])(fg, knn)
        x = x + (gathered.max(axis=2) - f) * kp["scl"][i] + kp["shl"][i]
        if i % 2 == 1:
            j = i // 2
            x = x + mlp(x, kp["w1s"][j], kp["b1s"][j], kp["w2s"][j], kp["shs"][j])
    return x[..., :C]


if __name__ == "__main__":
    B, N, C, K = 2, 128, 64, 8
    depth, mlp_ratio = 2, 2.0

    root = jax.random.PRNGKey(0)
    kx, kknn, kp_key = jax.random.split(root, 3)
    x = jax.random.normal(kx, (B, N, C), jnp.float32)
    knn = jax.random.randint(kknn, (B, N, K), 0, N, dtype=jnp.int32)

    params = init_block_params(kp_key, C, depth, mlp_ratio)
    kparams = prepare_kernel_params(params)

    onehot_path = _use_onehot(N, K, "auto")        # MXU one-hot path at these shapes
    out = jax.block_until_ready(
        block_forward(x, knn, kparams, depth, neighbor_impl="auto"))

    ref_mixed = ref_block_mixed(x, knn, kparams, depth, onehot_path)  # kernel policy
    ref_f32 = ref_block_f32(x, knn, params, depth)                    # original f32 math

    assert out.shape == (B, N, C)
    assert jnp.allclose(out, ref_mixed, rtol=1e-2, atol=1e-2), \
        "mismatch vs mixed-precision reference"
    assert jnp.allclose(out, ref_f32, rtol=5e-2, atol=5e-2), \
        "mismatch vs full-f32 reference beyond bf16 tolerance"
    print("KERNEL_OK")
</pallas_src>

<mosaic_0001>
module attributes {stable_mosaic.version = 11 : i64} {
  func.func @kernel(%arg0: i32, %arg1: memref<1x128x128xf32, #tpu.memory_space<vmem>>, %arg2: memref<1x8x128xi32, #tpu.memory_space<vmem>>, %arg3: memref<128x128xbf16, #tpu.memory_space<vmem>>, %arg4: memref<1x128xf32, #tpu.memory_space<vmem>>, %arg5: memref<128x128xbf16, #tpu.memory_space<vmem>>, %arg6: memref<1x128xf32, #tpu.memory_space<vmem>>, %arg7: memref<2x128x128xbf16, #tpu.memory_space<vmem>>, %arg8: memref<2x1x128xf32, #tpu.memory_space<vmem>>, %arg9: memref<2x1x128xf32, #tpu.memory_space<vmem>>, %arg10: memref<1x128x128xbf16, #tpu.memory_space<vmem>>, %arg11: memref<1x1x128xf32, #tpu.memory_space<vmem>>, %arg12: memref<1x128x128xbf16, #tpu.memory_space<vmem>>, %arg13: memref<1x1x128xf32, #tpu.memory_space<vmem>>, %arg14: memref<1x128x128xf32, #tpu.memory_space<vmem>>, %arg15: memref<8x128x128xbf16, #tpu.memory_space<vmem>>) attributes {dimension_semantics = [#tpu.dimension_semantics<parallel>], iteration_bounds = array<i64: 2>, scalar_prefetch = 0 : i64, scratch_operands = 1 : i64, tpu.core_type = #tpu.core_type<tc>, window_params = [{transform_indices = @transform_0, window_bounds = array<i64: 1, 128, 128>}, {transform_indices = @transform_1, window_bounds = array<i64: 1, 8, 128>}, {pipeline_mode = #tpu.pipeline_mode<synchronous>, transform_indices = @transform_2, window_bounds = array<i64: 128, 128>}, {pipeline_mode = #tpu.pipeline_mode<synchronous>, transform_indices = @transform_3, window_bounds = array<i64: 1, 128>}, {pipeline_mode = #tpu.pipeline_mode<synchronous>, transform_indices = @transform_4, window_bounds = array<i64: 128, 128>}, {pipeline_mode = #tpu.pipeline_mode<synchronous>, transform_indices = @transform_5, window_bounds = array<i64: 1, 128>}, {pipeline_mode = #tpu.pipeline_mode<synchronous>, transform_indices = @transform_6, window_bounds = array<i64: 2, 128, 128>}, {pipeline_mode = #tpu.pipeline_mode<synchronous>, transform_indices = @transform_7, window_bounds = array<i64: 2, 1, 128>}, {pipeline_mode = #tpu.pipeline_mode<synchronous>, transform_indices = @transform_8, window_bounds = array<i64: 2, 1, 128>}, {pipeline_mode = #tpu.pipeline_mode<synchronous>, transform_indices = @transform_9, window_bounds = array<i64: 1, 128, 128>}, {pipeline_mode = #tpu.pipeline_mode<synchronous>, transform_indices = @transform_10, window_bounds = array<i64: 1, 1, 128>}, {pipeline_mode = #tpu.pipeline_mode<synchronous>, transform_indices = @transform_11, window_bounds = array<i64: 1, 128, 128>}, {pipeline_mode = #tpu.pipeline_mode<synchronous>, transform_indices = @transform_12, window_bounds = array<i64: 1, 1, 128>}, {transform_indices = @transform_13, window_bounds = array<i64: 1, 128, 128>}]} {
    %c0 = arith.constant 0 : index
    %c0_0 = arith.constant 0 : index
    %c0_1 = arith.constant 0 : index
    %0 = vector.load %arg1[%c0, %c0_0, %c0_1] : memref<1x128x128xf32, #tpu.memory_space<vmem>>, vector<1x128x128xf32>
    %1 = vector.shape_cast %0 : vector<1x128x128xf32> to vector<128x128xf32>
    %c0_2 = arith.constant 0 : index
    %c0_3 = arith.constant 0 : index
    %c0_4 = arith.constant 0 : index
    %2 = vector.load %arg2[%c0_2, %c0_3, %c0_4] : memref<1x8x128xi32, #tpu.memory_space<vmem>>, vector<1x8x128xi32>
    %3 = vector.shape_cast %2 : vector<1x8x128xi32> to vector<8x128xi32>
    %4 = tpu.iota {dimensions = array<i32: 0>} : vector<128x128xi32>
    %5 = vector.extract_strided_slice %3 {offsets = [0, 0], sizes = [1, 128], strides = [1, 1]} : vector<8x128xi32> to vector<1x128xi32>
    %6 = vector.shape_cast %5 : vector<1x128xi32> to vector<128xi32>
    %7 = vector.shape_cast %6 : vector<128xi32> to vector<1x128xi32>
    %8 = vector.broadcast %7 : vector<1x128xi32> to vector<128x128xi32>
    %9 = arith.cmpi eq, %4, %8 : vector<128x128xi32>
    %10 = arith.extui %9 : vector<128x128xi1> to vector<128x128xi32>
    %11 = arith.sitofp %10 : vector<128x128xi32> to vector<128x128xf32>
    %12 = tpu.transpose %11, [1, 0] : vector<128x128xf32> -> vector<128x128xf32>
    %13 = arith.truncf %12 : vector<128x128xf32> to vector<128x128xbf16>
    %c0_5 = arith.constant 0 : index
    %c0_6 = arith.constant 0 : index
    %c0_7 = arith.constant 0 : index
    %14 = vector.load %arg15[%c0_5, %c0_6, %c0_7] : memref<8x128x128xbf16, #tpu.memory_space<vmem>>, vector<1x128x128xbf16>
    %15 = vector.shape_cast %14 : vector<1x128x128xbf16> to vector<128x128xbf16>
    %16 = vector.shape_cast %13 : vector<128x128xbf16> to vector<1x128x128xbf16>
    tpu.vector_store %arg15[%c0_5, %c0_6, %c0_7], %16 {strides = array<i32>} : memref<8x128x128xbf16, #tpu.memory_space<vmem>>, vector<1x128x128xbf16>,
    %17 = vector.extract_strided_slice %3 {offsets = [1, 0], sizes = [1, 128], strides = [1, 1]} : vector<8x128xi32> to vector<1x128xi32>
    %18 = vector.shape_cast %17 : vector<1x128xi32> to vector<128xi32>
    %19 = vector.shape_cast %18 : vector<128xi32> to vector<1x128xi32>
    %20 = vector.broadcast %19 : vector<1x128xi32> to vector<128x128xi32>
    %21 = arith.cmpi eq, %4, %20 : vector<128x128xi32>
    %22 = arith.extui %21 : vector<128x128xi1> to vector<128x128xi32>
    %23 = arith.sitofp %22 : vector<128x128xi32> to vector<128x128xf32>
    %24 = tpu.transpose %23, [1, 0] : vector<128x128xf32> -> vector<128x128xf32>
    %25 = arith.truncf %24 : vector<128x128xf32> to vector<128x128xbf16>
    %c1 = arith.constant 1 : index
    %c0_8 = arith.constant 0 : index
    %c0_9 = arith.constant 0 : index
    %26 = vector.load %arg15[%c1, %c0_8, %c0_9] : memref<8x128x128xbf16, #tpu.memory_space<vmem>>, vector<1x128x128xbf16>
    %27 = vector.shape_cast %26 : vector<1x128x128xbf16> to vector<128x128xbf16>
    %28 = vector.shape_cast %25 : vector<128x128xbf16> to vector<1x128x128xbf16>
    tpu.vector_store %arg15[%c1, %c0_8, %c0_9], %28 {strides = array<i32>} : memref<8x128x128xbf16, #tpu.memory_space<vmem>>, vector<1x128x128xbf16>,
    %29 = vector.extract_strided_slice %3 {offsets = [2, 0], sizes = [1, 128], strides = [1, 1]} : vector<8x128xi32> to vector<1x128xi32>
    %30 = vector.shape_cast %29 : vector<1x128xi32> to vector<128xi32>
    %31 = vector.shape_cast %30 : vector<128xi32> to vector<1x128xi32>
    %32 = vector.broadcast %31 : vector<1x128xi32> to vector<128x128xi32>
    %33 = arith.cmpi eq, %4, %32 : vector<128x128xi32>
    %34 = arith.extui %33 : vector<128x128xi1> to vector<128x128xi32>
    %35 = arith.sitofp %34 : vector<128x128xi32> to vector<128x128xf32>
    %36 = tpu.transpose %35, [1, 0] : vector<128x128xf32> -> vector<128x128xf32>
    %37 = arith.truncf %36 : vector<128x128xf32> to vector<128x128xbf16>
    %c2 = arith.constant 2 : index
    %c0_10 = arith.constant 0 : index
    %c0_11 = arith.constant 0 : index
    %38 = vector.load %arg15[%c2, %c0_10, %c0_11] : memref<8x128x128xbf16, #tpu.memory_space<vmem>>, vector<1x128x128xbf16>
    %39 = vector.shape_cast %38 : vector<1x128x128xbf16> to vector<128x128xbf16>
    %40 = vector.shape_cast %37 : vector<128x128xbf16> to vector<1x128x128xbf16>
    tpu.vector_store %arg15[%c2, %c0_10, %c0_11], %40 {strides = array<i32>} : memref<8x128x128xbf16, #tpu.memory_space<vmem>>, vector<1x128x128xbf16>,
    %41 = vector.extract_strided_slice %3 {offsets = [3, 0], sizes = [1, 128], strides = [1, 1]} : vector<8x128xi32> to vector<1x128xi32>
    %42 = vector.shape_cast %41 : vector<1x128xi32> to vector<128xi32>
    %43 = vector.shape_cast %42 : vector<128xi32> to vector<1x128xi32>
    %44 = vector.broadcast %43 : vector<1x128xi32> to vector<128x128xi32>
    %45 = arith.cmpi eq, %4, %44 : vector<128x128xi32>
    %46 = arith.extui %45 : vector<128x128xi1> to vector<128x128xi32>
    %47 = arith.sitofp %46 : vector<128x128xi32> to vector<128x128xf32>
    %48 = tpu.transpose %47, [1, 0] : vector<128x128xf32> -> vector<128x128xf32>
    %49 = arith.truncf %48 : vector<128x128xf32> to vector<128x128xbf16>
    %c3 = arith.constant 3 : index
    %c0_12 = arith.constant 0 : index
    %c0_13 = arith.constant 0 : index
    %50 = vector.load %arg15[%c3, %c0_12, %c0_13] : memref<8x128x128xbf16, #tpu.memory_space<vmem>>, vector<1x128x128xbf16>
    %51 = vector.shape_cast %50 : vector<1x128x128xbf16> to vector<128x128xbf16>
    %52 = vector.shape_cast %49 : vector<128x128xbf16> to vector<1x128x128xbf16>
    tpu.vector_store %arg15[%c3, %c0_12, %c0_13], %52 {strides = array<i32>} : memref<8x128x128xbf16, #tpu.memory_space<vmem>>, vector<1x128x128xbf16>,
    %53 = vector.extract_strided_slice %3 {offsets = [4, 0], sizes = [1, 128], strides = [1, 1]} : vector<8x128xi32> to vector<1x128xi32>
    %54 = vector.shape_cast %53 : vector<1x128xi32> to vector<128xi32>
    %55 = vector.shape_cast %54 : vector<128xi32> to vector<1x128xi32>
    %56 = vector.broadcast %55 : vector<1x128xi32> to vector<128x128xi32>
    %57 = arith.cmpi eq, %4, %56 : vector<128x128xi32>
    %58 = arith.extui %57 : vector<128x128xi1> to vector<128x128xi32>
    %59 = arith.sitofp %58 : vector<128x128xi32> to vector<128x128xf32>
    %60 = tpu.transpose %59, [1, 0] : vector<128x128xf32> -> vector<128x128xf32>
    %61 = arith.truncf %60 : vector<128x128xf32> to vector<128x128xbf16>
    %c4 = arith.constant 4 : index
    %c0_14 = arith.constant 0 : index
    %c0_15 = arith.constant 0 : index
    %62 = vector.load %arg15[%c4, %c0_14, %c0_15] : memref<8x128x128xbf16, #tpu.memory_space<vmem>>, vector<1x128x128xbf16>
    %63 = vector.shape_cast %62 : vector<1x128x128xbf16> to vector<128x128xbf16>
    %64 = vector.shape_cast %61 : vector<128x128xbf16> to vector<1x128x128xbf16>
    tpu.vector_store %arg15[%c4, %c0_14, %c0_15], %64 {strides = array<i32>} : memref<8x128x128xbf16, #tpu.memory_space<vmem>>, vector<1x128x128xbf16>,
    %65 = vector.extract_strided_slice %3 {offsets = [5, 0], sizes = [1, 128], strides = [1, 1]} : vector<8x128xi32> to vector<1x128xi32>
    %66 = vector.shape_cast %65 : vector<1x128xi32> to vector<128xi32>
    %67 = vector.shape_cast %66 : vector<128xi32> to vector<1x128xi32>
    %68 = vector.broadcast %67 : vector<1x128xi32> to vector<128x128xi32>
    %69 = arith.cmpi eq, %4, %68 : vector<128x128xi32>
    %70 = arith.extui %69 : vector<128x128xi1> to vector<128x128xi32>
    %71 = arith.sitofp %70 : vector<128x128xi32> to vector<128x128xf32>
    %72 = tpu.transpose %71, [1, 0] : vector<128x128xf32> -> vector<128x128xf32>
    %73 = arith.truncf %72 : vector<128x128xf32> to vector<128x128xbf16>
    %c5 = arith.constant 5 : index
    %c0_16 = arith.constant 0 : index
    %c0_17 = arith.constant 0 : index
    %74 = vector.load %arg15[%c5, %c0_16, %c0_17] : memref<8x128x128xbf16, #tpu.memory_space<vmem>>, vector<1x128x128xbf16>
    %75 = vector.shape_cast %74 : vector<1x128x128xbf16> to vector<128x128xbf16>
    %76 = vector.shape_cast %73 : vector<128x128xbf16> to vector<1x128x128xbf16>
    tpu.vector_store %arg15[%c5, %c0_16, %c0_17], %76 {strides = array<i32>} : memref<8x128x128xbf16, #tpu.memory_space<vmem>>, vector<1x128x128xbf16>,
    %77 = vector.extract_strided_slice %3 {offsets = [6, 0], sizes = [1, 128], strides = [1, 1]} : vector<8x128xi32> to vector<1x128xi32>
    %78 = vector.shape_cast %77 : vector<1x128xi32> to vector<128xi32>
    %79 = vector.shape_cast %78 : vector<128xi32> to vector<1x128xi32>
    %80 = vector.broadcast %79 : vector<1x128xi32> to vector<128x128xi32>
    %81 = arith.cmpi eq, %4, %80 : vector<128x128xi32>
    %82 = arith.extui %81 : vector<128x128xi1> to vector<128x128xi32>
    %83 = arith.sitofp %82 : vector<128x128xi32> to vector<128x128xf32>
    %84 = tpu.transpose %83, [1, 0] : vector<128x128xf32> -> vector<128x128xf32>
    %85 = arith.truncf %84 : vector<128x128xf32> to vector<128x128xbf16>
    %c6 = arith.constant 6 : index
    %c0_18 = arith.constant 0 : index
    %c0_19 = arith.constant 0 : index
    %86 = vector.load %arg15[%c6, %c0_18, %c0_19] : memref<8x128x128xbf16, #tpu.memory_space<vmem>>, vector<1x128x128xbf16>
    %87 = vector.shape_cast %86 : vector<1x128x128xbf16> to vector<128x128xbf16>
    %88 = vector.shape_cast %85 : vector<128x128xbf16> to vector<1x128x128xbf16>
    tpu.vector_store %arg15[%c6, %c0_18, %c0_19], %88 {strides = array<i32>} : memref<8x128x128xbf16, #tpu.memory_space<vmem>>, vector<1x128x128xbf16>,
    %89 = vector.extract_strided_slice %3 {offsets = [7, 0], sizes = [1, 128], strides = [1, 1]} : vector<8x128xi32> to vector<1x128xi32>
    %90 = vector.shape_cast %89 : vector<1x128xi32> to vector<128xi32>
    %91 = vector.shape_cast %90 : vector<128xi32> to vector<1x128xi32>
    %92 = vector.broadcast %91 : vector<1x128xi32> to vector<128x128xi32>
    %93 = arith.cmpi eq, %4, %92 : vector<128x128xi32>
    %94 = arith.extui %93 : vector<128x128xi1> to vector<128x128xi32>
    %95 = arith.sitofp %94 : vector<128x128xi32> to vector<128x128xf32>
    %96 = tpu.transpose %95, [1, 0] : vector<128x128xf32> -> vector<128x128xf32>
    %97 = arith.truncf %96 : vector<128x128xf32> to vector<128x128xbf16>
    %c7 = arith.constant 7 : index
    %c0_20 = arith.constant 0 : index
    %c0_21 = arith.constant 0 : index
    %98 = vector.load %arg15[%c7, %c0_20, %c0_21] : memref<8x128x128xbf16, #tpu.memory_space<vmem>>, vector<1x128x128xbf16>
    %99 = vector.shape_cast %98 : vector<1x128x128xbf16> to vector<128x128xbf16>
    %100 = vector.shape_cast %97 : vector<128x128xbf16> to vector<1x128x128xbf16>
    tpu.vector_store %arg15[%c7, %c0_20, %c0_21], %100 {strides = array<i32>} : memref<8x128x128xbf16, #tpu.memory_space<vmem>>, vector<1x128x128xbf16>,
    %101 = arith.truncf %1 : vector<128x128xf32> to vector<128x128xbf16>
    %c0_22 = arith.constant 0 : index
    %c0_23 = arith.constant 0 : index
    %102 = vector.load %arg3[%c0_22, %c0_23] : memref<128x128xbf16, #tpu.memory_space<vmem>>, vector<128x128xbf16>
    %c0_24 = arith.constant 0 : index
    %c0_25 = arith.constant 0 : index
    %103 = vector.load %arg4[%c0_24, %c0_25] : memref<1x128xf32, #tpu.memory_space<vmem>>, vector<1x128xf32>
    %c0_26 = arith.constant 0 : index
    %c0_27 = arith.constant 0 : index
    %104 = vector.load %arg5[%c0_26, %c0_27] : memref<128x128xbf16, #tpu.memory_space<vmem>>, vector<128x128xbf16>
    %c0_28 = arith.constant 0 : index
    %c0_29 = arith.constant 0 : index
    %105 = vector.load %arg6[%c0_28, %c0_29] : memref<1x128xf32, #tpu.memory_space<vmem>>, vector<1x128xf32>
    %cst = arith.constant dense<0.000000e+00> : vector<128x128xf32>
    %106 = tpu.matmul %101, %102, %cst {dimension_numbers = #tpu.dot_dimension_numbers<[1], [0], [0], [1], [0, 0, 1, 1], [], []>} : vector<128x128xbf16>, vector<128x128xbf16>, vector<128x128xf32> -> vector<128x128xf32>
    %107 = vector.broadcast %103 : vector<1x128xf32> to vector<128x128xf32>
    %108 = arith.addf %106, %107 : vector<128x128xf32>
    %109 = arith.mulf %108, %108 : vector<128x128xf32>
    %110 = arith.mulf %108, %109 : vector<128x128xf32>
    %cst_30 = arith.constant 4.471500e-02 : f32
    %111 = vector.broadcast %cst_30 : f32 to vector<128x128xf32>
    %112 = arith.mulf %111, %110 : vector<128x128xf32>
    %113 = arith.addf %108, %112 : vector<128x128xf32>
    %cst_31 = arith.constant 0.797884583 : f32
    %114 = vector.broadcast %cst_31 : f32 to vector<128x128xf32>
    %115 = arith.mulf %114, %113 : vector<128x128xf32>
    %116 = math.tanh %115 : vector<128x128xf32>
    %cst_32 = arith.constant 1.000000e+00 : f32
    %117 = vector.broadcast %cst_32 : f32 to vector<128x128xf32>
    %118 = arith.addf %117, %116 : vector<128x128xf32>
    %cst_33 = arith.constant 5.000000e-01 : f32
    %119 = vector.broadcast %cst_33 : f32 to vector<128x128xf32>
    %120 = arith.mulf %119, %118 : vector<128x128xf32>
    %121 = arith.mulf %108, %120 : vector<128x128xf32>
    %122 = arith.truncf %121 : vector<128x128xf32> to vector<128x128xbf16>
    %cst_34 = arith.constant dense<0.000000e+00> : vector<128x128xf32>
    %123 = tpu.matmul %122, %104, %cst_34 {dimension_numbers = #tpu.dot_dimension_numbers<[1], [0], [0], [1], [0, 0, 1, 1], [], []>} : vector<128x128xbf16>, vector<128x128xbf16>, vector<128x128xf32> -> vector<128x128xf32>
    %124 = vector.broadcast %105 : vector<1x128xf32> to vector<128x128xf32>
    %125 = arith.addf %123, %124 : vector<128x128xf32>
    %126 = arith.addf %1, %125 : vector<128x128xf32>
    %127 = arith.truncf %126 : vector<128x128xf32> to vector<128x128xbf16>
    %c0_35 = arith.constant 0 : index
    %c0_36 = arith.constant 0 : index
    %c0_37 = arith.constant 0 : index
    %128 = vector.load %arg7[%c0_35, %c0_36, %c0_37] : memref<2x128x128xbf16, #tpu.memory_space<vmem>>, vector<1x128x128xbf16>
    %129 = vector.shape_cast %128 : vector<1x128x128xbf16> to vector<128x128xbf16>
    %cst_38 = arith.constant dense<0.000000e+00> : vector<128x128xf32>
    %130 = tpu.matmul %127, %129, %cst_38 {dimension_numbers = #tpu.dot_dimension_numbers<[1], [0], [0], [1], [0, 0, 1, 1], [], []>} : vector<128x128xbf16>, vector<128x128xbf16>, vector<128x128xf32> -> vector<128x128xf32>
    %131 = arith.truncf %130 : vector<128x128xf32> to vector<128x128xbf16>
    %c0_39 = arith.constant 0 : index
    %c0_40 = arith.constant 0 : index
    %c0_41 = arith.constant 0 : index
    %132 = vector.load %arg15[%c0_39, %c0_40, %c0_41] : memref<8x128x128xbf16, #tpu.memory_space<vmem>>, vector<1x128x128xbf16>
    %133 = vector.shape_cast %132 : vector<1x128x128xbf16> to vector<128x128xbf16>
    %cst_42 = arith.constant dense<0.000000e+00> : vector<128x128xf32>
    %134 = tpu.matmul %133, %131, %cst_42 {dimension_numbers = #tpu.dot_dimension_numbers<[1], [0], [0], [1], [0, 0, 1, 1], [], []>} : vector<128x128xbf16>, vector<128x128xbf16>, vector<128x128xf32> -> vector<128x128xf32>
    %c1_43 = arith.constant 1 : index
    %c0_44 = arith.constant 0 : index
    %c0_45 = arith.constant 0 : index
    %135 = vector.load %arg15[%c1_43, %c0_44, %c0_45] : memref<8x128x128xbf16, #tpu.memory_space<vmem>>, vector<1x128x128xbf16>
    %136 = vector.shape_cast %135 : vector<1x128x128xbf16> to vector<128x128xbf16>
    %cst_46 = arith.constant dense<0.000000e+00> : vector<128x128xf32>
    %137 = tpu.matmul %136, %131, %cst_46 {dimension_numbers = #tpu.dot_dimension_numbers<[1], [0], [0], [1], [0, 0, 1, 1], [], []>} : vector<128x128xbf16>, vector<128x128xbf16>, vector<128x128xf32> -> vector<128x128xf32>
    %138 = arith.maximumf %134, %137 : vector<128x128xf32>
    %c2_47 = arith.constant 2 : index
    %c0_48 = arith.constant 0 : index
    %c0_49 = arith.constant 0 : index
    %139 = vector.load %arg15[%c2_47, %c0_48, %c0_49] : memref<8x128x128xbf16, #tpu.memory_space<vmem>>, vector<1x128x128xbf16>
    %140 = vector.shape_cast %139 : vector<1x128x128xbf16> to vector<128x128xbf16>
    %cst_50 = arith.constant dense<0.000000e+00> : vector<128x128xf32>
    %141 = tpu.matmul %140, %131, %cst_50 {dimension_numbers = #tpu.dot_dimension_numbers<[1], [0], [0], [1], [0, 0, 1, 1], [], []>} : vector<128x128xbf16>, vector<128x128xbf16>, vector<128x128xf32> -> vector<128x128xf32>
    %142 = arith.maximumf %138, %141 : vector<128x128xf32>
    %c3_51 = arith.constant 3 : index
    %c0_52 = arith.constant 0 : index
    %c0_53 = arith.constant 0 : index
    %143 = vector.load %arg15[%c3_51, %c0_52, %c0_53] : memref<8x128x128xbf16, #tpu.memory_space<vmem>>, vector<1x128x128xbf16>
    %144 = vector.shape_cast %143 : vector<1x128x128xbf16> to vector<128x128xbf16>
    %cst_54 = arith.constant dense<0.000000e+00> : vector<128x128xf32>
    %145 = tpu.matmul %144, %131, %cst_54 {dimension_numbers = #tpu.dot_dimension_numbers<[1], [0], [0], [1], [0, 0, 1, 1], [], []>} : vector<128x128xbf16>, vector<128x128xbf16>, vector<128x128xf32> -> vector<128x128xf32>
    %146 = arith.maximumf %142, %145 : vector<128x128xf32>
    %c4_55 = arith.constant 4 : index
    %c0_56 = arith.constant 0 : index
    %c0_57 = arith.constant 0 : index
    %147 = vector.load %arg15[%c4_55, %c0_56, %c0_57] : memref<8x128x128xbf16, #tpu.memory_space<vmem>>, vector<1x128x128xbf16>
    %148 = vector.shape_cast %147 : vector<1x128x128xbf16> to vector<128x128xbf16>
    %cst_58 = arith.constant dense<0.000000e+00> : vector<128x128xf32>
    %149 = tpu.matmul %148, %131, %cst_58 {dimension_numbers = #tpu.dot_dimension_numbers<[1], [0], [0], [1], [0, 0, 1, 1], [], []>} : vector<128x128xbf16>, vector<128x128xbf16>, vector<128x128xf32> -> vector<128x128xf32>
    %150 = arith.maximumf %146, %149 : vector<128x128xf32>
    %c5_59 = arith.constant 5 : index
    %c0_60 = arith.constant 0 : index
    %c0_61 = arith.constant 0 : index
    %151 = vector.load %arg15[%c5_59, %c0_60, %c0_61] : memref<8x128x128xbf16, #tpu.memory_space<vmem>>, vector<1x128x128xbf16>
    %152 = vector.shape_cast %151 : vector<1x128x128xbf16> to vector<128x128xbf16>
    %cst_62 = arith.constant dense<0.000000e+00> : vector<128x128xf32>
    %153 = tpu.matmul %152, %131, %cst_62 {dimension_numbers = #tpu.dot_dimension_numbers<[1], [0], [0], [1], [0, 0, 1, 1], [], []>} : vector<128x128xbf16>, vector<128x128xbf16>, vector<128x128xf32> -> vector<128x128xf32>
    %154 = arith.maximumf %150, %153 : vector<128x128xf32>
    %c6_63 = arith.constant 6 : index
    %c0_64 = arith.constant 0 : index
    %c0_65 = arith.constant 0 : index
    %155 = vector.load %arg15[%c6_63, %c0_64, %c0_65] : memref<8x128x128xbf16, #tpu.memory_space<vmem>>, vector<1x128x128xbf16>
    %156 = vector.shape_cast %155 : vector<1x128x128xbf16> to vector<128x128xbf16>
    %cst_66 = arith.constant dense<0.000000e+00> : vector<128x128xf32>
    %157 = tpu.matmul %156, %131, %cst_66 {dimension_numbers = #tpu.dot_dimension_numbers<[1], [0], [0], [1], [0, 0, 1, 1], [], []>} : vector<128x128xbf16>, vector<128x128xbf16>, vector<128x128xf32> -> vector<128x128xf32>
    %158 = arith.maximumf %154, %157 : vector<128x128xf32>
    %c7_67 = arith.constant 7 : index
    %c0_68 = arith.constant 0 : index
    %c0_69 = arith.constant 0 : index
    %159 = vector.load %arg15[%c7_67, %c0_68, %c0_69] : memref<8x128x128xbf16, #tpu.memory_space<vmem>>, vector<1x128x128xbf16>
    %160 = vector.shape_cast %159 : vector<1x128x128xbf16> to vector<128x128xbf16>
    %cst_70 = arith.constant dense<0.000000e+00> : vector<128x128xf32>
    %161 = tpu.matmul %160, %131, %cst_70 {dimension_numbers = #tpu.dot_dimension_numbers<[1], [0], [0], [1], [0, 0, 1, 1], [], []>} : vector<128x128xbf16>, vector<128x128xbf16>, vector<128x128xf32> -> vector<128x128xf32>
    %162 = arith.maximumf %158, %161 : vector<128x128xf32>
    %163 = arith.subf %162, %130 : vector<128x128xf32>
    %c0_71 = arith.constant 0 : index
    %c0_72 = arith.constant 0 : index
    %c0_73 = arith.constant 0 : index
    %164 = vector.load %arg8[%c0_71, %c0_72, %c0_73] : memref<2x1x128xf32, #tpu.memory_space<vmem>>, vector<1x1x128xf32>
    %165 = vector.shape_cast %164 : vector<1x1x128xf32> to vector<1x128xf32>
    %166 = vector.broadcast %165 : vector<1x128xf32> to vector<128x128xf32>
    %167 = arith.mulf %163, %166 : vector<128x128xf32>
    %168 = arith.addf %126, %167 : vector<128x128xf32>
    %c0_74 = arith.constant 0 : index
    %c0_75 = arith.constant 0 : index
    %c0_76 = arith.constant 0 : index
    %169 = vector.load %arg9[%c0_74, %c0_75, %c0_76] : memref<2x1x128xf32, #tpu.memory_space<vmem>>, vector<1x1x128xf32>
    %170 = vector.shape_cast %169 : vector<1x1x128xf32> to vector<1x128xf32>
    %171 = vector.broadcast %170 : vector<1x128xf32> to vector<128x128xf32>
    %172 = arith.addf %168, %171 : vector<128x128xf32>
    %173 = arith.truncf %172 : vector<128x128xf32> to vector<128x128xbf16>
    %c1_77 = arith.constant 1 : index
    %c0_78 = arith.constant 0 : index
    %c0_79 = arith.constant 0 : index
    %174 = vector.load %arg7[%c1_77, %c0_78, %c0_79] : memref<2x128x128xbf16, #tpu.memory_space<vmem>>, vector<1x128x128xbf16>
    %175 = vector.shape_cast %174 : vector<1x128x128xbf16> to vector<128x128xbf16>
    %cst_80 = arith.constant dense<0.000000e+00> : vector<128x128xf32>
    %176 = tpu.matmul %173, %175, %cst_80 {dimension_numbers = #tpu.dot_dimension_numbers<[1], [0], [0], [1], [0, 0, 1, 1], [], []>} : vector<128x128xbf16>, vector<128x128xbf16>, vector<128x128xf32> -> vector<128x128xf32>
    %177 = arith.truncf %176 : vector<128x128xf32> to vector<128x128xbf16>
    %c0_81 = arith.constant 0 : index
    %c0_82 = arith.constant 0 : index
    %c0_83 = arith.constant 0 : index
    %178 = vector.load %arg15[%c0_81, %c0_82, %c0_83] : memref<8x128x128xbf16, #tpu.memory_space<vmem>>, vector<1x128x128xbf16>
    %179 = vector.shape_cast %178 : vector<1x128x128xbf16> to vector<128x128xbf16>
    %cst_84 = arith.constant dense<0.000000e+00> : vector<128x128xf32>
    %180 = tpu.matmul %179, %177, %cst_84 {dimension_numbers = #tpu.dot_dimension_numbers<[1], [0], [0], [1], [0, 0, 1, 1], [], []>} : vector<128x128xbf16>, vector<128x128xbf16>, vector<128x128xf32> -> vector<128x128xf32>
    %c1_85 = arith.constant 1 : index
    %c0_86 = arith.constant 0 : index
    %c0_87 = arith.constant 0 : index
    %181 = vector.load %arg15[%c1_85, %c0_86, %c0_87] : memref<8x128x128xbf16, #tpu.memory_space<vmem>>, vector<1x128x128xbf16>
    %182 = vector.shape_cast %181 : vector<1x128x128xbf16> to vector<128x128xbf16>
    %cst_88 = arith.constant dense<0.000000e+00> : vector<128x128xf32>
    %183 = tpu.matmul %182, %177, %cst_88 {dimension_numbers = #tpu.dot_dimension_numbers<[1], [0], [0], [1], [0, 0, 1, 1], [], []>} : vector<128x128xbf16>, vector<128x128xbf16>, vector<128x128xf32> -> vector<128x128xf32>
    %184 = arith.maximumf %180, %183 : vector<128x128xf32>
    %c2_89 = arith.constant 2 : index
    %c0_90 = arith.constant 0 : index
    %c0_91 = arith.constant 0 : index
    %185 = vector.load %arg15[%c2_89, %c0_90, %c0_91] : memref<8x128x128xbf16, #tpu.memory_space<vmem>>, vector<1x128x128xbf16>
    %186 = vector.shape_cast %185 : vector<1x128x128xbf16> to vector<128x128xbf16>
    %cst_92 = arith.constant dense<0.000000e+00> : vector<128x128xf32>
    %187 = tpu.matmul %186, %177, %cst_92 {dimension_numbers = #tpu.dot_dimension_numbers<[1], [0], [0], [1], [0, 0, 1, 1], [], []>} : vector<128x128xbf16>, vector<128x128xbf16>, vector<128x128xf32> -> vector<128x128xf32>
    %188 = arith.maximumf %184, %187 : vector<128x128xf32>
    %c3_93 = arith.constant 3 : index
    %c0_94 = arith.constant 0 : index
    %c0_95 = arith.constant 0 : index
    %189 = vector.load %arg15[%c3_93, %c0_94, %c0_95] : memref<8x128x128xbf16, #tpu.memory_space<vmem>>, vector<1x128x128xbf16>
    %190 = vector.shape_cast %189 : vector<1x128x128xbf16> to vector<128x128xbf16>
    %cst_96 = arith.constant dense<0.000000e+00> : vector<128x128xf32>
    %191 = tpu.matmul %190, %177, %cst_96 {dimension_numbers = #tpu.dot_dimension_numbers<[1], [0], [0], [1], [0, 0, 1, 1], [], []>} : vector<128x128xbf16>, vector<128x128xbf16>, vector<128x128xf32> -> vector<128x128xf32>
    %192 = arith.maximumf %188, %191 : vector<128x128xf32>
    %c4_97 = arith.constant 4 : index
    %c0_98 = arith.constant 0 : index
    %c0_99 = arith.constant 0 : index
    %193 = vector.load %arg15[%c4_97, %c0_98, %c0_99] : memref<8x128x128xbf16, #tpu.memory_space<vmem>>, vector<1x128x128xbf16>
    %194 = vector.shape_cast %193 : vector<1x128x128xbf16> to vector<128x128xbf16>
    %cst_100 = arith.constant dense<0.000000e+00> : vector<128x128xf32>
    %195 = tpu.matmul %194, %177, %cst_100 {dimension_numbers = #tpu.dot_dimension_numbers<[1], [0], [0], [1], [0, 0, 1, 1], [], []>} : vector<128x128xbf16>, vector<128x128xbf16>, vector<128x128xf32> -> vector<128x128xf32>
    %196 = arith.maximumf %192, %195 : vector<128x128xf32>
    %c5_101 = arith.constant 5 : index
    %c0_102 = arith.constant 0 : index
    %c0_103 = arith.constant 0 : index
    %197 = vector.load %arg15[%c5_101, %c0_102, %c0_103] : memref<8x128x128xbf16, #tpu.memory_space<vmem>>, vector<1x128x128xbf16>
    %198 = vector.shape_cast %197 : vector<1x128x128xbf16> to vector<128x128xbf16>
    %cst_104 = arith.constant dense<0.000000e+00> : vector<128x128xf32>
    %199 = tpu.matmul %198, %177, %cst_104 {dimension_numbers = #tpu.dot_dimension_numbers<[1], [0], [0], [1], [0, 0, 1, 1], [], []>} : vector<128x128xbf16>, vector<128x128xbf16>, vector<128x128xf32> -> vector<128x128xf32>
    %200 = arith.maximumf %196, %199 : vector<128x128xf32>
    %c6_105 = arith.constant 6 : index
    %c0_106 = arith.constant 0 : index
    %c0_107 = arith.constant 0 : index
    %201 = vector.load %arg15[%c6_105, %c0_106, %c0_107] : memref<8x128x128xbf16, #tpu.memory_space<vmem>>, vector<1x128x128xbf16>
    %202 = vector.shape_cast %201 : vector<1x128x128xbf16> to vector<128x128xbf16>
    %cst_108 = arith.constant dense<0.000000e+00> : vector<128x128xf32>
    %203 = tpu.matmul %202, %177, %cst_108 {dimension_numbers = #tpu.dot_dimension_numbers<[1], [0], [0], [1], [0, 0, 1, 1], [], []>} : vector<128x128xbf16>, vector<128x128xbf16>, vector<128x128xf32> -> vector<128x128xf32>
    %204 = arith.maximumf %200, %203 : vector<128x128xf32>
    %c7_109 = arith.constant 7 : index
    %c0_110 = arith.constant 0 : index
    %c0_111 = arith.constant 0 : index
    %205 = vector.load %arg15[%c7_109, %c0_110, %c0_111] : memref<8x128x128xbf16, #tpu.memory_space<vmem>>, vector<1x128x128xbf16>
    %206 = vector.shape_cast %205 : vector<1x128x128xbf16> to vector<128x128xbf16>
    %cst_112 = arith.constant dense<0.000000e+00> : vector<128x128xf32>
    %207 = tpu.matmul %206, %177, %cst_112 {dimension_numbers = #tpu.dot_dimension_numbers<[1], [0], [0], [1], [0, 0, 1, 1], [], []>} : vector<128x128xbf16>, vector<128x128xbf16>, vector<128x128xf32> -> vector<128x128xf32>
    %208 = arith.maximumf %204, %207 : vector<128x128xf32>
    %209 = arith.subf %208, %176 : vector<128x128xf32>
    %c1_113 = arith.constant 1 : index
    %c0_114 = arith.constant 0 : index
    %c0_115 = arith.constant 0 : index
    %210 = vector.load %arg8[%c1_113, %c0_114, %c0_115] : memref<2x1x128xf32, #tpu.memory_space<vmem>>, vector<1x1x128xf32>
    %211 = vector.shape_cast %210 : vector<1x1x128xf32> to vector<1x128xf32>
    %212 = vector.broadcast %211 : vector<1x128xf32> to vector<128x128xf32>
    %213 = arith.mulf %209, %212 : vector<128x128xf32>
    %214 = arith.addf %172, %213 : vector<128x128xf32>
    %c1_116 = arith.constant 1 : index
    %c0_117 = arith.constant 0 : index
    %c0_118 = arith.constant 0 : index
    %215 = vector.load %arg9[%c1_116, %c0_117, %c0_118] : memref<2x1x128xf32, #tpu.memory_space<vmem>>, vector<1x1x128xf32>
    %216 = vector.shape_cast %215 : vector<1x1x128xf32> to vector<1x128xf32>
    %217 = vector.broadcast %216 : vector<1x128xf32> to vector<128x128xf32>
    %218 = arith.addf %214, %217 : vector<128x128xf32>
    %219 = arith.truncf %218 : vector<128x128xf32> to vector<128x128xbf16>
    %c0_119 = arith.constant 0 : index
    %c0_120 = arith.constant 0 : index
    %c0_121 = arith.constant 0 : index
    %220 = vector.load %arg10[%c0_119, %c0_120, %c0_121] : memref<1x128x128xbf16, #tpu.memory_space<vmem>>, vector<1x128x128xbf16>
    %221 = vector.shape_cast %220 : vector<1x128x128xbf16> to vector<128x128xbf16>
    %c0_122 = arith.constant 0 : index
    %c0_123 = arith.constant 0 : index
    %c0_124 = arith.constant 0 : index
    %222 = vector.load %arg11[%c0_122, %c0_123, %c0_124] : memref<1x1x128xf32, #tpu.memory_space<vmem>>, vector<1x1x128xf32>
    %223 = vector.shape_cast %222 : vector<1x1x128xf32> to vector<1x128xf32>
    %c0_125 = arith.constant 0 : index
    %c0_126 = arith.constant 0 : index
    %c0_127 = arith.constant 0 : index
    %224 = vector.load %arg12[%c0_125, %c0_126, %c0_127] : memref<1x128x128xbf16, #tpu.memory_space<vmem>>, vector<1x128x128xbf16>
    %225 = vector.shape_cast %224 : vector<1x128x128xbf16> to vector<128x128xbf16>
    %c0_128 = arith.constant 0 : index
    %c0_129 = arith.constant 0 : index
    %c0_130 = arith.constant 0 : index
    %226 = vector.load %arg13[%c0_128, %c0_129, %c0_130] : memref<1x1x128xf32, #tpu.memory_space<vmem>>, vector<1x1x128xf32>
    %227 = vector.shape_cast %226 : vector<1x1x128xf32> to vector<1x128xf32>
    %cst_131 = arith.constant dense<0.000000e+00> : vector<128x128xf32>
    %228 = tpu.matmul %219, %221, %cst_131 {dimension_numbers = #tpu.dot_dimension_numbers<[1], [0], [0], [1], [0, 0, 1, 1], [], []>} : vector<128x128xbf16>, vector<128x128xbf16>, vector<128x128xf32> -> vector<128x128xf32>
    %229 = vector.broadcast %223 : vector<1x128xf32> to vector<128x128xf32>
    %230 = arith.addf %228, %229 : vector<128x128xf32>
    %231 = arith.mulf %230, %230 : vector<128x128xf32>
    %232 = arith.mulf %230, %231 : vector<128x128xf32>
    %cst_132 = arith.constant 4.471500e-02 : f32
    %233 = vector.broadcast %cst_132 : f32 to vector<128x128xf32>
    %234 = arith.mulf %233, %232 : vector<128x128xf32>
    %235 = arith.addf %230, %234 : vector<128x128xf32>
    %cst_133 = arith.constant 0.797884583 : f32
    %236 = vector.broadcast %cst_133 : f32 to vector<128x128xf32>
    %237 = arith.mulf %236, %235 : vector<128x128xf32>
    %238 = math.tanh %237 : vector<128x128xf32>
    %cst_134 = arith.constant 1.000000e+00 : f32
    %239 = vector.broadcast %cst_134 : f32 to vector<128x128xf32>
    %240 = arith.addf %239, %238 : vector<128x128xf32>
    %cst_135 = arith.constant 5.000000e-01 : f32
    %241 = vector.broadcast %cst_135 : f32 to vector<128x128xf32>
    %242 = arith.mulf %241, %240 : vector<128x128xf32>
    %243 = arith.mulf %230, %242 : vector<128x128xf32>
    %244 = arith.truncf %243 : vector<128x128xf32> to vector<128x128xbf16>
    %cst_136 = arith.constant dense<0.000000e+00> : vector<128x128xf32>
    %245 = tpu.matmul %244, %225, %cst_136 {dimension_numbers = #tpu.dot_dimension_numbers<[1], [0], [0], [1], [0, 0, 1, 1], [], []>} : vector<128x128xbf16>, vector<128x128xbf16>, vector<128x128xf32> -> vector<128x128xf32>
    %246 = vector.broadcast %227 : vector<1x128xf32> to vector<128x128xf32>
    %247 = arith.addf %245, %246 : vector<128x128xf32>
    %248 = arith.addf %218, %247 : vector<128x128xf32>
    %c0_137 = arith.constant 0 : index
    %c0_138 = arith.constant 0 : index
    %c0_139 = arith.constant 0 : index
    %249 = vector.load %arg14[%c0_137, %c0_138, %c0_139] : memref<1x128x128xf32, #tpu.memory_space<vmem>>, vector<1x128x128xf32>
    %250 = vector.shape_cast %249 : vector<1x128x128xf32> to vector<128x128xf32>
    %251 = vector.shape_cast %248 : vector<128x128xf32> to vector<1x128x128xf32>
    tpu.vector_store %arg14[%c0_137, %c0_138, %c0_139], %251 {strides = array<i32>} : memref<1x128x128xf32, #tpu.memory_space<vmem>>, vector<1x128x128xf32>,
    return
  }
  func.func @transform_0(%arg0: i32) -> (i32, i32, i32) {
    %c0_i32 = arith.constant 0 : i32
    %c0_i32_0 = arith.constant 0 : i32
    %c0_i32_1 = arith.constant 0 : i32
    return %arg0, %c0_i32, %c0_i32_0 : i32, i32, i32
  }
  func.func @transform_1(%arg0: i32) -> (i32, i32, i32) {
    %c0_i32 = arith.constant 0 : i32
    %c0_i32_0 = arith.constant 0 : i32
    %c0_i32_1 = arith.constant 0 : i32
    return %arg0, %c0_i32, %c0_i32_0 : i32, i32, i32
  }
  func.func @transform_2(%arg0: i32) -> (i32, i32) {
    %c0_i32 = arith.constant 0 : i32
    %c0_i32_0 = arith.constant 0 : i32
    %c0_i32_1 = arith.constant 0 : i32
    return %c0_i32, %c0_i32_0 : i32, i32
  }
  func.func @transform_3(%arg0: i32) -> (i32, i32) {
    %c0_i32 = arith.constant 0 : i32
    %c0_i32_0 = arith.constant 0 : i32
    %c0_i32_1 = arith.constant 0 : i32
    return %c0_i32, %c0_i32_0 : i32, i32
  }
  func.func @transform_4(%arg0: i32) -> (i32, i32) {
    %c0_i32 = arith.constant 0 : i32
    %c0_i32_0 = arith.constant 0 : i32
    %c0_i32_1 = arith.constant 0 : i32
    return %c0_i32, %c0_i32_0 : i32, i32
  }
  func.func @transform_5(%arg0: i32) -> (i32, i32) {
    %c0_i32 = arith.constant 0 : i32
    %c0_i32_0 = arith.constant 0 : i32
    %c0_i32_1 = arith.constant 0 : i32
    return %c0_i32, %c0_i32_0 : i32, i32
  }
  func.func @transform_6(%arg0: i32) -> (i32, i32, i32) {
    %c0_i32 = arith.constant 0 : i32
    %c0_i32_0 = arith.constant 0 : i32
    %c0_i32_1 = arith.constant 0 : i32
    %c0_i32_2 = arith.constant 0 : i32
    return %c0_i32, %c0_i32_0, %c0_i32_1 : i32, i32, i32
  }
  func.func @transform_7(%arg0: i32) -> (i32, i32, i32) {
    %c0_i32 = arith.constant 0 : i32
    %c0_i32_0 = arith.constant 0 : i32
    %c0_i32_1 = arith.constant 0 : i32
    %c0_i32_2 = arith.constant 0 : i32
    return %c0_i32, %c0_i32_0, %c0_i32_1 : i32, i32, i32
  }
  func.func @transform_8(%arg0: i32) -> (i32, i32, i32) {
    %c0_i32 = arith.constant 0 : i32
    %c0_i32_0 = arith.constant 0 : i32
    %c0_i32_1 = arith.constant 0 : i32
    %c0_i32_2 = arith.constant 0 : i32
    return %c0_i32, %c0_i32_0, %c0_i32_1 : i32, i32, i32
  }
  func.func @transform_9(%arg0: i32) -> (i32, i32, i32) {
    %c0_i32 = arith.constant 0 : i32
    %c0_i32_0 = arith.constant 0 : i32
    %c0_i32_1 = arith.constant 0 : i32
    %c0_i32_2 = arith.constant 0 : i32
    return %c0_i32, %c0_i32_0, %c0_i32_1 : i32, i32, i32
  }
  func.func @transform_10(%arg0: i32) -> (i32, i32, i32) {
    %c0_i32 = arith.constant 0 : i32
    %c0_i32_0 = arith.constant 0 : i32
    %c0_i32_1 = arith.constant 0 : i32
    %c0_i32_2 = arith.constant 0 : i32
    return %c0_i32, %c0_i32_0, %c0_i32_1 : i32, i32, i32
  }
  func.func @transform_11(%arg0: i32) -> (i32, i32, i32) {
    %c0_i32 = arith.constant 0 : i32
    %c0_i32_0 = arith.constant 0 : i32
    %c0_i32_1 = arith.constant 0 : i32
    %c0_i32_2 = arith.constant 0 : i32
    return %c0_i32, %c0_i32_0, %c0_i32_1 : i32, i32, i32
  }
  func.func @transform_12(%arg0: i32) -> (i32, i32, i32) {
    %c0_i32 = arith.constant 0 : i32
    %c0_i32_0 = arith.constant 0 : i32
    %c0_i32_1 = arith.constant 0 : i32
    %c0_i32_2 = arith.constant 0 : i32
    return %c0_i32, %c0_i32_0, %c0_i32_1 : i32, i32, i32
  }
  func.func @transform_13(%arg0: i32) -> (i32, i32, i32) {
    %c0_i32 = arith.constant 0 : i32
    %c0_i32_0 = arith.constant 0 : i32
    %c0_i32_1 = arith.constant 0 : i32
    return %arg0, %c0_i32, %c0_i32_0 : i32, i32, i32
  }
}

</mosaic_0001>

<bundles_post_ra>
// kernel: tpu_custom_call.1
= control target key start
LH: loop header
LB: loop body
LE: loop exit
PB: predicated region body
PF: predicated region fallthrough
CT: control target
= control target key end

     0   :  { %s11480_s0 = inlined_call_operand.hbm [shape: f32[2,128,128], index: 0, kind: input, shape index: {}]   ;;  %s11481_s1 = inlined_call_operand.hbm [shape: s32[2,8,128], index: 1, kind: input, shape index: {}]   ;;  %s11482_s2 = inlined_call_operand.hbm [shape: bf16[128,128], index: 2, kind: input, shape index: {}]   ;;  %s11483_s3 = inlined_call_operand.vmem [shape: f32[1,128], index: 3, kind: input, shape index: {}]   ;;  %s11484_s4 = inlined_call_operand.hbm [shape: bf16[128,128], index: 4, kind: input, shape index: {}]   ;;  %s11485_s5 = inlined_call_operand.vmem [shape: f32[1,128], index: 5, kind: input, shape index: {}]   ;;  %s11486_s6 = inlined_call_operand.hbm [shape: bf16[2,128,128], index: 6, kind: input, shape index: {}]   ;;  %s11487_s7 = inlined_call_operand.vmem [shape: f32[2,1,128], index: 7, kind: input, shape index: {}]   ;;  %s11488_s8 = inlined_call_operand.vmem [shape: f32[2,1,128], index: 8, kind: input, shape index: {}]   ;;  %s11489_s9 = inlined_call_operand.hbm [shape: bf16[1,128,128], index: 9, kind: input, shape index: {}]   ;;  %s11490_s10 = inlined_call_operand.vmem [shape: f32[1,1,128], index: 10, kind: input, shape index: {}]   ;;  %s11491_s11 = inlined_call_operand.hbm [shape: bf16[1,128,128], index: 11, kind: input, shape index: {}]   ;;  %s11492_s12 = inlined_call_operand.vmem [shape: f32[1,1,128], index: 12, kind: input, shape index: {}]   ;;  %s11493_s13 = inlined_call_operand.hbm [shape: f32[2,128,128], index: 13, kind: output, shape index: {}]  }
   0x1   :  { %11587 = sst [smem:[#allocation87_spill]] %s11480_s0 }
   0x2   :  { %11588 = sst [smem:[#allocation88_spill]] %s11482_s2 }
   0x3   :  { %11589 = sst [smem:[#allocation89_spill]] %s11484_s4 }
   0x4   :  { %11590 = sst [smem:[#allocation90_spill]] %s11486_s6 }
   0x5   :  { %11591 = sst [smem:[#allocation91_spill]] %s11489_s9 }
   0x6   :  { %11592 = sst [smem:[#allocation92_spill]] %s11491_s11 }
   0x7   :  { %11593 = sst [smem:[#allocation93_spill]] %s11493_s13 }
   0x8   :  { %18 = vsyncpa [#allocation4], 0 }
   0x9   :  { %20 = vsyncpa [#allocation4 + $0x1], 0 }
   0xa   :  { %21 = vsyncpa [#allocation7], 0 }
   0xb   :  { %23 = vsyncpa [#allocation7 + $0x1], 0 }
   0xc   :  { %24 = vsyncpa [#allocation10], 0 }
   0xd   :  { %25 = vsyncpa [#allocation13], 0 }
   0xe   :  { %26 = vsyncpa [#allocation5], 0 }
   0xf   :  { %28 = vsyncpa [#allocation5 + $0x1], 0  ;;  %s9053_s25 = smov 0   ;;  %s9055_s26 = smov 0  }
  0x10   :  { %s9057_s27 = smov 0   ;;  %s9059_s28 = smov 0  }
  0x11 LB: > { %11594 = sst [smem:[#allocation22_spill]] %s8954_s25  ;;  %s8968_s29 = smov [#allocation8]   ;;  %s8966_s28 = sphi %s9059_s28, %s11893_s28   ;;  %s8962_s27 = sphi %s9057_s27, %s11895_s27   ;;  %s8958_s26 = sphi %s9055_s26, %s11897_s26   ;;  %s8954_s25 = sphi %s9053_s25, %s11896_s25  }
  0x12   : > { %11595 = sst [smem:[#allocation23_spill]] %s8962_s27  ;;  %s360_s30 = sshll.u32 %s8968_s29, 4  ;;  %s361_s30 = int_to_ptr.vmem [resolvable:$true] %s360_s30 }
  0x13   : > { %s9074_s14 = sadd.s32 4294967295, %s8966_s28   ;;  %p5921_p0 = scmp.ge.s32.totalorder %s8966_s28, 1 }
  0x14   : > { %p11494_p1 = scmp.eq.s32.totalorder %s9074_s14, 0  ;;  %p348_p2 = scmp.lt.s32.totalorder %s8966_s28, 3 }
  0x15   : > { %s8969_s16 = smov [#allocation9]   ;;  %s8970_s19 = smov [#allocation12]  }
  0x16   : > { %p9079_p3 = pnand %p5921_p0, %p348_p2  ;;  %s376_s17 = sshll.u32 %s8969_s16, 4  ;;  %s9092_s17 = int_to_ptr.vmem [resolvable:$true] %s376_s17 }
  0x17   : > { %s411_s20 = sshll.u32 %s8970_s19, 4  ;;  %s8711_s22 = scalar_lea.vmem %s361_s30, 1024  ;;  %s9094_s20 = int_to_ptr.vmem [resolvable:$true] %s411_s20 }
  0x18   : > { %s11596_s15 = scalar_select %p9079_p3, 1, 0 }
  0x19   : > { %p7913_p5 = pneg %p9079_p3  ;;  %p8712_p8 = scmp.ne.s32.totalorder %s361_s30, %s8711_s22 }
  0x1a   : > { %p8719_p11 = scmp.lt.s32.totalorder %s361_s30, %s361_s30  ;;  %p8720_p12 = scmp.lt.s32.totalorder %s8711_s22, %s8711_s22 }
  0x1b   : > { %p9088_p6 = pnand %p7913_p5, %p11494_p1 }
  0x1c   : > { %p8721_p13 = por %p8720_p12, %p8719_p11 }
  0x1d   : > { %p9098_p7 = pneg %p9088_p6 }
  0x1f   : > { %p8714_p9 = pnand %p8712_p8, %p9098_p7 }
  0x21   : > { %p8715_p10 = pneg %p8714_p9 }
  0x23   : > { %p8722_p0 = pnand %p8721_p13, %p8715_p10 }
  0x25   : > { %8725 = shalt.err (!%p8722_p0)
}
  0x26   : > { %s8971_s23 = smov 64   ;;  %s8972_s24 = smov 4  }
  0x27   : > { %s11599_s2 = sld [smem:[#allocation88_spill]]  ;;  %s8737_s19 = scalar_lea.vmem %s9092_s17, 1024 }
  0x28   : > { %p8738_p2 = scmp.ne.s32.totalorder %s9092_s17, %s8737_s19  ;;  %p8745_p9 = scmp.lt.s32.totalorder %s9092_s17, %s9092_s17 }
  0x29   : > { %p8746_p10 = scmp.lt.s32.totalorder %s8737_s19, %s8737_s19 }
  0x2a   : > { %p8740_p5 = pnand %p8738_p2, %p9098_p7 }
  0x2b   : > { %p8747_p11 = por %p8746_p10, %p8745_p9 }
  0x2c   : > { %p8741_p8 = pneg %p8740_p5 }
  0x2d   : > { %7916 = dma.hbm_to_vmem [thread:$0]  (!%p9088_p6), %s11599_s2, 1024, %s361_s30, [#allocation7], %s8971_s23, %s8971_s23, %s8972_s24  }
  0x2e   : > { %p8748_p12 = pnand %p8747_p11, %p8741_p8 }
  0x30   : > { %8751 = shalt.err (!%p8748_p12)
}
  0x31   : > { %s11600_s4 = sld [smem:[#allocation89_spill]]  ;;  %s8763_s30 = scalar_lea.vmem %s9094_s20, 1024 }
  0x32   : > { %p8764_p13 = scmp.ne.s32.totalorder %s9094_s20, %s8763_s30  ;;  %p8771_p5 = scmp.lt.s32.totalorder %s9094_s20, %s9094_s20 }
  0x33   : > { %p8772_p8 = scmp.lt.s32.totalorder %s8763_s30, %s8763_s30 }
  0x34   : > { %p8766_p0 = pnand %p8764_p13, %p9098_p7 }
  0x35   : > { %p8773_p9 = por %p8772_p8, %p8771_p5 }
  0x36   : > { %p8767_p2 = pneg %p8766_p0 }
  0x37   : > { %7919 = dma.hbm_to_vmem [thread:$0]  (!%p9088_p6), %s11600_s4, 1024, %s9092_s17, [#allocation10], %s8971_s23, %s8971_s23, %s8972_s24  }
  0x38   : > { %p8774_p10 = pnand %p8773_p9, %p8767_p2 }
  0x3a   : > { %8777 = shalt.err (!%p8774_p10)
}
  0x3b   : > { %s11601_s9 = sld [smem:[#allocation91_spill]]  ;;  %s8973_s17 = smov [#allocation11]  }
  0x3c   : > { %s392_s22 = sshll.u32 %s8973_s17, 4  ;;  %s8974_s29 = smov [#allocation14]   ;;  %s393_s22 = int_to_ptr.vmem [resolvable:$true] %s392_s22 }
  0x3d   : > { %s427_s2 = sshll.u32 %s8974_s29, 4  ;;  %s8789_s30 = scalar_lea.vmem %s393_s22, 2048  ;;  %s428_s2 = int_to_ptr.vmem [resolvable:$true] %s427_s2 }
  0x3e   : > { %p8790_p11 = scmp.ne.s32.totalorder %s393_s22, %s8789_s30  ;;  %p8797_p0 = scmp.lt.s32.totalorder %s393_s22, %s393_s22 }
  0x3f   : > { %p8798_p2 = scmp.lt.s32.totalorder %s8789_s30, %s8789_s30 }
  0x40   : > { %p8792_p12 = pnand %p8790_p11, %p9098_p7 }
  0x41   : > { %7925 = dma.hbm_to_vmem [thread:$0]  (!%p9088_p6), %s11601_s9, 1024, %s9094_s20, [#allocation13], %s8971_s23, %s8971_s23, %s8972_s24  }
  0x42   : > { %p8793_p13 = pneg %p8792_p12  ;;  %p8799_p5 = por %p8798_p2, %p8797_p0 }
  0x44   : > { %p8800_p8 = pnand %p8799_p5, %p8793_p13 }
  0x46   : > { %8803 = shalt.err (!%p8800_p8)
}
  0x47   : > { %s11602_s6 = sld [smem:[#allocation90_spill]]  ;;  %s8815_s19 = scalar_lea.vmem %s428_s2, 1024 }
  0x48   : > { %p8816_p9 = scmp.ne.s32.totalorder %s428_s2, %s8815_s19  ;;  %p8823_p12 = scmp.lt.s32.totalorder %s428_s2, %s428_s2 }
  0x49   : > { %p8824_p0 = scmp.lt.s32.totalorder %s8815_s19, %s8815_s19 }
  0x4a   : > { %p8818_p10 = pnand %p8816_p9, %p9098_p7 }
  0x4b   : > { %p8825_p13 = por %p8824_p0, %p8823_p12 }
  0x4c   : > { %p8819_p11 = pneg %p8818_p10 }
  0x4d   : > { %7922 = dma.hbm_to_vmem [thread:$0]  (!%p9088_p6), %s11602_s6, 2048, %s393_s22, [#allocation10], %s8971_s23, %s8971_s23, %s8972_s24  }
  0x4e   : > { %p8826_p2 = pnand %p8825_p13, %p8819_p11 }
  0x50   : > { %8829 = shalt.err (!%p8826_p2)
}
  0x51   : > { %s11603_s11 = sld [smem:[#allocation92_spill]]  ;;  %s5920_s18 = sadd.s32 4294967294, %s8966_s28  }
  0x52   : > { %s9164_s21 = sadd.s32 1, %s8966_s28   ;;  %s41_s22 = sadd.s32 1, %s8962_s27 }
  0x53   : > { %11604 = sst [smem:[#allocation24_spill]] %s9164_s21  ;;  %s38_s30 = ssub.s32 %s8966_s28, %s9164_s21 }
  0x54   : > { %p48_p7 = scmp.ne.s32.totalorder %s8962_s27, %s8958_s26  ;;  %p39_p5 = scmp.eq.s32.totalorder %s38_s30, 0 }
  0x55   : > { %p49_p8 = scmp.eq.s32.totalorder %s8966_s28, 0  ;;  %p54_p9 = scmp.ne.s32.totalorder %s8958_s26, %s8954_s25 }
  0x56   : > { %p335_p10 = scmp.eq.s32.totalorder %s9074_s14, 1  ;;  %p341_p0 = scmp.eq.s32.totalorder %s5920_s18, 1 }
  0x57   : > { %7928 = dma.hbm_to_vmem [thread:$0]  (!%p9088_p6), %s11603_s11, 1024, %s428_s2, [#allocation13], %s8971_s23, %s8971_s23, %s8972_s24  }
  0x58   : > { %s9176_s20 = scalar_select %p39_p5, %s8962_s27, %s41_s22  }
  0x59   : > { %p50_p11 = por %p49_p8, %p48_p7  ;;  %p9180_p12 = por %p11494_p1, %p54_p9 }
  0x5a   : > { %11605 = sst [smem:[#allocation25_spill]] %s9176_s20  ;;  %p9184_p6 = por %p335_p10, %p48_p7 }
  0x5b   : > { %s11606_s16 = scalar_select %p9180_p12, 1, 0 }
  0x5c   : > { %s11607_s2 = scalar_select %p9184_p6, 1, 0 }
  0x5d   : > { %p7945_p13 = scmp.lt.s32.totalorder %s8966_s28, 2  ;;  %s9190_s23 = sand.u32 1, %s8962_s27  }
  0x5e   : > { %11608 = sst [smem:[#allocation26_spill]] %s11607_s2  ;;  %p9192_p2 = por %p341_p0, %p54_p9 }
  0x5f   : > { %s5928_s19 = sshll.u32 %s9190_s23, 7  ;;  %s6325_s17 = sshll.u32 %s8966_s28, 11 }
  0x60   : > { %s11609_s24 = scalar_select %p9192_p2, 1, 0 }
  0x61   : > { %s11611_s0 = sld [smem:[#allocation87_spill]]  ;;  %s448_s18 = scalar_lea.vmem [#allocation3], %s5928_s19 }
  0x62   : > { %11610 = sst [smem:[#allocation27_spill]] %s11609_s24  ;;  %s455_s4 = sshll.u32 %s448_s18, 4  ;;  %s9207_s4 = int_to_ptr.vmem [resolvable:$true] %s455_s4 }
  0x63   : > { %p9203_p7 = pnand %p7945_p13, %p50_p11 }
  0x65   : > { %p8832_p8 = pneg %p9203_p7 }
  0x67   : > { %s9201_s30 = scalar_lea.hbm %s11611_s0, %s6325_s17  ;;  %s8835_s29 = scalar_lea.hbm %s11611_s0, 4096 }
  0x68   : > { %s8830_s11 = scalar_lea.hbm %s9201_s30, 2048  ;;  %p8836_p11 = scmp.lt.s32.totalorder %s9201_s30, %s11611_s0 }
  0x69   : > { %p8831_p5 = scmp.ne.s32.totalorder %s9201_s30, %s8830_s11  ;;  %p8837_p0 = scmp.lt.s32.totalorder %s8835_s29, %s8830_s11 }
  0x6b   : > { %p8833_p9 = pnand %p8832_p8, %p8831_p5  ;;  %p8838_p13 = por %p8837_p0, %p8836_p11 }
  0x6d   : > { %p8834_p10 = pneg %p8833_p9 }
  0x6f   : > { %p8839_p4 = pnand %p8838_p13, %p8834_p10 }
  0x71   : > { %8842 = shalt.err (!%p8839_p4)
}
  0x72   : > { %s8843_s9 = scalar_lea.vmem %s9207_s4, 2048  ;;  %s8975_s17 = smov [#allocation3]  }
  0x73   : > { %p8844_p1 = scmp.ne.s32.totalorder %s9207_s4, %s8843_s9  ;;  %s8848_s19 = sshll.u32 %s8975_s17, 4  ;;  %s8849_s19 = int_to_ptr.vmem [resolvable:$false] %s8848_s19 }
  0x74   : > { %s8850_s20 = scalar_lea.vmem %s8849_s19, 4096  ;;  %p8851_p2 = scmp.lt.s32.totalorder %s9207_s4, %s8849_s19 }
  0x75   : > { %p8846_p5 = pnand %p8844_p1, %p8832_p8  ;;  %p8852_p6 = scmp.lt.s32.totalorder %s8850_s20, %s8843_s9 }
  0x77   : > { %p8847_p9 = pneg %p8846_p5  ;;  %p8853_p12 = por %p8852_p6, %p8851_p2 }
  0x79   : > { %p8854_p11 = pnand %p8853_p12, %p8847_p9 }
  0x7b   : > { %8857 = shalt.err (!%p8854_p11)
}
  0x7c   : > { %s8976_s11 = smov 128   ;;  %s8977_s29 = smov 8  }
  0x7d   : > { %s11613_s22 = scalar_lea.sflag [#allocation4], %s9190_s23  ;;  %s465_s18 = sand.u32 1, %s8966_s28  }
  0x7e   : > { %7932 = dma.hbm_to_vmem [thread:$0]  (!%p9203_p7), %s9201_s30, 2048, %s9207_s4, %s11613_s22, %s8976_s11, %s8976_s11, %s8977_s29  }
  0x7f   : > { %s5931_s17 = sshll.u32 %s9190_s23, 3  ;;  %s5932_s19 = sshll.u32 %s8966_s28, 7 }
  0x80   : > { %s469_s9 = scalar_lea.vmem [#allocation6], %s5931_s17  ;;  %s474_s21 = scalar_lea.hbm %s11481_s1, %s5932_s19 }
  0x81   : > { %s476_s20 = sshll.u32 %s469_s9, 4  ;;  %s466_s24 = scalar_lea.sflag [#allocation7], %s465_s18  ;;  %s477_s20 = int_to_ptr.vmem [resolvable:$true] %s476_s20 }
  0x82   : > { %s8858_s25 = scalar_lea.hbm %s474_s21, 128  ;;  %s8863_s4 = scalar_lea.hbm %s11481_s1, 256 }
  0x83   : > { %p8859_p1 = scmp.ne.s32.totalorder %s474_s21, %s8858_s25  ;;  %p8864_p6 = scmp.lt.s32.totalorder %s474_s21, %s11481_s1 }
  0x84   : > { %p8865_p2 = scmp.lt.s32.totalorder %s8863_s4, %s8858_s25 }
  0x85   : > { %p8861_p4 = pnand %p8859_p1, %p8832_p8 }
  0x86   : > { %p8866_p10 = por %p8865_p2, %p8864_p6 }
  0x87   : > { %p8862_p12 = pneg %p8861_p4 }
  0x89   : > { %p8867_p0 = pnand %p8866_p10, %p8862_p12 }
  0x8b   : > { %8870 = shalt.err (!%p8867_p0)
}
  0x8c   : > { %s8871_s0 = scalar_lea.vmem %s477_s20, 128  ;;  %s8978_s27 = smov [#allocation6]  }
  0x8d   : > { %p8872_p13 = scmp.ne.s32.totalorder %s477_s20, %s8871_s0  ;;  %s8876_s11 = sshll.u32 %s8978_s27, 4  ;;  %s8877_s11 = int_to_ptr.vmem [resolvable:$false] %s8876_s11 }
  0x8e   : > { %s8878_s13 = scalar_lea.vmem %s8877_s11, 256  ;;  %p8879_p11 = scmp.lt.s32.totalorder %s477_s20, %s8877_s11 }
  0x8f   : > { %p8874_p5 = pnand %p8872_p13, %p8832_p8  ;;  %p8880_p1 = scmp.lt.s32.totalorder %s8878_s13, %s8871_s0 }
  0x91   : > { %p8875_p9 = pneg %p8874_p5  ;;  %p8881_p4 = por %p8880_p1, %p8879_p11 }
  0x93   : > { %p8882_p3 = pnand %p8881_p4, %p8875_p9 }
  0x95   : > { %8885 = shalt.err (!%p8882_p3)
}
  0x96   : > { %7935 = dma.hbm_to_vmem [thread:$0]  (!%p9203_p7), %s474_s21, 128, %s477_s20, %s466_s24  }
  0x97   : > { %p11614_p12 = scmp.ne.s32.totalorder %s11596_s15, 0 }
  0x99   : > { %485 = sbr.rel (%p11614_p12) target bundleno = 2264 (0x8d8), region = 72 }
  0x9e   : > { %s9259_s25 = sand.u32 1, %s8958_s26   ;;  %p11615_p8 = scmp.ne.s32.totalorder %s11606_s16, 0 }
  0x9f   : > { %s5934_s2 = sshll.u32 %s9259_s25, 7  ;;  %s488_s29 = scalar_lea.sflag [#allocation4], %s9259_s25 }
  0xa0   : > { %s9265_s22 = scalar_lea.vmem [#allocation3], %s5934_s2 }
  0xa1   : > { %8929 = dma.done.wait (%p11615_p8), %s488_s29, 2048  }
  0xa2   : > { %8931 = vsyncadd (%p11615_p8), %s488_s29, 4294965248  ;;  %s496_s6 = sand.u32 1, %s9074_s14   ;;  %s5935_s15 = sshll.u32 %s9259_s25, 3 }
  0xa3   : > { %s497_s21 = scalar_lea.sflag [#allocation7], %s496_s6  ;;  %s9273_s24 = scalar_lea.vmem [#allocation6], %s5935_s15 }
  0xa4   : > { %8933 = dma.done.wait (%p11615_p8), %s497_s21, 128  }
  0xa5   : > { %8935 = vsyncadd (%p11615_p8), %s497_s21, 4294967168  ;;  %p11616_p3 = scmp.eq.s32.totalorder %s9074_s14, 0 }
  0xa7   : > { %8937 = dma.done.wait (%p11616_p3), [#allocation7], 1024   ;;  %p11617_p7 = pmov %p11616_p3 }
  0xa8   : > { %p11618_p6 = pmov %p11616_p3 }
  0xa9   : > { %8939 = vsyncadd (%p11617_p7), [#allocation7], 4294966272 }
  0xaa   : > { %8941 = dma.done.wait (%p11618_p6), [#allocation10], 3072   ;;  %p11619_p2 = pmov %p11616_p3 }
  0xac   : > { %8943 = vsyncadd (%p11619_p2), [#allocation10], 4294964224  ;;  %p11620_p10 = pmov %p11619_p2 }
  0xad   : > { %p11621_p0 = pmov %p11619_p2 }
  0xae   : > { %8945 = dma.done.wait (%p11620_p10), [#allocation13], 2048  }
  0xaf   : > { %8947 = vsyncadd (%p11621_p0), [#allocation13], 4294965248  ;;  %v8444_v0 = vld [vmem:[#allocation8 + $0x38] sm:$0xff]   ;;  %v8445_v1 = vld [vmem:[#allocation8 + $0x30] sm:$0xff]   ;;  %s11383_s15 = scalar_lea.vmem [#allocation15], %s5934_s2  ;;  %s11886_s2 = sld [smem:[#allocation26_spill]] }
  0xb0   : > { %7183 = vmatprep.subr.bf16.mxu0 %v8444_v0  ;;  %v8446_v2 = vld [vmem:[#allocation8 + $0x28] sm:$0xff]   ;;  %v8447_v3 = vld [vmem:[#allocation8 + $0x20] sm:$0xff]   ;;  %v569_v4 = vld [vmem:[%s9265_s22] sm:$0xff]  ;;  %s6454_s21 = sshll.u32 %s9074_s14, 11  ;;  %s11887_s17 = sld [smem:[#allocation93_spill]] }
  0xb1   : > { %7184 = vmatpush3.bf16.msra.mxu0 %v8444_v0  ;;  %v570_v5 = vld [vmem:[%s9265_s22 + $0x8] sm:$0xff]  ;;  %v8449_v8 = vld [vmem:[#allocation8 + $0x10] sm:$0xff]   ;;  %v8450_v9 = vld [vmem:[#allocation8 + $0x8] sm:$0xff]   ;;  %s5764_s14 = scalar_lea.sflag [#allocation5], %s9259_s25  ;;  %s8980_s20 = smov [#allocation15]  }
  0xb2   : > { %7185 = vmatprep.subr.bf16.mxu0 %v8445_v1  ;;  %v1922_v6 = vpack.c.bf16 %v570_v5, %v569_v4  ;;  %v8448_v7 = vld [vmem:[#allocation8 + $0x18] sm:$0xff]   ;;  %v8451_v10 = vld [vmem:[#allocation8] sm:$0xff]   ;;  %v572_v12 = vld [vmem:[%s9265_s22 + $0x18] sm:$0xff]  ;;  %s8890_s4 = sshll.u32 %s8980_s20, 4  ;;  %s8891_s4 = int_to_ptr.vmem [resolvable:$false] %s8890_s4 }
  0xb3   : > { %v571_v11 = vld [vmem:[%s9265_s22 + $0x10] sm:$0xff]  ;;  %v573_v13 = vld [vmem:[%s9265_s22 + $0x20] sm:$0xff]  ;;  %v574_v14 = vld [vmem:[%s9265_s22 + $0x28] sm:$0xff]  ;;  %s8892_s23 = scalar_lea.vmem %s8891_s4, 4096 }
  0xb4   : > { %7199 = vmatprep.mubr.bf16.mxu0 %v1922_v6  ;;  %v1923_v15 = vpack.c.bf16 %v572_v12, %v571_v11  ;;  %v1924_v16 = vpack.c.bf16 %v574_v14, %v573_v13  ;;  %v575_v17 = vld [vmem:[%s9265_s22 + $0x30] sm:$0xff]  ;;  %v576_v18 = vld [vmem:[%s9265_s22 + $0x38] sm:$0xff]  ;;  %v577_v19 = vld [vmem:[%s9265_s22 + $0x40] sm:$0xff] }
  0xb5   : > { %7186 = vmatpush3.bf16.msra.mxu0 %v8445_v1  ;;  %v578_v20 = vld [vmem:[%s9265_s22 + $0x48] sm:$0xff]  ;;  %v1925_v21 = vpack.c.bf16 %v576_v18, %v575_v17  ;;  %v579_v23 = vld [vmem:[%s9265_s22 + $0x50] sm:$0xff]  ;;  %v580_v24 = vld [vmem:[%s9265_s22 + $0x58] sm:$0xff]  ;;  %p11888_p5 = scmp.ne.s32.totalorder %s11886_s2, 0 }
  0xb6   : > { %7187 = vmatprep.subr.bf16.mxu0 %v8446_v2  ;;  %v1926_v22 = vpack.c.bf16 %v578_v20, %v577_v19  ;;  %v581_v25 = vld [vmem:[%s9265_s22 + $0x60] sm:$0xff]  ;;  %v582_v26 = vld [vmem:[%s9265_s22 + $0x68] sm:$0xff]  ;;  %v1927_v27 = vpack.c.bf16 %v580_v24, %v579_v23  ;;  %v583_v29 = vld [vmem:[%s9265_s22 + $0x70] sm:$0xff]  ;;  %s11432_s19 = scalar_lea.hbm %s11887_s17, %s6454_s21 }
  0xb7   : > { %v1928_v28 = vpack.c.bf16 %v582_v26, %v581_v25  ;;  %v584_v30 = vld [vmem:[%s9265_s22 + $0x78] sm:$0xff]  ;;  %v8452_v32 = vld [vmem:[#allocation9 + $0x38] sm:$0xff]   ;;  %v8453_v33 = vld [vmem:[#allocation9 + $0x30] sm:$0xff]  }
  0xb8   : > { %v1929_v31 = vpack.c.bf16 %v584_v30, %v583_v29  ;;  %7215 = vmatprep.subr.bf16.mxu1 %v8452_v32  ;;  %v8454_v34 = vld [vmem:[#allocation9 + $0x28] sm:$0xff]   ;;  %v8455_v35 = vld [vmem:[#allocation9 + $0x20] sm:$0xff]   ;;  %v8456_v36 = vld [vmem:[#allocation9 + $0x18] sm:$0xff]  }
  0xb9   : > { %7188 = vmatpush3.bf16.msra.mxu0 %v8446_v2  ;;  %7216 = vmatpush3.bf16.msra.mxu1 %v8452_v32  ;;  %v8457_v37 = vld [vmem:[#allocation9 + $0x10] sm:$0xff]   ;;  %v8458_v38 = vld [vmem:[#allocation9 + $0x8] sm:$0xff]   ;;  %v8459_v39 = vld [vmem:[#allocation9] sm:$0xff]  }
  0xba   : > { %7189 = vmatprep.subr.bf16.mxu0 %v8447_v3  ;;  %7217 = vmatprep.subr.bf16.mxu1 %v8453_v33  ;;  %v8460_v40 = vld [vmem:[#allocation11 + $0x38] sm:$0xff]   ;;  %v8461_v41 = vld [vmem:[#allocation11 + $0x30] sm:$0xff]   ;;  %v8462_v42 = vld [vmem:[#allocation11 + $0x28] sm:$0xff]  }
  0xbb   : > { %v8463_v43 = vld [vmem:[#allocation11 + $0x20] sm:$0xff]   ;;  %v8464_v44 = vld [vmem:[#allocation11 + $0x18] sm:$0xff]   ;;  %v9310_v45 = vld [vmem:[%s11483_s3] ss:$0 sm:$0xff] }
  0xbd   : > { %7190 = vmatpush3.bf16.msra.mxu0 %v8447_v3  ;;  %7218 = vmatpush3.bf16.msra.mxu1 %v8453_v33 }
  0xbe   : > { %7191 = vmatprep.subr.bf16.mxu0 %v8448_v7  ;;  %7219 = vmatprep.subr.bf16.mxu1 %v8454_v34 }
  0xc1   : > { %7192 = vmatpush3.bf16.msra.mxu0 %v8448_v7  ;;  %7220 = vmatpush3.bf16.msra.mxu1 %v8454_v34 }
  0xc2   : > { %7193 = vmatprep.subr.bf16.mxu0 %v8449_v8  ;;  %7221 = vmatprep.subr.bf16.mxu1 %v8455_v35 }
  0xc5   : > { %7194 = vmatpush3.bf16.msra.mxu0 %v8449_v8  ;;  %7222 = vmatpush3.bf16.msra.mxu1 %v8455_v35 }
  0xc6   : > { %7195 = vmatprep.subr.bf16.mxu0 %v8450_v9  ;;  %7223 = vmatprep.subr.bf16.mxu1 %v8456_v36 }
  0xc9   : > { %7196 = vmatpush3.bf16.msra.mxu0 %v8450_v9  ;;  %7224 = vmatpush3.bf16.msra.mxu1 %v8456_v36 }
  0xca   : > { %7197 = vmatprep.subr.bf16.mxu0 %v8451_v10  ;;  %7225 = vmatprep.subr.bf16.mxu1 %v8457_v37 }
  0xcd   : > { %7198 = vmatpush3.bf16.msra.mxu0 %v8451_v10  ;;  %7226 = vmatpush3.bf16.msra.mxu1 %v8457_v37 }
  0xce   : > { %7227 = vmatprep.subr.bf16.mxu1 %v8458_v38  ;;  %7247 = vmatprep.subr.bf16.mxu0 %v8460_v40 }
  0xd0   : > { %7200 = vmatmul.mubr.bf16.vlgmr.msra.gmra.mxu0 %v1923_v15 }
  0xd1   : > { %7203 = vmatprep.mubr.bf16.mxu0 %v1924_v16  ;;  %7228 = vmatpush3.bf16.msra.mxu1 %v8458_v38 }
  0xd2   : > { %7229 = vmatprep.subr.bf16.mxu1 %v8459_v39  ;;  %7248 = vmatpush3.bf16.msra.mxu0 %v8460_v40 }
  0xd3   : > { %7249 = vmatprep.subr.bf16.mxu0 %v8461_v41 }
  0xd5   : > { %7230 = vmatpush3.bf16.msra.mxu1 %v8459_v39 }
  0xd6   : > { %7250 = vmatpush3.bf16.msra.mxu0 %v8461_v41 }
  0xd7   : > { %7251 = vmatprep.subr.bf16.mxu0 %v8462_v42 }
  0xd8   : > { %7204 = vmatmul.mubr.bf16.gmra.mxu0 %v1925_v21 }
  0xd9   : > { %7207 = vmatprep.mubr.bf16.mxu0 %v1926_v22 }
  0xda   : > { %7252 = vmatpush3.bf16.msra.mxu0 %v8462_v42 }
  0xdb   : > { %7253 = vmatprep.subr.bf16.mxu0 %v8463_v43 }
  0xde   : > { %7254 = vmatpush3.bf16.msra.mxu0 %v8463_v43 }
  0xdf   : > { %7255 = vmatprep.subr.bf16.mxu0 %v8464_v44 }
  0xe0   : > { %7208 = vmatmul.mubr.bf16.gmra.mxu0 %v1927_v27 }
  0xe1   : > { %7211 = vmatprep.mubr.bf16.mxu0 %v1928_v28 }
  0xe2   : > { %7256 = vmatpush3.bf16.msra.mxu0 %v8464_v44 }
  0xe8   : > { %7212 = vmatmul.mubr.bf16.gmra.mxu0 %v1929_v31 }
 0x190   : > { %v7201_v46 = vpop.f32.mrf.mxu0 }
 0x191   : > { %v9313_v47 = vadd.f32 %v7201_v46, %v9310_v45 }
 0x192   : > { %v2052_v48 = vpop.f32.mrf.mxu0 }
 0x193   : > { %v2117_v49 = vmul.f32 %v9313_v47, %v9313_v47  ;;  %v9318_v50 = vadd.f32 %v9310_v45, %v2052_v48 }
 0x194   : > { %v7202_v51 = vpop.f32.mrf.mxu0 }
 0x195   : > { %v2133_v52 = vmul.f32 %v2117_v49, %v9313_v47  ;;  %v2115_v53 = vmul.f32 %v9318_v50, %v9318_v50  ;;  %v9324_v54 = vadd.f32 %v7202_v51, %v9310_v45 }
 0x196   : > { %v2055_v55 = vpop.f32.mrf.mxu0 }
 0x197   : > { %v2149_v56 = vmul.f32 0.044715, %v2133_v52  ;;  %v2131_v57 = vmul.f32 %v2115_v53, %v9318_v50  ;;  %v2118_v58 = vmul.f32 %v9324_v54, %v9324_v54  ;;  %v9330_v59 = vadd.f32 %v9310_v45, %v2055_v55 }
 0x198   : > { %v7205_v60 = vpop.f32.mrf.mxu0 }
 0x199   : > { %v2165_v61 = vadd.f32 %v2149_v56, %v9313_v47  ;;  %v2147_v62 = vmul.f32 0.044715, %v2131_v57  ;;  %v2134_v63 = vmul.f32 %v2118_v58, %v9324_v54  ;;  %v2116_v0 = vmul.f32 %v9330_v59, %v9330_v59 }
 0x19a   : > { %v9337_v1 = vadd.f32 %v7205_v60, %v9310_v45  ;;  %v2068_v2 = vpop.f32.mrf.mxu0 }
 0x19b   : > { %v2181_v3 = vmul.f32 0.7978846, %v2165_v61  ;;  %v2163_v4 = vadd.f32 %v2147_v62, %v9318_v50  ;;  %v2150_v5 = vmul.f32 0.044715, %v2134_v63  ;;  %v2132_v6 = vmul.f32 %v2116_v0, %v9330_v59 }
 0x19c   : > { %v2121_v7 = vmul.f32 %v9337_v1, %v9337_v1  ;;  %v9344_v8 = vadd.f32 %v9310_v45, %v2068_v2  ;;  %v7206_v9 = vpop.f32.mrf.mxu0 }
 0x19d   : > { %8556 = vtanh.f32 %v2181_v3  ;;  %v2166_v10 = vadd.f32 %v2150_v5, %v9324_v54  ;;  %v2148_v11 = vmul.f32 0.044715, %v2132_v6  ;;  %v9348_v12 = vadd.f32 %v7206_v9, %v9310_v45 }
 0x19e   : > { %v2137_v13 = vmul.f32 %v2121_v7, %v9337_v1  ;;  %v2119_v14 = vmul.f32 %v9344_v8, %v9344_v8  ;;  %v2071_v15 = vpop.f32.mrf.mxu0  ;;  %v2179_v16 = vmul.f32 0.7978846, %v2163_v4 }
 0x19f   : > { %v2182_v17 = vmul.f32 0.7978846, %v2166_v10  ;;  %v2122_v18 = vmul.f32 %v9348_v12, %v9348_v12  ;;  %v9356_v19 = vadd.f32 %v9310_v45, %v2071_v15  ;;  %v2164_v20 = vadd.f32 %v2148_v11, %v9330_v59 }
 0x1a0   : > { %v2153_v21 = vmul.f32 0.044715, %v2137_v13  ;;  %v2135_v22 = vmul.f32 %v2119_v14, %v9344_v8  ;;  %v7209_v23 = vpop.f32.mrf.mxu0  ;;  %8558 = vtanh.f32 %v2179_v16 }
 0x1a1   : > { %8560 = vtanh.f32 %v2182_v17  ;;  %v2138_v24 = vmul.f32 %v2122_v18, %v9348_v12  ;;  %v2120_v25 = vmul.f32 %v9356_v19, %v9356_v19  ;;  %v9364_v26 = vadd.f32 %v7209_v23, %v9310_v45 }
 0x1a2   : > { %v2169_v27 = vadd.f32 %v2153_v21, %v9337_v1  ;;  %v2151_v28 = vmul.f32 0.044715, %v2135_v22  ;;  %v2084_v29 = vpop.f32.mrf.mxu0  ;;  %v2180_v30 = vmul.f32 0.7978846, %v2164_v20 }
 0x1a3   : > { %v2154_v31 = vmul.f32 0.044715, %v2138_v24  ;;  %v2136_v32 = vmul.f32 %v2120_v25, %v9356_v19  ;;  %v2125_v33 = vmul.f32 %v9364_v26, %v9364_v26  ;;  %v9371_v34 = vadd.f32 %v9310_v45, %v2084_v29 }
 0x1a4   : > { %v2185_v35 = vmul.f32 0.7978846, %v2169_v27  ;;  %v2167_v36 = vadd.f32 %v2151_v28, %v9344_v8  ;;  %v7210_v37 = vpop.f32.mrf.mxu0  ;;  %8562 = vtanh.f32 %v2180_v30 }
 0x1a5   : > { %v2170_v38 = vadd.f32 %v2154_v31, %v9348_v12  ;;  %v2152_v39 = vmul.f32 0.044715, %v2136_v32  ;;  %v2141_v40 = vmul.f32 %v2125_v33, %v9364_v26  ;;  %v2123_v41 = vmul.f32 %v9371_v34, %v9371_v34 }
 0x1a6   : > { %8564 = vtanh.f32 %v2185_v35  ;;  %v2183_v42 = vmul.f32 0.7978846, %v2167_v36  ;;  %v9379_v43 = vadd.f32 %v7210_v37, %v9310_v45  ;;  %v2087_v44 = vpop.f32.mrf.mxu0 }
 0x1a7   : > { %v2186_v46 = vmul.f32 0.7978846, %v2170_v38  ;;  %v2168_v48 = vadd.f32 %v2152_v39, %v9356_v19  ;;  %v2157_v49 = vmul.f32 0.044715, %v2141_v40  ;;  %v2139_v51 = vmul.f32 %v2123_v41, %v9371_v34 }
 0x1a8   : > { %8566 = vtanh.f32 %v2183_v42  ;;  %v2126_v52 = vmul.f32 %v9379_v43, %v9379_v43  ;;  %v9386_v53 = vadd.f32 %v9310_v45, %v2087_v44  ;;  %v7213_v55 = vpop.f32.mrf.mxu0 }
 0x1a9   : > { %8568 = vtanh.f32 %v2186_v46  ;;  %v2184_v56 = vmul.f32 0.7978846, %v2168_v48  ;;  %v2173_v57 = vadd.f32 %v2157_v49, %v9364_v26  ;;  %v2155_v58 = vmul.f32 0.044715, %v2139_v51 }
 0x1aa   : > { %v8557_v60 = vpop.eup %8556  ;;  %v2142_v61 = vmul.f32 %v2126_v52, %v9379_v43  ;;  %v2124_v62 = vmul.f32 %v9386_v53, %v9386_v53  ;;  %v9393_v63 = vadd.f32 %v7213_v55, %v9310_v45  ;;  %v2100_v0 = vpop.f32.mrf.mxu0 }
 0x1ab   : > { %8570 = vtanh.f32 %v2184_v56  ;;  %v2189_v2 = vmul.f32 0.7978846, %v2173_v57  ;;  %v2171_v3 = vadd.f32 %v2155_v58, %v9371_v34  ;;  %v9397_v4 = vadd.f32 %v9310_v45, %v2100_v0 }
 0x1ac   : > { %v2158_v5 = vmul.f32 0.044715, %v2142_v61  ;;  %v2140_v6 = vmul.f32 %v2124_v62, %v9386_v53  ;;  %v2129_v7 = vmul.f32 %v9393_v63, %v9393_v63  ;;  %v7214_v9 = vpop.f32.mrf.mxu0  ;;  %v2213_v10 = vadd.f32 1.0, %v8557_v60 }
 0x1ad   : > { %v8559_v11 = vpop.eup %8558  ;;  %8572 = vtanh.f32 %v2189_v2  ;;  %v2187_v13 = vmul.f32 0.7978846, %v2171_v3  ;;  %v2127_v14 = vmul.f32 %v9397_v4, %v9397_v4  ;;  %v9405_v15 = vadd.f32 %v7214_v9, %v9310_v45 }
 0x1ae   : > { %v8561_v16 = vpop.eup %8560  ;;  %v2174_v17 = vadd.f32 %v2158_v5, %v9379_v43  ;;  %v2156_v18 = vmul.f32 0.044715, %v2140_v6  ;;  %v2145_v20 = vmul.f32 %v2129_v7, %v9393_v63  ;;  %v2103_v21 = vpop.f32.mrf.mxu0  ;;  %v2211_v22 = vadd.f32 1.0, %v8559_v11 }
 0x1af   : > { %8574 = vtanh.f32 %v2187_v13  ;;  %v2143_v23 = vmul.f32 %v2127_v14, %v9397_v4  ;;  %v2130_v24 = vmul.f32 %v9405_v15, %v9405_v15  ;;  %v9413_v25 = vadd.f32 %v9310_v45, %v2103_v21 }
 0x1b0   : > { %v2190_v27 = vmul.f32 0.7978846, %v2174_v17  ;;  %v2172_v28 = vadd.f32 %v2156_v18, %v9386_v53  ;;  %v2161_v29 = vmul.f32 0.044715, %v2145_v20  ;;  %v2227_v30 = vmul.f32 0.5, %v2211_v22 }
 0x1b1   : > { %v8563_v31 = vpop.eup %8562  ;;  %v2159_v32 = vmul.f32 0.044715, %v2143_v23  ;;  %v2146_v33 = vmul.f32 %v2130_v24, %v9405_v15  ;;  %v2128_v35 = vmul.f32 %v9413_v25, %v9413_v25  ;;  %v2214_v36 = vadd.f32 1.0, %v8561_v16 }
 0x1b2   : > { %8576 = vtanh.f32 %v2190_v27  ;;  %v2188_v37 = vmul.f32 0.7978846, %v2172_v28  ;;  %v2177_v38 = vadd.f32 %v2161_v29, %v9393_v63  ;;  %v2212_v39 = vadd.f32 1.0, %v8563_v31 }
 0x1b3   : > { %v8565_v45 = vpop.eup %8564  ;;  %v2175_v40 = vadd.f32 %v2159_v32, %v9397_v4  ;;  %v2162_v41 = vmul.f32 0.044715, %v2146_v33  ;;  %v2144_v42 = vmul.f32 %v2128_v35, %v9413_v25  ;;  %v2243_v44 = vmul.f32 %v2227_v30, %v9318_v50 }
 0x1b4   : > { %8578 = vtanh.f32 %v2188_v37  ;;  %v2193_v46 = vmul.f32 0.7978846, %v2177_v38  ;;  %v2228_v48 = vmul.f32 0.5, %v2212_v39  ;;  %v2229_v49 = vmul.f32 0.5, %v2213_v10 }
 0x1b5   : > { %v8567_v51 = vpop.eup %8566  ;;  %v2191_v52 = vmul.f32 0.7978846, %v2175_v40  ;;  %v2178_v55 = vadd.f32 %v2162_v41, %v9405_v15  ;;  %v2160_v56 = vmul.f32 0.044715, %v2144_v42  ;;  %v2230_v57 = vmul.f32 0.5, %v2214_v36 }
 0x1b6   : > { %v8569_v58 = vpop.eup %8568  ;;  %8580 = vtanh.f32 %v2193_v46  ;;  %v2244_v60 = vmul.f32 %v2228_v48, %v9330_v59  ;;  %v2245_v61 = vmul.f32 %v2229_v49, %v9313_v47  ;;  %v2215_v62 = vadd.f32 1.0, %v8567_v51 }
 0x1b7   : > { %8582 = vtanh.f32 %v2191_v52  ;;  %v2194_v0 = vmul.f32 0.7978846, %v2178_v55  ;;  %v2176_v50 = vadd.f32 %v2160_v56, %v9413_v25  ;;  %v2246_v2 = vmul.f32 %v2230_v57, %v9324_v54 }
 0x1b8   : > { %v8571_v3 = vpop.eup %8570  ;;  %v2259_v5 = vpack.c.bf16 %v2244_v60, %v2243_v44  ;;  %v2231_v6 = vmul.f32 0.5, %v2215_v62  ;;  %v2217_v7 = vadd.f32 1.0, %v8565_v45  ;;  %v2218_v9 = vadd.f32 1.0, %v8569_v58  ;;  %v8465_v58 = vld [vmem:[#allocation11 + $0x10] sm:$0xff]   ;;  %v8466_v60 = vld [vmem:[#allocation11 + $0x8] sm:$0xff]  }
 0x1b9   : > { %8584 = vtanh.f32 %v2194_v0  ;;  %v2192_v10 = vmul.f32 0.7978846, %v2176_v50  ;;  %v2260_v11 = vpack.c.bf16 %v2246_v2, %v2245_v61  ;;  %v2216_v13 = vadd.f32 1.0, %v8571_v3  ;;  %7257 = vmatprep.subr.bf16.mxu0 %v8465_v58  ;;  %v8467_v61 = vld [vmem:[#allocation11] sm:$0xff]  }
 0x1ba   : > { %v8573_v14 = vpop.eup %8572  ;;  %7231 = vmatprep.mubr.bf16.mxu1 %v2259_v5  ;;  %v2234_v59 = vmul.f32 0.5, %v2218_v9  ;;  %v2233_v16 = vmul.f32 0.5, %v2217_v7  ;;  %v2247_v18 = vmul.f32 %v2231_v6, %v9344_v8  ;;  %7258 = vmatpush3.bf16.msra.mxu0 %v8465_v58  ;;  %v8979_v6 = vmov 0.0  }
 0x1bb   : > { %8586 = vtanh.f32 %v2192_v10  ;;  %7232 = vmatmul.mubr.bf16.vlgmr.msra.gmra.mxu1 %v2260_v11  ;;  %v2232_v47 = vmul.f32 0.5, %v2216_v13  ;;  %v2221_v27 = vadd.f32 1.0, %v8573_v14  ;;  %7259 = vmatprep.subr.bf16.mxu0 %v8466_v60 }
 0x1bc   : > { %v8575_v17 = vpop.eup %8574  ;;  %v2250_v20 = vmul.f32 %v2234_v59, %v9348_v12  ;;  %v2249_v24 = vmul.f32 %v2233_v16, %v9337_v1 }
 0x1bd   : > { %v2248_v54 = vmul.f32 %v2232_v47, %v9356_v19  ;;  %v2219_v21 = vadd.f32 1.0, %v8575_v17  ;;  %v2237_v8 = vmul.f32 0.5, %v2221_v27 }
 0x1be   : > { %v2262_v30 = vpack.c.bf16 %v2250_v20, %v2249_v24  ;;  %7260 = vmatpush3.bf16.msra.mxu0 %v8466_v60 }
 0x1bf   : > { %v8577_v22 = vpop.eup %8576  ;;  %v2261_v23 = vpack.c.bf16 %v2248_v54, %v2247_v18  ;;  %v2235_v32 = vmul.f32 0.5, %v2219_v21  ;;  %v2253_v45 = vmul.f32 %v2237_v8, %v9364_v26  ;;  %7261 = vmatprep.subr.bf16.mxu0 %v8467_v61 }
 0x1c0   : > { %v2222_v28 = vadd.f32 1.0, %v8577_v22 }
 0x1c1   : > { %v8579_v29 = vpop.eup %8578  ;;  %7235 = vmatprep.mubr.bf16.mxu1 %v2261_v23  ;;  %v2251_v39 = vmul.f32 %v2235_v32, %v9371_v34 }
 0x1c2   : > { %v2220_v31 = vadd.f32 1.0, %v8579_v29  ;;  %v2238_v33 = vmul.f32 0.5, %v2222_v28  ;;  %7262 = vmatpush3.bf16.msra.mxu0 %v8467_v61 }
 0x1c3   : > { %v8581_v35 = vpop.eup %8580  ;;  %7236 = vmatmul.mubr.bf16.gmra.mxu1 %v2262_v30 }
 0x1c4   : > { %v8583_v36 = vpop.eup %8582  ;;  %v2236_v19 = vmul.f32 0.5, %v2220_v31  ;;  %v2254_v12 = vmul.f32 %v2238_v33, %v9379_v43  ;;  %v2225_v40 = vadd.f32 1.0, %v8581_v35 }
 0x1c5   : > { %v2223_v37 = vadd.f32 1.0, %v8583_v36 }
 0x1c6   : > { %v8585_v38 = vpop.eup %8584  ;;  %v2252_v1 = vmul.f32 %v2236_v19, %v9386_v53  ;;  %v2264_v46 = vpack.c.bf16 %v2254_v12, %v2253_v45  ;;  %v2241_v43 = vmul.f32 0.5, %v2225_v40 }
 0x1c7   : > { %v2226_v41 = vadd.f32 1.0, %v8585_v38  ;;  %v2239_v49 = vmul.f32 0.5, %v2223_v37 }
 0x1c8   : > { %v8587_v42 = vpop.eup %8586  ;;  %v2263_v44 = vpack.c.bf16 %v2252_v1, %v2251_v39  ;;  %v2257_v26 = vmul.f32 %v2241_v43, %v9393_v63 }
 0x1c9   : > { %v2224_v48 = vadd.f32 1.0, %v8587_v42  ;;  %v2242_v51 = vmul.f32 0.5, %v2226_v41  ;;  %v2255_v55 = vmul.f32 %v2239_v49, %v9397_v4  ;;  %v586_v4 = vlaneseq }
 0x1ca   : > { %7239 = vmatprep.mubr.bf16.mxu1 %v2263_v44 }
 0x1cb   : > { %7240 = vmatmul.mubr.bf16.gmra.mxu1 %v2264_v46  ;;  %v2240_v52 = vmul.f32 0.5, %v2224_v48  ;;  %v2258_v53 = vmul.f32 %v2242_v51, %v9405_v15  ;;  %v9443_v15 = vld [vmem:[%s9273_s24] sm:$0xff]  ;;  %s5777_s24 = sshll.u32 %s11383_s15, 4  ;;  %s11434_s24 = int_to_ptr.vmem [resolvable:$true] %s5777_s24 }
 0x1cc   : > { %s8886_s9 = scalar_lea.vmem %s11434_s24, 2048  ;;  %p8893_p1 = scmp.lt.s32.totalorder %s11434_s24, %s8891_s4 }
 0x1cd   : > { %v2256_v34 = vmul.f32 %v2240_v52, %v9413_v25  ;;  %v2266_v57 = vpack.c.bf16 %v2258_v53, %v2257_v26  ;;  %v9440_v25 = vshrl.u32 %v586_v4, 7  ;;  %p8887_p13 = scmp.ne.s32.totalorder %s11434_s24, %s8886_s9  ;;  %p8894_p4 = scmp.lt.s32.totalorder %s8892_s23, %s8886_s9 }
 0x1cf   : > { %v2265_v56 = vpack.c.bf16 %v2256_v34, %v2255_v55  ;;  %v605_v62 = vsub.s32 0, %v9440_v25  ;;  %v769_v63 = vsub.s32 1, %v9440_v25  ;;  %v9448_v0 = vadd.s32 8, %v9440_v25  ;;  %p8888_p9 = pnand %p8887_p13, %p11888_p5  ;;  %p8895_p12 = por %p8894_p4, %p8893_p1 }
 0x1d0   : > { %v9457_v3 = vadd.s32 16, %v9440_v25  ;;  %v9460_v5 = vadd.s32 24, %v9440_v25  ;;  %v9479_v59 = vadd.s32 32, %v9440_v25  ;;  %v934_v47 = vsub.s32 2, %v9440_v25 }
 0x1d1   : > { %7243 = vmatprep.mubr.bf16.mxu1 %v2265_v56  ;;  %v9451_v50 = vrot.slane %v9443_v15, %v605_v62  ;;  %v9454_v2 = vrot.slane %v9443_v15, %v769_v63  ;;  %v1099_v18 = vsub.s32 3, %v9440_v25  ;;  %v9492_v22 = vadd.s32 40, %v9440_v25  ;;  %p8889_p11 = pneg %p8888_p9 }
 0x1d2   : > { %v9497_v23 = vrot.slane %v9443_v15, %v934_v47  ;;  %v9505_v28 = vadd.s32 48, %v9440_v25  ;;  %v9526_v36 = vadd.s32 56, %v9440_v25  ;;  %v9545_v45 = vadd.s32 64, %v9440_v25 }
 0x1d3   : > { %7244 = vmatmul.mubr.bf16.gmra.mxu1 %v2266_v57  ;;  %vm607_vm0 = vcmp.eq.s32.totalorder %v9440_v25, %v9451_v50  ;;  %vm771_vm1 = vcmp.eq.s32.totalorder %v9440_v25, %v9454_v2  ;;  %vm608_vm2 = vcmp.eq.s32.totalorder %v9448_v0, %v9451_v50  ;;  %vm772_vm3 = vcmp.eq.s32.totalorder %v9448_v0, %v9454_v2  ;;  %p8896_p8 = pnand %p8895_p12, %p8889_p11 }
 0x1d4   : > { %v5942_v7 = vsel %vm607_vm0, 1.0, %v8979_v6  ;;  %v5974_v9 = vsel %vm771_vm1, 1.0, %v8979_v6  ;;  %v5943_v10 = vsel %vm608_vm2, 1.0, %v8979_v6  ;;  %v5975_v11 = vsel %vm772_vm3, 1.0, %v8979_v6 }
 0x1d5   : > { %v7996_v13 = vpack.i.bf16 %v5974_v9, %v5942_v7  ;;  %vm609_vm4 = vcmp.eq.s32.totalorder %v9457_v3, %v9451_v50  ;;  %vm773_vm5 = vcmp.eq.s32.totalorder %v9457_v3, %v9454_v2  ;;  %v7998_v14 = vpack.i.bf16 %v5975_v11, %v5943_v10 }
 0x1d6   : > { %v5944_v16 = vsel %vm609_vm4, 1.0, %v8979_v6  ;;  %v5976_v17 = vsel %vm773_vm5, 1.0, %v8979_v6  ;;  %vm610_vm6 = vcmp.eq.s32.totalorder %v9460_v5, %v9451_v50  ;;  %vm774_vm7 = vcmp.eq.s32.totalorder %v9460_v5, %v9454_v2 }
 0x1d7   : > { %7997 = vxpose.xlu0.b32.start [1/16] %v7996_v13, 128  ;;  %v8000_v54 = vpack.i.bf16 %v5976_v17, %v5944_v16  ;;  %v5945_v20 = vsel %vm610_vm6, 1.0, %v8979_v6  ;;  %v5977_v21 = vsel %vm774_vm7, 1.0, %v8979_v6  ;;  %vm611_vm8 = vcmp.eq.s32.totalorder %v9479_v59, %v9451_v50 }
 0x1d8   : > { %vm775_vm9 = vcmp.eq.s32.totalorder %v9479_v59, %v9454_v2  ;;  %v9502_v24 = vrot.slane %v9443_v15, %v1099_v18  ;;  %v8002_v27 = vpack.i.bf16 %v5977_v21, %v5945_v20  ;;  %vm936_vm10 = vcmp.eq.s32.totalorder %v9440_v25, %v9497_v23 }
 0x1d9   : > { %vm937_vm11 = vcmp.eq.s32.totalorder %v9448_v0, %v9497_v23  ;;  %v5946_v29 = vsel %vm611_vm8, 1.0, %v8979_v6  ;;  %vm612_vm12 = vcmp.eq.s32.totalorder %v9492_v22, %v9451_v50  ;;  %v6006_v30 = vsel %vm936_vm10, 1.0, %v8979_v6 }
 0x1da   : > { %vm1101_vm13 = vcmp.eq.s32.totalorder %v9440_v25, %v9502_v24  ;;  %v5978_v31 = vsel %vm775_vm9, 1.0, %v8979_v6  ;;  %v6007_v33 = vsel %vm937_vm11, 1.0, %v8979_v6  ;;  %vm1102_vm14 = vcmp.eq.s32.totalorder %v9448_v0, %v9502_v24 }
 0x1db   : > { %7999 = vxpose.xlu0.b32.cont [2/16] %v7998_v14, 128  ;;  %v6038_v32 = vsel %vm1101_vm13, 1.0, %v8979_v6  ;;  %vm776_vm15 = vcmp.eq.s32.totalorder %v9492_v22, %v9454_v2  ;;  %v6039_v8 = vsel %vm1102_vm14, 1.0, %v8979_v6  ;;  %vm938_vm0 = vcmp.eq.s32.totalorder %v9457_v3, %v9497_v23 }
 0x1dc   : > { %v8108_v35 = vpack.i.bf16 %v6038_v32, %v6006_v30  ;;  %vm1103_vm1 = vcmp.eq.s32.totalorder %v9457_v3, %v9502_v24  ;;  %v8004_v19 = vpack.i.bf16 %v5978_v31, %v5946_v29  ;;  %v5947_v12 = vsel %vm612_vm12, 1.0, %v8979_v6 }
 0x1dd   : > { %vm613_vm2 = vcmp.eq.s32.totalorder %v9505_v28, %v9451_v50  ;;  %v8110_v37 = vpack.i.bf16 %v6039_v8, %v6007_v33  ;;  %v5979_v38 = vsel %vm776_vm15, 1.0, %v8979_v6  ;;  %vm777_vm3 = vcmp.eq.s32.totalorder %v9505_v28, %v9454_v2 }
 0x1de   : > { %8109 = vxpose.xlu1.b32.start [1/16] %v8108_v35, 128  ;;  %v6008_v39 = vsel %vm938_vm0, 1.0, %v8979_v6  ;;  %v6040_v1 = vsel %vm1103_vm1, 1.0, %v8979_v6  ;;  %vm939_vm4 = vcmp.eq.s32.totalorder %v9460_v5, %v9497_v23  ;;  %vm1104_vm5 = vcmp.eq.s32.totalorder %v9460_v5, %v9502_v24 }
 0x1df   : > { %8001 = vxpose.xlu0.b32.cont [3/16] %v8000_v54, 128  ;;  %v8006_v40 = vpack.i.bf16 %v5979_v38, %v5947_v12  ;;  %v5948_v41 = vsel %vm613_vm2, 1.0, %v8979_v6  ;;  %v5980_v42 = vsel %vm777_vm3, 1.0, %v8979_v6  ;;  %v8112_v44 = vpack.i.bf16 %v6040_v1, %v6008_v39 }
 0x1e0   : > { %vm614_vm6 = vcmp.eq.s32.totalorder %v9526_v36, %v9451_v50  ;;  %vm778_vm7 = vcmp.eq.s32.totalorder %v9526_v36, %v9454_v2  ;;  %v6009_v46 = vsel %vm939_vm4, 1.0, %v8979_v6  ;;  %v6041_v48 = vsel %vm1104_vm5, 1.0, %v8979_v6 }
 0x1e1   : > { %vm940_vm8 = vcmp.eq.s32.totalorder %v9479_v59, %v9497_v23  ;;  %vm1105_vm9 = vcmp.eq.s32.totalorder %v9479_v59, %v9502_v24  ;;  %v8008_v49 = vpack.i.bf16 %v5980_v42, %v5948_v41  ;;  %v9560_v51 = vadd.s32 72, %v9440_v25 }
 0x1e2   : > { %8111 = vxpose.xlu1.b32.cont [2/16] %v8110_v37, 128  ;;  %v5949_v52 = vsel %vm614_vm6, 1.0, %v8979_v6  ;;  %v5981_v43 = vsel %vm778_vm7, 1.0, %v8979_v6  ;;  %vm615_vm10 = vcmp.eq.s32.totalorder %v9545_v45, %v9451_v50  ;;  %v8114_v55 = vpack.i.bf16 %v6041_v48, %v6009_v46 }
 0x1e3   : > { %8003 = vxpose.xlu0.b32.cont [4/16] %v8002_v27, 128  ;;  %vm779_vm11 = vcmp.eq.s32.totalorder %v9545_v45, %v9454_v2  ;;  %v6010_v34 = vsel %vm940_vm8, 1.0, %v8979_v6  ;;  %v6042_v53 = vsel %vm1105_vm9, 1.0, %v8979_v6  ;;  %vm941_vm12 = vcmp.eq.s32.totalorder %v9492_v22, %v9497_v23 }
 0x1e4   : > { %vm1106_vm13 = vcmp.eq.s32.totalorder %v9492_v22, %v9502_v24  ;;  %v8010_v56 = vpack.i.bf16 %v5981_v43, %v5949_v52  ;;  %v5950_v26 = vsel %vm615_vm10, 1.0, %v8979_v6  ;;  %v9576_v57 = vadd.s32 80, %v9440_v25 }
 0x1e5   : > { %v5982_v58 = vsel %vm779_vm11, 1.0, %v8979_v6  ;;  %vm616_vm14 = vcmp.eq.s32.totalorder %v9560_v51, %v9451_v50  ;;  %vm780_vm15 = vcmp.eq.s32.totalorder %v9560_v51, %v9454_v2  ;;  %v8116_v60 = vpack.i.bf16 %v6042_v53, %v6010_v34 }
 0x1e6   : > { %8113 = vxpose.xlu1.b32.cont [3/16] %v8112_v44, 128  ;;  %v6011_v61 = vsel %vm941_vm12, 1.0, %v8979_v6  ;;  %v6043_v4 = vsel %vm1106_vm13, 1.0, %v8979_v6  ;;  %vm942_vm0 = vcmp.eq.s32.totalorder %v9505_v28, %v9497_v23  ;;  %vm1107_vm1 = vcmp.eq.s32.totalorder %v9505_v28, %v9502_v24 }
 0x1e7   : > { %8005 = vxpose.xlu0.b32.cont [5/16] %v8004_v19, 128  ;;  %v8012_v62 = vpack.i.bf16 %v5982_v58, %v5950_v26  ;;  %v5951_v63 = vsel %vm616_vm14, 1.0, %v8979_v6  ;;  %v5983_v7 = vsel %vm780_vm15, 1.0, %v8979_v6  ;;  %vm617_vm2 = vcmp.eq.s32.totalorder %v9576_v57, %v9451_v50 }
 0x1e8   : > { %vm781_vm3 = vcmp.eq.s32.totalorder %v9576_v57, %v9454_v2  ;;  %v8118_v9 = vpack.i.bf16 %v6043_v4, %v6011_v61  ;;  %v1264_v10 = vsub.s32 4, %v9440_v25  ;;  %v9597_v11 = vadd.s32 88, %v9440_v25 }
 0x1e9   : > { %v6012_v13 = vsel %vm942_vm0, 1.0, %v8979_v6  ;;  %v6044_v14 = vsel %vm1107_vm1, 1.0, %v8979_v6  ;;  %v1429_v47 = vsub.s32 5, %v9440_v25  ;;  %vm943_vm4 = vcmp.eq.s32.totalorder %v9526_v36, %v9497_v23 }
 0x1ea   : > { %8115 = vxpose.xlu1.b32.cont [4/16] %v8114_v55, 128  ;;  %vm1108_vm5 = vcmp.eq.s32.totalorder %v9526_v36, %v9502_v24  ;;  %v9607_v16 = vrot.slane %v9443_v15, %v1264_v10  ;;  %v8014_v17 = vpack.i.bf16 %v5983_v7, %v5951_v63  ;;  %v5952_v54 = vsel %vm617_vm2, 1.0, %v8979_v6 }
 0x1eb   : > { %8007 = vxpose.xlu0.b32.cont [6/16] %v8006_v40, 128  ;;  %v9610_v18 = vrot.slane %v9443_v15, %v1429_v47  ;;  %v5984_v20 = vsel %vm781_vm3, 1.0, %v8979_v6  ;;  %v9615_v21 = vadd.s32 96, %v9440_v25  ;;  %v8120_v27 = vpack.i.bf16 %v6044_v14, %v6012_v13 }
 0x1ec   : > { %vm618_vm6 = vcmp.eq.s32.totalorder %v9597_v11, %v9451_v50  ;;  %vm782_vm7 = vcmp.eq.s32.totalorder %v9597_v11, %v9454_v2  ;;  %v6013_v29 = vsel %vm943_vm4, 1.0, %v8979_v6  ;;  %v6045_v30 = vsel %vm1108_vm5, 1.0, %v8979_v6 }
 0x1ed   : > { %vm944_vm8 = vcmp.eq.s32.totalorder %v9545_v45, %v9497_v23  ;;  %vm1109_vm9 = vcmp.eq.s32.totalorder %v9545_v45, %v9502_v24  ;;  %v8016_v31 = vpack.i.bf16 %v5984_v20, %v5952_v54  ;;  %v5953_v32 = vsel %vm618_vm6, 1.0, %v8979_v6 }
 0x1ee   : > { %8117 = vxpose.xlu1.b32.cont [5/16] %v8116_v60, 128  ;;  %v5985_v33 = vsel %vm782_vm7, 1.0, %v8979_v6  ;;  %vm619_vm10 = vcmp.eq.s32.totalorder %v9615_v21, %v9451_v50  ;;  %v8122_v35 = vpack.i.bf16 %v6045_v30, %v6013_v29  ;;  %vm783_vm11 = vcmp.eq.s32.totalorder %v9615_v21, %v9454_v2 }
 0x1ef   : > { %8009 = vxpose.xlu0.b32.cont [7/16] %v8008_v49, 128  ;;  %v9634_v8 = vadd.s32 104, %v9440_v25  ;;  %v6014_v19 = vsel %vm944_vm8, 1.0, %v8979_v6  ;;  %v6046_v12 = vsel %vm1109_vm9, 1.0, %v8979_v6  ;;  %vm945_vm12 = vcmp.eq.s32.totalorder %v9560_v51, %v9497_v23 }
 0x1f0   : > { %vm1110_vm13 = vcmp.eq.s32.totalorder %v9560_v51, %v9502_v24  ;;  %v8018_v37 = vpack.i.bf16 %v5985_v33, %v5953_v32  ;;  %v5954_v38 = vsel %vm619_vm10, 1.0, %v8979_v6  ;;  %v5986_v39 = vsel %vm783_vm11, 1.0, %v8979_v6 }
 0x1f1   : > { %v9645_v1 = vadd.s32 112, %v9440_v25  ;;  %v8124_v40 = vpack.i.bf16 %v6046_v12, %v6014_v19  ;;  %vm620_vm14 = vcmp.eq.s32.totalorder %v9634_v8, %v9451_v50  ;;  %vm784_vm15 = vcmp.eq.s32.totalorder %v9634_v8, %v9454_v2 }
 0x1f2   : > { %8119 = vxpose.xlu1.b32.cont [6/16] %v8118_v9, 128  ;;  %v6015_v41 = vsel %vm945_vm12, 1.0, %v8979_v6  ;;  %v6047_v42 = vsel %vm1110_vm13, 1.0, %v8979_v6  ;;  %vm946_vm0 = vcmp.eq.s32.totalorder %v9576_v57, %v9497_v23  ;;  %vm1111_vm1 = vcmp.eq.s32.totalorder %v9576_v57, %v9502_v24 }
 0x1f3   : > { %8011 = vxpose.xlu0.b32.cont [8/16] %v8010_v56, 128  ;;  %v8020_v44 = vpack.i.bf16 %v5986_v39, %v5954_v38  ;;  %v5955_v46 = vsel %vm620_vm14, 1.0, %v8979_v6  ;;  %v5987_v48 = vsel %vm784_vm15, 1.0, %v8979_v6  ;;  %vm621_vm2 = vcmp.eq.s32.totalorder %v9645_v1, %v9451_v50 }
 0x1f4   : > { %v8126_v49 = vpack.i.bf16 %v6047_v42, %v6015_v41  ;;  %vm785_vm3 = vcmp.eq.s32.totalorder %v9645_v1, %v9454_v2  ;;  %v9664_v52 = vadd.s32 120, %v9440_v25  ;;  %v6016_v43 = vsel %vm946_vm0, 1.0, %v8979_v6 }
 0x1f5   : > { %v6048_v55 = vsel %vm1111_vm1, 1.0, %v8979_v6  ;;  %vm947_vm4 = vcmp.eq.s32.totalorder %v9597_v11, %v9497_v23  ;;  %vm1112_vm5 = vcmp.eq.s32.totalorder %v9597_v11, %v9502_v24  ;;  %v8022_v34 = vpack.i.bf16 %v5987_v48, %v5955_v46 }
 0x1f6   : > { %8121 = vxpose.xlu1.b32.cont [7/16] %v8120_v27, 128  ;;  %v5956_v53 = vsel %vm621_vm2, 1.0, %v8979_v6  ;;  %v5988_v56 = vsel %vm785_vm3, 1.0, %v8979_v6  ;;  %v8128_v26 = vpack.i.bf16 %v6048_v55, %v6016_v43  ;;  %v1594_v58 = vsub.s32 6, %v9440_v25 }
 0x1f7   : > { %8013 = vxpose.xlu0.b32.cont [9/16] %v8012_v62, 128  ;;  %v1759_v60 = vsub.s32 7, %v9440_v25  ;;  %vm622_vm6 = vcmp.eq.s32.totalorder %v9664_v52, %v9451_v50  ;;  %vm786_vm7 = vcmp.eq.s32.totalorder %v9664_v52, %v9454_v2  ;;  %v6017_v61 = vsel %vm947_vm4, 1.0, %v8979_v6 }
 0x1f8   : > { %v6049_v4 = vsel %vm1112_vm5, 1.0, %v8979_v6  ;;  %vm948_vm8 = vcmp.eq.s32.totalorder %v9615_v21, %v9497_v23  ;;  %vm1113_vm9 = vcmp.eq.s32.totalorder %v9615_v21, %v9502_v24  ;;  %v9687_v62 = vrot.slane %v9443_v15, %v1594_v58 }
 0x1f9   : > { %v9690_v63 = vrot.slane %v9443_v15, %v1759_v60  ;;  %v8024_v50 = vpack.i.bf16 %v5988_v56, %v5956_v53  ;;  %v8130_v2 = vpack.i.bf16 %v6049_v4, %v6017_v61  ;;  %v5957_v7 = vsel %vm622_vm6, 1.0, %v8979_v6 }
 0x1fa   : > { %8123 = vxpose.xlu1.b32.cont [8/16] %v8122_v35, 128  ;;  %v5989_v9 = vsel %vm786_vm7, 1.0, %v8979_v6  ;;  %v6018_v10 = vsel %vm948_vm8, 1.0, %v8979_v6  ;;  %v6050_v13 = vsel %vm1113_vm9, 1.0, %v8979_v6  ;;  %vm1266_vm10 = vcmp.eq.s32.totalorder %v9440_v25, %v9607_v16 }
 0x1fb   : > { %8015 = vxpose.xlu0.b32.cont [10/16] %v8014_v17, 128  ;;  %vm1431_vm11 = vcmp.eq.s32.totalorder %v9440_v25, %v9610_v18  ;;  %vm949_vm12 = vcmp.eq.s32.totalorder %v9634_v8, %v9497_v23  ;;  %vm1114_vm13 = vcmp.eq.s32.totalorder %v9634_v8, %v9502_v24  ;;  %v8026_v15 = vpack.i.bf16 %v5989_v9, %v5957_v7 }
 0x1fc   : > { %v8132_v14 = vpack.i.bf16 %v6050_v13, %v6018_v10  ;;  %v6070_v47 = vsel %vm1266_vm10, 1.0, %v8979_v6  ;;  %v6102_v17 = vsel %vm1431_vm11, 1.0, %v8979_v6  ;;  %v6019_v54 = vsel %vm949_vm12, 1.0, %v8979_v6 }
 0x1fd   : > { %v6051_v20 = vsel %vm1114_vm13, 1.0, %v8979_v6  ;;  %vm1267_vm14 = vcmp.eq.s32.totalorder %v9448_v0, %v9607_v16  ;;  %vm1432_vm15 = vcmp.eq.s32.totalorder %v9448_v0, %v9610_v18  ;;  %vm950_vm0 = vcmp.eq.s32.totalorder %v9645_v1, %v9497_v23 }
 0x1fe   : > { %8125 = vxpose.xlu1.b32.cont [9/16] %v8124_v40, 128  ;;  %vm1115_vm1 = vcmp.eq.s32.totalorder %v9645_v1, %v9502_v24  ;;  %v8220_v27 = vpack.i.bf16 %v6102_v17, %v6070_v47  ;;  %v8134_v29 = vpack.i.bf16 %v6051_v20, %v6019_v54  ;;  %v6071_v30 = vsel %vm1267_vm14, 1.0, %v8979_v6 }
 0x1ff   : > { %8017 = vxpose.xlu0.b32.cont [11/16] %v8016_v31, 128  ;;  %v6103_v31 = vsel %vm1432_vm15, 1.0, %v8979_v6  ;;  %v6020_v32 = vsel %vm950_vm0, 1.0, %v8979_v6  ;;  %v6052_v33 = vsel %vm1115_vm1, 1.0, %v8979_v6  ;;  %vm1268_vm2 = vcmp.eq.s32.totalorder %v9457_v3, %v9607_v16 }
 0x200   : > { %vm1433_vm3 = vcmp.eq.s32.totalorder %v9457_v3, %v9610_v18  ;;  %vm951_vm4 = vcmp.eq.s32.totalorder %v9664_v52, %v9497_v23  ;;  %vm1116_vm5 = vcmp.eq.s32.totalorder %v9664_v52, %v9502_v24  ;;  %v8222_v35 = vpack.i.bf16 %v6103_v31, %v6071_v30  ;;  %v8620_v30 = vld [vmem:[%s9265_s22 + $0x18] sm:$0xff] }
 0x201   : > { %v8136_v19 = vpack.i.bf16 %v6052_v33, %v6020_v32  ;;  %v6072_v12 = vsel %vm1268_vm2, 1.0, %v8979_v6  ;;  %v6021_v38 = vsel %vm951_vm4, 1.0, %v8979_v6  ;;  %v6053_v39 = vsel %vm1116_vm5, 1.0, %v8979_v6 }
 0x202   : > { %8127 = vxpose.xlu1.b32.cont [10/16] %v8126_v49, 128  ;;  %vm1269_vm6 = vcmp.eq.s32.totalorder %v9460_v5, %v9607_v16  ;;  %vm1434_vm7 = vcmp.eq.s32.totalorder %v9460_v5, %v9610_v18  ;;  %vm1596_vm8 = vcmp.eq.s32.totalorder %v9440_v25, %v9687_v62  ;;  %vm1761_vm9 = vcmp.eq.s32.totalorder %v9440_v25, %v9690_v63 }
 0x203   : > { %8019 = vxpose.xlu0.b32.cont [12/16] %v8018_v37, 128  ;;  %v6104_v37 = vsel %vm1433_vm3, 1.0, %v8979_v6  ;;  %v8138_v24 = vpack.i.bf16 %v6053_v39, %v6021_v38  ;;  %v6073_v40 = vsel %vm1269_vm6, 1.0, %v8979_v6  ;;  %v6105_v41 = vsel %vm1434_vm7, 1.0, %v8979_v6  ;;  %v8623_v39 = vld [vmem:[%s9265_s22 + $0x10] sm:$0xff] }
 0x204   : > { %v8224_v23 = vpack.i.bf16 %v6104_v37, %v6072_v12  ;;  %v6134_v42 = vsel %vm1596_vm8, 1.0, %v8979_v6  ;;  %vm1270_vm10 = vcmp.eq.s32.totalorder %v9479_v59, %v9607_v16  ;;  %vm1435_vm11 = vcmp.eq.s32.totalorder %v9479_v59, %v9610_v18  ;;  %v8622_v37 = vld [vmem:[%s9265_s22 + $0x8] sm:$0xff] }
 0x205   : > { %vm1597_vm12 = vcmp.eq.s32.totalorder %v9448_v0, %v9687_v62  ;;  %vm1762_vm13 = vcmp.eq.s32.totalorder %v9448_v0, %v9690_v63  ;;  %v8226_v25 = vpack.i.bf16 %v6105_v41, %v6073_v40  ;;  %v6074_v48 = vsel %vm1270_vm10, 1.0, %v8979_v6 }
 0x206   : > { %8129 = vxpose.xlu1.b32.cont [11/16] %v8128_v26, 128  ;;  %v6106_v49 = vsel %vm1435_vm11, 1.0, %v8979_v6  ;;  %v6135_v43 = vsel %vm1597_vm12, 1.0, %v8979_v6  ;;  %v6167_v55 = vsel %vm1762_vm13, 1.0, %v8979_v6  ;;  %vm1271_vm14 = vcmp.eq.s32.totalorder %v9492_v22, %v9607_v16 }
 0x207   : > { %8021 = vxpose.xlu0.b32.cont [13/16] %v8020_v44, 128  ;;  %v6166_v44 = vsel %vm1761_vm9, 1.0, %v8979_v6  ;;  %vm1436_vm15 = vcmp.eq.s32.totalorder %v9492_v22, %v9610_v18  ;;  %vm1598_vm0 = vcmp.eq.s32.totalorder %v9457_v3, %v9687_v62  ;;  %vm1763_vm1 = vcmp.eq.s32.totalorder %v9457_v3, %v9690_v63 }
 0x208   : > { %v8332_v46 = vpack.i.bf16 %v6166_v44, %v6134_v42  ;;  %v8228_v0 = vpack.i.bf16 %v6106_v49, %v6074_v48  ;;  %v6075_v53 = vsel %vm1271_vm14, 1.0, %v8979_v6  ;;  %v6107_v56 = vsel %vm1436_vm15, 1.0, %v8979_v6 }
 0x209   : > { %v6136_v26 = vsel %vm1598_vm0, 1.0, %v8979_v6  ;;  %v6168_v58 = vsel %vm1763_vm1, 1.0, %v8979_v6  ;;  %vm1272_vm2 = vcmp.eq.s32.totalorder %v9505_v28, %v9607_v16  ;;  %vm1437_vm3 = vcmp.eq.s32.totalorder %v9505_v28, %v9610_v18 }
 0x20a   : > { %8131 = vxpose.xlu1.b32.cont [12/16] %v8130_v2, 128  ;;  %vm1599_vm4 = vcmp.eq.s32.totalorder %v9460_v5, %v9687_v62  ;;  %vm1764_vm5 = vcmp.eq.s32.totalorder %v9460_v5, %v9690_v63  ;;  %v8230_v61 = vpack.i.bf16 %v6107_v56, %v6075_v53  ;;  %v8336_v4 = vpack.i.bf16 %v6168_v58, %v6136_v26 }
 0x20b   : > { %8023 = vxpose.xlu0.b32.cont [14/16] %v8022_v34, 128  ;;  %v8334_v34 = vpack.i.bf16 %v6167_v55, %v6135_v43  ;;  %v6076_v2 = vsel %vm1272_vm2, 1.0, %v8979_v6  ;;  %v6108_v7 = vsel %vm1437_vm3, 1.0, %v8979_v6  ;;  %v6137_v9 = vsel %vm1599_vm4, 1.0, %v8979_v6 }
 0x20c   : > { %v6169_v10 = vsel %vm1764_vm5, 1.0, %v8979_v6  ;;  %vm1273_vm6 = vcmp.eq.s32.totalorder %v9526_v36, %v9607_v16  ;;  %vm1438_vm7 = vcmp.eq.s32.totalorder %v9526_v36, %v9610_v18  ;;  %vm1600_vm8 = vcmp.eq.s32.totalorder %v9479_v59, %v9687_v62 }
 0x20d   : > { %vm1765_vm9 = vcmp.eq.s32.totalorder %v9479_v59, %v9690_v63  ;;  %v8232_v17 = vpack.i.bf16 %v6108_v7, %v6076_v2  ;;  %v8338_v54 = vpack.i.bf16 %v6169_v10, %v6137_v9  ;;  %vm1274_vm10 = vcmp.eq.s32.totalorder %v9545_v45, %v9607_v16  ;;  %v8626_v7 = vld [vmem:[%s9265_s22 + $0x28] sm:$0xff]  ;;  %v8627_v10 = vld [vmem:[%s9265_s22 + $0x30] sm:$0xff] }
 0x20e   : > { %8133 = vxpose.xlu1.b32.cont [13/16] %v8132_v14, 128  ;;  %vm1439_vm11 = vcmp.eq.s32.totalorder %v9545_v45, %v9610_v18  ;;  %v6138_v33 = vsel %vm1600_vm8, 1.0, %v8979_v6  ;;  %vm1601_vm12 = vcmp.eq.s32.totalorder %v9492_v22, %v9687_v62  ;;  %vm1766_vm13 = vcmp.eq.s32.totalorder %v9492_v22, %v9690_v63 }
 0x20f   : > { %8025 = vxpose.xlu0.b32.cont [15/16] %v8024_v50, 128  ;;  %v9779_v50 = vld [vmem:[%s11485_s5] ss:$0 sm:$0xff]  ;;  %vm1275_vm14 = vcmp.eq.s32.totalorder %v9560_v51, %v9607_v16  ;;  %v6078_v41 = vsel %vm1274_vm10, 1.0, %v8979_v6  ;;  %v6110_v42 = vsel %vm1439_vm11, 1.0, %v8979_v6  ;;  %vm1440_vm15 = vcmp.eq.s32.totalorder %v9560_v51, %v9610_v18 }
 0x210   : > { %v6139_v48 = vsel %vm1601_vm12, 1.0, %v8979_v6  ;;  %v6171_v49 = vsel %vm1766_vm13, 1.0, %v8979_v6  ;;  %v8236_v53 = vpack.i.bf16 %v6110_v42, %v6078_v41  ;;  %v6079_v22 = vsel %vm1275_vm14, 1.0, %v8979_v6  ;;  %v8630_v42 = vld [vmem:[%s9265_s22 + $0x48] sm:$0xff] }
 0x211   : > { %v6111_v26 = vsel %vm1440_vm15, 1.0, %v8979_v6  ;;  %v8342_v58 = vpack.i.bf16 %v6171_v49, %v6139_v48  ;;  %vm1276_vm0 = vcmp.eq.s32.totalorder %v9576_v57, %v9607_v16  ;;  %vm1441_vm1 = vcmp.eq.s32.totalorder %v9576_v57, %v9610_v18 }
 0x212   : > { %8135 = vxpose.xlu1.b32.cont [14/16] %v8134_v29, 128  ;;  %v6109_v29 = vsel %vm1438_vm7, 1.0, %v8979_v6  ;;  %vm1277_vm2 = vcmp.eq.s32.totalorder %v9597_v11, %v9607_v16  ;;  %vm1442_vm3 = vcmp.eq.s32.totalorder %v9597_v11, %v9610_v18  ;;  %vm1278_vm4 = vcmp.eq.s32.totalorder %v9615_v21, %v9607_v16 }
 0x213   : > { %8027 = vxpose.xlu0.b32.end [16/16] %v8026_v15, 128  ;;  %vm1443_vm5 = vcmp.eq.s32.totalorder %v9615_v21, %v9610_v18  ;;  %vm1444_vm7 = vcmp.eq.s32.totalorder %v9634_v8, %v9610_v18  ;;  %vm1602_vm8 = vcmp.eq.s32.totalorder %v9505_v28, %v9687_v62  ;;  %vm1280_vm10 = vcmp.eq.s32.totalorder %v9645_v1, %v9607_v16 }
 0x214   : > { %vm1445_vm11 = vcmp.eq.s32.totalorder %v9645_v1, %v9610_v18  ;;  %vm1603_vm12 = vcmp.eq.s32.totalorder %v9526_v36, %v9687_v62  ;;  %vm1768_vm13 = vcmp.eq.s32.totalorder %v9526_v36, %v9690_v63  ;;  %vm1281_vm14 = vcmp.eq.s32.totalorder %v9664_v52, %v9607_v16 }
 0x215   : > { %vm1446_vm15 = vcmp.eq.s32.totalorder %v9664_v52, %v9610_v18 }
 0x216   : > { %8137 = vxpose.xlu1.b32.cont [15/16] %v8136_v19, 128  ;;  %v8621_v19 = vld [vmem:[%s9265_s22] sm:$0xff] }
 0x217   : > { %8221 = vxpose.xlu0.b32.start [1/16] %v8220_v27, 128  ;;  %v6077_v27 = vsel %vm1273_vm6, 1.0, %v8979_v6  ;;  %vm1279_vm6 = vcmp.eq.s32.totalorder %v9634_v8, %v9607_v16 }
 0x218   : > { %v8234_v40 = vpack.i.bf16 %v6109_v29, %v6077_v27 }
 0x21a   : > { %8139 = vxpose.xlu1.b32.end [16/16] %v8138_v24, 128 }
 0x21b   : > { %8223 = vxpose.xlu0.b32.cont [2/16] %v8222_v35, 128  ;;  %v6170_v35 = vsel %vm1765_vm9, 1.0, %v8979_v6  ;;  %vm1767_vm9 = vcmp.eq.s32.totalorder %v9505_v28, %v9690_v63 }
 0x21c   : > { %v8340_v44 = vpack.i.bf16 %v6170_v35, %v6138_v33 }
 0x21e   : > { %8333 = vxpose.xlu1.b32.start [1/16] %v8332_v46, 128 }
 0x21f   : > { %8225 = vxpose.xlu0.b32.cont [3/16] %v8224_v23, 128 }
 0x222   : > { %8335 = vxpose.xlu1.b32.cont [2/16] %v8334_v34, 128 }
 0x223   : > { %8227 = vxpose.xlu0.b32.cont [4/16] %v8226_v25, 128 }
 0x226   : > { %8337 = vxpose.xlu1.b32.cont [3/16] %v8336_v4, 128  ;;  %v8625_v4 = vld [vmem:[%s9265_s22 + $0x20] sm:$0xff] }
 0x227   : > { %8229 = vxpose.xlu0.b32.cont [5/16] %v8228_v0, 128 }
 0x22a   : > { %8339 = vxpose.xlu1.b32.cont [4/16] %v8338_v54, 128 }
 0x22b   : > { %8231 = vxpose.xlu0.b32.cont [6/16] %v8230_v61, 128 }
 0x22e   : > { %8341 = vxpose.xlu1.b32.cont [5/16] %v8340_v44, 128 }
 0x22f   : > { %8233 = vxpose.xlu0.b32.cont [7/16] %v8232_v17, 128  ;;  %v6112_v17 = vsel %vm1441_vm1, 1.0, %v8979_v6  ;;  %vm1769_vm1 = vcmp.eq.s32.totalorder %v9545_v45, %v9690_v63 }
 0x230   : > { %v6174_v18 = vsel %vm1769_vm1, 1.0, %v8979_v6 }
 0x232   : > { %8343 = vxpose.xlu1.b32.cont [6/16] %v8342_v58, 128 }
 0x233   : > { %8235 = vxpose.xlu0.b32.cont [8/16] %v8234_v40, 128 }
 0x237   : > { %8237 = vxpose.xlu0.b32.cont [9/16] %v8236_v53, 128 }
 0x253   : > { %v8028_v28 = vpop.trf.xlu0 }
 0x254   : > { %v8029_v36 = vunpack.i.l.bf16 %v8028_v28 }
 0x27b   : > { %v7233_v60 = vpop.f32.mrf.mxu1 }
 0x27c   : > { %v2364_v14 = vadd.f32 %v7233_v60, %v9779_v50  ;;  %v8624_v60 = vld [vmem:[%s9265_s22 + $0x38] sm:$0xff] }
 0x27d   : > { %v2355_v3 = vpop.f32.mrf.mxu1 }
 0x27e   : > { %v2356_v5 = vadd.f32 %v9779_v50, %v2355_v3  ;;  %v9825_v23 = vadd.f32 %v8623_v39, %v2364_v14  ;;  %v8628_v39 = vld [vmem:[%s9265_s22 + $0x58] sm:$0xff] }
 0x27f   : > { %v7234_v13 = vpop.f32.mrf.mxu1 }
 0x280   : > { %v2367_v15 = vadd.f32 %v7234_v13, %v9779_v50  ;;  %v9815_v12 = vadd.f32 %v8621_v19, %v2356_v5  ;;  %11625 = vst [vmem:[#allocation31_spill] sm:$0xff] %v9825_v23  ;;  %v6081_v19 = vsel %vm1277_vm2, 1.0, %v8979_v6  ;;  %vm1605_vm2 = vcmp.eq.s32.totalorder %v9560_v51, %v9687_v62 }
 0x281   : > { %v2358_v47 = vpop.f32.mrf.mxu1 }
 0x282   : > { %v2359_v20 = vadd.f32 %v9779_v50, %v2358_v47  ;;  %v9802_v31 = vadd.f32 %v8620_v30, %v2367_v15  ;;  %11623 = vst [vmem:[#allocation29_spill] sm:$0xff] %v9815_v12  ;;  %v8238_v15 = vpack.i.bf16 %v6111_v26, %v6079_v22  ;;  %v6080_v47 = vsel %vm1276_vm0, 1.0, %v8979_v6 }
 0x283   : > { %v7237_v32 = vpop.f32.mrf.mxu1  ;;  %v8240_v33 = vpack.i.bf16 %v6112_v17, %v6080_v47  ;;  %v8634_v47 = vld [vmem:[%s9265_s22 + $0x68] sm:$0xff]  ;;  %vm1604_vm0 = vcmp.eq.s32.totalorder %v9545_v45, %v9687_v62 }
 0x284   : > { %11622 = vst [vmem:[#allocation28_spill] sm:$0xff] %v9802_v31  ;;  %v9818_v38 = vadd.f32 %v8622_v37, %v2359_v20  ;;  %v2435_v25 = vpack.c.bf16 %v9802_v31, %v9825_v23  ;;  %v2380_v0 = vadd.f32 %v7237_v32, %v9779_v50  ;;  %8239 = vxpose.xlu0.b32.cont [10/16] %v8238_v15, 128  ;;  %v6113_v37 = vsel %vm1442_vm3, 1.0, %v8979_v6  ;;  %v8633_v15 = vld [vmem:[%s9265_s22 + $0x60] sm:$0xff] }
 0x285   : > { %v2371_v24 = vpop.f32.mrf.mxu1  ;;  %v8242_v49 = vpack.i.bf16 %v6113_v37, %v6081_v19  ;;  %v6142_v16 = vsel %vm1604_vm0, 1.0, %v8979_v6  ;;  %vm1770_vm3 = vcmp.eq.s32.totalorder %v9560_v51, %v9690_v63 }
 0x286   : > { %11624 = vst [vmem:[#allocation30_spill] sm:$0xff] %v9818_v38  ;;  %v2434_v59 = vpack.c.bf16 %v9818_v38, %v9815_v12  ;;  %v2372_v43 = vadd.f32 %v9779_v50, %v2371_v24  ;;  %v9874_v13 = vadd.f32 %v8627_v10, %v2380_v0  ;;  %v6114_v0 = vsel %vm1443_vm5, 1.0, %v8979_v6  ;;  %v8632_v10 = vld [vmem:[%s9265_s22 + $0x78] sm:$0xff] }
 0x287   : > { %v7238_v46 = vpop.f32.mrf.mxu1  ;;  %vm1771_vm5 = vcmp.eq.s32.totalorder %v9576_v57, %v9690_v63 }
 0x288   : > { %v2383_v55 = vadd.f32 %v7238_v46, %v9779_v50  ;;  %7263 = vmatprep.mubr.bf16.mxu0 %v2434_v59  ;;  %v9868_v2 = vadd.f32 %v8625_v4, %v2372_v43  ;;  %11629 = vst [vmem:[#allocation35_spill] sm:$0xff] %v9874_v13  ;;  %v8629_v59 = vld [vmem:[%s9265_s22 + $0x40] sm:$0xff]  ;;  %8241 = vxpose.xlu0.b32.cont [11/16] %v8240_v33, 128  ;;  %v6083_v4 = vsel %vm1279_vm6, 1.0, %v8979_v6  ;;  %v6084_v33 = vsel %vm1280_vm10, 1.0, %v8979_v6 }
 0x289   : > { %v2374_v34 = vpop.f32.mrf.mxu1  ;;  %7264 = vmatmul.mubr.bf16.vlgmr.msra.gmra.mxu0 %v2435_v25  ;;  %v8631_v25 = vld [vmem:[%s9265_s22 + $0x50] sm:$0xff]  ;;  %v6176_v51 = vsel %vm1771_vm5, 1.0, %v8979_v6  ;;  %vm1607_vm6 = vcmp.eq.s32.totalorder %v9597_v11, %v9687_v62  ;;  %vm1609_vm10 = vcmp.eq.s32.totalorder %v9634_v8, %v9687_v62 }
 0x28a   : > { %v2375_v56 = vadd.f32 %v9779_v50, %v2374_v34  ;;  %v9861_v3 = vadd.f32 %v8624_v60, %v2383_v55  ;;  %11627 = vst [vmem:[#allocation33_spill] sm:$0xff] %v9868_v2  ;;  %v6082_v55 = vsel %vm1278_vm4, 1.0, %v8979_v6  ;;  %vm1606_vm4 = vcmp.eq.s32.totalorder %v9576_v57, %v9687_v62 }
 0x28b   : > { %v7241_v61 = vpop.f32.mrf.mxu1  ;;  %v8244_v60 = vpack.i.bf16 %v6114_v0, %v6082_v55  ;;  %v8348_v55 = vpack.i.bf16 %v6174_v18, %v6142_v16 }
 0x28c   : > { %11626 = vst [vmem:[#allocation32_spill] sm:$0xff] %v9861_v3  ;;  %v9871_v9 = vadd.f32 %v8626_v7, %v2375_v56  ;;  %v2437_v20 = vpack.c.bf16 %v9861_v3, %v9874_v13  ;;  %v2396_v30 = vadd.f32 %v7241_v61, %v9779_v50  ;;  %8243 = vxpose.xlu0.b32.cont [12/16] %v8242_v49, 128  ;;  %v6115_v7 = vsel %vm1444_vm7, 1.0, %v8979_v6 }
 0x28d   : > { %v2387_v5 = vpop.f32.mrf.mxu1  ;;  %v8032_v49 = vunpack.i.h.bf16 %v8028_v28  ;;  %vm1772_vm7 = vcmp.eq.s32.totalorder %v9597_v11, %v9690_v63 }
 0x28e   : > { %11628 = vst [vmem:[#allocation34_spill] sm:$0xff] %v9871_v9  ;;  %v2436_v14 = vpack.c.bf16 %v9871_v9, %v9868_v2  ;;  %v2388_v27 = vadd.f32 %v9779_v50, %v2387_v5  ;;  %v9906_v46 = vadd.f32 %v8631_v25, %v2396_v30  ;;  %v6140_v30 = vsel %vm1602_vm8, 1.0, %v8979_v6 }
 0x28f   : > { %v7242_v54 = vpop.f32.mrf.mxu1  ;;  %vm1608_vm8 = vcmp.eq.s32.totalorder %v9615_v21, %v9687_v62 }
 0x290   : > { %v2399_v29 = vadd.f32 %v7242_v54, %v9779_v50  ;;  %7267 = vmatprep.mubr.bf16.mxu0 %v2436_v14  ;;  %v9900_v41 = vadd.f32 %v8629_v59, %v2388_v27  ;;  %11633 = vst [vmem:[#allocation39_spill] sm:$0xff] %v9906_v46  ;;  %v8635_v54 = vld [vmem:[%s9265_s22 + $0x70] sm:$0xff]  ;;  %8245 = vxpose.xlu0.b32.cont [13/16] %v8244_v60, 128  ;;  %v6085_v59 = vsel %vm1281_vm14, 1.0, %v8979_v6  ;;  %v6146_v11 = vsel %vm1608_vm8, 1.0, %v8979_v6 }
 0x291   : > { %v2390_v32 = vpop.f32.mrf.mxu1  ;;  %7268 = vmatmul.mubr.bf16.gmra.mxu0 %v2437_v20  ;;  %v8246_v27 = vpack.i.bf16 %v6115_v7, %v6083_v4  ;;  %v6144_v4 = vsel %vm1606_vm4, 1.0, %v8979_v6  ;;  %vm1611_vm14 = vcmp.eq.s32.totalorder %v9664_v52, %v9687_v62 }
 0x292   : > { %v2391_v35 = vadd.f32 %v9779_v50, %v2390_v32  ;;  %v9893_v24 = vadd.f32 %v8628_v39, %v2399_v29  ;;  %11631 = vst [vmem:[#allocation37_spill] sm:$0xff] %v9900_v41  ;;  %v6172_v32 = vsel %vm1767_vm9, 1.0, %v8979_v6  ;;  %v6141_v39 = vsel %vm1603_vm12, 1.0, %v8979_v6 }
 0x293   : > { %v7245_v40 = vpop.f32.mrf.mxu1  ;;  %v8344_v19 = vpack.i.bf16 %v6172_v32, %v6140_v30  ;;  %vm1773_vm9 = vcmp.eq.s32.totalorder %v9615_v21, %v9690_v63  ;;  %vm1610_vm12 = vcmp.eq.s32.totalorder %v9645_v1, %v9687_v62 }
 0x294   : > { %11630 = vst [vmem:[#allocation36_spill] sm:$0xff] %v9893_v24  ;;  %v9903_v44 = vadd.f32 %v8630_v42, %v2391_v35  ;;  %v2439_v53 = vpack.c.bf16 %v9893_v24, %v9906_v46  ;;  %v2412_v26 = vadd.f32 %v7245_v40, %v9779_v50  ;;  %8247 = vxpose.xlu0.b32.cont [14/16] %v8246_v27, 128  ;;  %v6116_v35 = vsel %vm1445_vm11, 1.0, %v8979_v6 }
 0x295   : > { %v2403_v48 = vpop.f32.mrf.mxu1  ;;  %v8248_v37 = vpack.i.bf16 %v6116_v35, %v6084_v33  ;;  %8345 = vxpose.xlu1.b32.cont [7/16] %v8344_v19, 128  ;;  %v6173_v40 = vsel %vm1768_vm13, 1.0, %v8979_v6  ;;  %v6117_v42 = vsel %vm1446_vm15, 1.0, %v8979_v6  ;;  %vm1774_vm11 = vcmp.eq.s32.totalorder %v9634_v8, %v9690_v63 }
 0x296   : > { %11632 = vst [vmem:[#allocation38_spill] sm:$0xff] %v9903_v44  ;;  %v2438_v43 = vpack.c.bf16 %v9903_v44, %v9900_v41  ;;  %v2404_v56 = vadd.f32 %v9779_v50, %v2403_v48  ;;  %v9934_v20 = vadd.f32 %v8635_v54, %v2412_v26  ;;  %v8346_v25 = vpack.i.bf16 %v6173_v40, %v6141_v39 }
 0x297   : > { %v7246_v34 = vpop.f32.mrf.mxu1  ;;  %v8250_v48 = vpack.i.bf16 %v6117_v42, %v6085_v59  ;;  %v6175_v26 = vsel %vm1770_vm3, 1.0, %v8979_v6  ;;  %v6148_v18 = vsel %vm1610_vm12, 1.0, %v8979_v6  ;;  %vm1775_vm13 = vcmp.eq.s32.totalorder %v9645_v1, %v9690_v63 }
 0x298   : > { %v2415_v22 = vadd.f32 %v7246_v34, %v9779_v50  ;;  %7271 = vmatprep.mubr.bf16.mxu0 %v2438_v43  ;;  %v9928_v14 = vadd.f32 %v8633_v15, %v2404_v56  ;;  %11637 = vst [vmem:[#allocation43_spill] sm:$0xff] %v9934_v20  ;;  %8249 = vxpose.xlu0.b32.cont [15/16] %v8248_v37, 128  ;;  %v8033_v43 = vpop.trf.xlu0  ;;  %v6178_v37 = vsel %vm1773_vm9, 1.0, %v8979_v6  ;;  %v6180_v8 = vsel %vm1775_vm13, 1.0, %v8979_v6 }
 0x299   : > { %v2406_v58 = vpop.f32.mrf.mxu1  ;;  %7272 = vmatmul.mubr.bf16.gmra.mxu0 %v2439_v53  ;;  %8347 = vxpose.xlu1.b32.cont [8/16] %v8346_v25, 128  ;;  %v8037_v0 = vunpack.i.h.bf16 %v8033_v43  ;;  %v8034_v34 = vunpack.i.l.bf16 %v8033_v43  ;;  %v8356_v39 = vpack.i.bf16 %v6178_v37, %v6146_v11  ;;  %vm1776_vm15 = vcmp.eq.s32.totalorder %v9664_v52, %v9690_v63 }
 0x29a   : > { %v2407_v61 = vadd.f32 %v9779_v50, %v2406_v58  ;;  %v9925_v5 = vadd.f32 %v8632_v10, %v2415_v22  ;;  %11635 = vst [vmem:[#allocation41_spill] sm:$0xff] %v9928_v14  ;;  %v6143_v22 = vsel %vm1605_vm2, 1.0, %v8979_v6  ;;  %v8352_v10 = vpack.i.bf16 %v6176_v51, %v6144_v4 }
 0x29b   : > { %v6498_v53 = vpack.c.bf16 %v8037_v0, %v8032_v49  ;;  %v6458_v56 = vpack.c.bf16 %v8034_v34, %v8029_v36  ;;  %v8350_v58 = vpack.i.bf16 %v6175_v26, %v6143_v22  ;;  %v6179_v49 = vsel %vm1774_vm11, 1.0, %v8979_v6 }
 0x29c   : > { %11634 = vst [vmem:[#allocation40_spill] sm:$0xff] %v9925_v5  ;;  %v9931_v17 = vadd.f32 %v8634_v47, %v2407_v61  ;;  %v2441_v29 = vpack.c.bf16 %v9925_v5, %v9934_v20  ;;  %8251 = vxpose.xlu0.b32.end [16/16] %v8250_v48, 128  ;;  %v8038_v45 = vpop.trf.xlu0  ;;  %v6147_v48 = vsel %vm1609_vm10, 1.0, %v8979_v6  ;;  %v8360_v0 = vpack.i.bf16 %v6180_v8, %v6148_v18 }
 0x29d   : > { %8349 = vxpose.xlu1.b32.cont [9/16] %v8348_v55, 128  ;;  %6499 = vst [vmem:[#allocation2 + $0x40] sm:$0xff] %v6498_v53   ;;  %6459 = vst [vmem:[#allocation2] sm:$0xff] %v6458_v56   ;;  %v8042_v60 = vunpack.i.h.bf16 %v8038_v45  ;;  %v8039_v61 = vunpack.i.l.bf16 %v8038_v45  ;;  %v8358_v36 = vpack.i.bf16 %v6179_v49, %v6147_v48  ;;  %v8140_v56 = vpop.trf.xlu1  ;;  %v6149_v22 = vsel %vm1611_vm14, 1.0, %v8979_v6 }
 0x29e   : > { %11636 = vst [vmem:[#allocation42_spill] sm:$0xff] %v9931_v17  ;;  %v2440_v50 = vpack.c.bf16 %v9931_v17, %v9928_v14  ;;  %v6181_v1 = vsel %vm1776_vm15, 1.0, %v8979_v6  ;;  %v8141_v4 = vunpack.i.l.bf16 %v8140_v56 }
 0x2a0   : > { %7275 = vmatprep.mubr.bf16.mxu0 %v2440_v50  ;;  %v8043_v7 = vpop.trf.xlu0  ;;  %v6145_v50 = vsel %vm1607_vm6, 1.0, %v8979_v6 }
 0x2a1   : > { %7276 = vmatmul.mubr.bf16.gmra.mxu0 %v2441_v29  ;;  %8351 = vxpose.xlu1.b32.cont [10/16] %v8350_v58, 128  ;;  %v8047_v15 = vunpack.i.h.bf16 %v8043_v7  ;;  %v8044_v47 = vunpack.i.l.bf16 %v8043_v7  ;;  %v6177_v29 = vsel %vm1772_vm7, 1.0, %v8979_v6  ;;  %v8362_v58 = vpack.i.bf16 %v6181_v1, %v6149_v22  ;;  %v8145_v7 = vpop.trf.xlu1 }
 0x2a2   : > { %v8354_v30 = vpack.i.bf16 %v6177_v29, %v6145_v50  ;;  %v8149_v62 = vunpack.i.h.bf16 %v8145_v7 }
 0x2a3   : > { %v6503_v54 = vpack.c.bf16 %v8047_v15, %v8042_v60  ;;  %v6463_v27 = vpack.c.bf16 %v8044_v47, %v8039_v61  ;;  %v8144_v61 = vunpack.i.h.bf16 %v8140_v56 }
 0x2a4   : > { %v8048_v57 = vpop.trf.xlu0  ;;  %v8468_v33 = vld [vmem:[#allocation2] sm:$0xff]  }
 0x2a5   : > { %8353 = vxpose.xlu1.b32.cont [11/16] %v8352_v10, 128  ;;  %6782 = vst [vmem:[#allocation2 + $0x48] sm:$0xff] %v6503_v54   ;;  %6775 = vst [vmem:[#allocation2 + $0x8] sm:$0xff] %v6463_v27   ;;  %v8052_v32 = vunpack.i.h.bf16 %v8048_v57  ;;  %v8469_v35 = vld [vmem:[#allocation2 + $0x40] sm:$0xff]   ;;  %v8049_v19 = vunpack.i.l.bf16 %v8048_v57  ;;  %7295 = vmatprep.mubr.bf16.mxu1 %v8468_v33  ;;  %v8146_v10 = vunpack.i.l.bf16 %v8145_v7  ;;  %v6578_v47 = vpack.c.bf16 %v8149_v62, %v8144_v61  ;;  %v8150_v6 = vpop.trf.xlu1 }
 0x2a6   : > { %7327 = vmatprep.mubr.bf16.mxu0 %v8469_v35 }
 0x2a7   : > { %v6538_v15 = vpack.c.bf16 %v8146_v10, %v8141_v4  ;;  %6579 = vst [vmem:[#allocation2 + $0xc0] sm:$0xff] %v6578_v47  }
 0x2a8   : > { %v8053_v28 = vpop.trf.xlu0 }
 0x2a9   : > { %8355 = vxpose.xlu1.b32.cont [12/16] %v8354_v30, 128  ;;  %v8057_v40 = vunpack.i.h.bf16 %v8053_v28  ;;  %v8054_v59 = vunpack.i.l.bf16 %v8053_v28  ;;  %6539 = vst [vmem:[#allocation2 + $0x80] sm:$0xff] %v6538_v15   ;;  %v8154_v30 = vunpack.i.h.bf16 %v8150_v6  ;;  %v8155_v35 = vpop.trf.xlu1 }
 0x2aa   : > { %v8156_v11 = vunpack.i.l.bf16 %v8155_v35 }
 0x2ab   : > { %v6508_v42 = vpack.c.bf16 %v8057_v40, %v8052_v32  ;;  %v6468_v25 = vpack.c.bf16 %v8054_v59, %v8049_v19  ;;  %v8151_v32 = vunpack.i.l.bf16 %v8150_v6  ;;  %v8159_v19 = vunpack.i.h.bf16 %v8155_v35 }
 0x2ac   : > { %v8058_v21 = vpop.trf.xlu0 }
 0x2ad   : > { %8357 = vxpose.xlu1.b32.cont [13/16] %v8356_v39, 128  ;;  %6783 = vst [vmem:[#allocation2 + $0x50] sm:$0xff] %v6508_v42   ;;  %6776 = vst [vmem:[#allocation2 + $0x10] sm:$0xff] %v6468_v25   ;;  %v8062_v16 = vunpack.i.h.bf16 %v8058_v21  ;;  %v8059_v43 = vunpack.i.l.bf16 %v8058_v21  ;;  %v6543_v39 = vpack.c.bf16 %v8156_v11, %v8151_v32  ;;  %v6583_v40 = vpack.c.bf16 %v8159_v19, %v8154_v30  ;;  %v8160_v25 = vpop.trf.xlu1 }
 0x2af   : > { %6789 = vst [vmem:[#allocation2 + $0x88] sm:$0xff] %v6543_v39   ;;  %6796 = vst [vmem:[#allocation2 + $0xc8] sm:$0xff] %v6583_v40  }
 0x2b0   : > { %v8063_v55 = vpop.trf.xlu0 }
 0x2b1   : > { %8359 = vxpose.xlu1.b32.cont [14/16] %v8358_v36, 128  ;;  %v8067_v34 = vunpack.i.h.bf16 %v8063_v55  ;;  %v8064_v53 = vunpack.i.l.bf16 %v8063_v55  ;;  %v8164_v36 = vunpack.i.h.bf16 %v8160_v25 }
 0x2b3   : > { %v6513_v45 = vpack.c.bf16 %v8067_v34, %v8062_v16  ;;  %v6473_v26 = vpack.c.bf16 %v8064_v53, %v8059_v43  ;;  %v8161_v16 = vunpack.i.l.bf16 %v8160_v25  ;;  %v8165_v43 = vpop.trf.xlu1 }
 0x2b4   : > { %v8068_v60 = vpop.trf.xlu0  ;;  %v8169_v8 = vunpack.i.h.bf16 %v8165_v43  ;;  %v8166_v55 = vunpack.i.l.bf16 %v8165_v43 }
 0x2b5   : > { %8361 = vxpose.xlu1.b32.cont [15/16] %v8360_v0, 128  ;;  %6784 = vst [vmem:[#allocation2 + $0x58] sm:$0xff] %v6513_v45   ;;  %6777 = vst [vmem:[#allocation2 + $0x18] sm:$0xff] %v6473_v26   ;;  %v8072_v51 = vunpack.i.h.bf16 %v8068_v60  ;;  %v8069_v52 = vunpack.i.l.bf16 %v8068_v60 }
 0x2b6   : > { %v6548_v53 = vpack.c.bf16 %v8166_v55, %v8161_v16  ;;  %v6588_v56 = vpack.c.bf16 %v8169_v8, %v8164_v36 }
 0x2b8   : > { %v8073_v63 = vpop.trf.xlu0  ;;  %6790 = vst [vmem:[#allocation2 + $0x90] sm:$0xff] %v6548_v53   ;;  %6797 = vst [vmem:[#allocation2 + $0xd0] sm:$0xff] %v6588_v56  }
 0x2b9   : > { %8363 = vxpose.xlu1.b32.end [16/16] %v8362_v58, 128  ;;  %v8077_v54 = vunpack.i.h.bf16 %v8073_v63  ;;  %v8074_v27 = vunpack.i.l.bf16 %v8073_v63  ;;  %v8170_v58 = vpop.trf.xlu1 }
 0x2ba   : > { %v8174_v61 = vunpack.i.h.bf16 %v8170_v58  ;;  %v8171_v4 = vunpack.i.l.bf16 %v8170_v58 }
 0x2bb   : > { %v6518_v57 = vpack.c.bf16 %v8077_v54, %v8072_v51  ;;  %v6478_v50 = vpack.c.bf16 %v8074_v27, %v8069_v52 }
 0x2bc   : > { %v8078_v29 = vpop.trf.xlu0 }
 0x2bd   : > { %6785 = vst [vmem:[#allocation2 + $0x60] sm:$0xff] %v6518_v57   ;;  %6778 = vst [vmem:[#allocation2 + $0x20] sm:$0xff] %v6478_v50   ;;  %v8082_v33 = vunpack.i.h.bf16 %v8078_v29  ;;  %v8079_v37 = vunpack.i.l.bf16 %v8078_v29  ;;  %v8175_v62 = vpop.trf.xlu1 }
 0x2be   : > { %v8179_v52 = vunpack.i.h.bf16 %v8175_v62  ;;  %v8176_v63 = vunpack.i.l.bf16 %v8175_v62 }
 0x2c0   : > { %v8083_v28 = vpop.trf.xlu0  ;;  %v6553_v54 = vpack.c.bf16 %v8176_v63, %v8171_v4  ;;  %v6593_v27 = vpack.c.bf16 %v8179_v52, %v8174_v61 }
 0x2c1   : > { %v8087_v59 = vunpack.i.h.bf16 %v8083_v28  ;;  %v8084_v42 = vunpack.i.l.bf16 %v8083_v28  ;;  %v8180_v50 = vpop.trf.xlu1 }
 0x2c2   : > { %6791 = vst [vmem:[#allocation2 + $0x98] sm:$0xff] %v6553_v54   ;;  %6798 = vst [vmem:[#allocation2 + $0xd8] sm:$0xff] %v6593_v27   ;;  %v8184_v29 = vunpack.i.h.bf16 %v8180_v50  ;;  %v8181_v30 = vunpack.i.l.bf16 %v8180_v50 }
 0x2c3   : > { %v6523_v21 = vpack.c.bf16 %v8087_v59, %v8082_v33  ;;  %v6483_v48 = vpack.c.bf16 %v8084_v42, %v8079_v37 }
 0x2c4   : > { %v8088_v49 = vpop.trf.xlu0 }
 0x2c5   : > { %6786 = vst [vmem:[#allocation2 + $0x68] sm:$0xff] %v6523_v21   ;;  %6779 = vst [vmem:[#allocation2 + $0x28] sm:$0xff] %v6483_v48   ;;  %v8092_v18 = vunpack.i.h.bf16 %v8088_v49  ;;  %v8089_v0 = vunpack.i.l.bf16 %v8088_v49  ;;  %v8185_v33 = vpop.trf.xlu1 }
 0x2c6   : > { %v8189_v35 = vunpack.i.h.bf16 %v8185_v33  ;;  %v8186_v19 = vunpack.i.l.bf16 %v8185_v33 }
 0x2c8   : > { %v8093_v34 = vpop.trf.xlu0  ;;  %v6558_v28 = vpack.c.bf16 %v8186_v19, %v8181_v30  ;;  %v6598_v39 = vpack.c.bf16 %v8189_v35, %v8184_v29 }
 0x2c9   : > { %v8097_v45 = vunpack.i.h.bf16 %v8093_v34  ;;  %v8094_v22 = vunpack.i.l.bf16 %v8093_v34  ;;  %v8190_v59 = vpop.trf.xlu1 }
 0x2ca   : > { %6792 = vst [vmem:[#allocation2 + $0xa0] sm:$0xff] %v6558_v28   ;;  %6799 = vst [vmem:[#allocation2 + $0xe0] sm:$0xff] %v6598_v39   ;;  %v8194_v49 = vunpack.i.h.bf16 %v8190_v59  ;;  %v8191_v36 = vunpack.i.l.bf16 %v8190_v59 }
 0x2cb   : > { %v6528_v1 = vpack.c.bf16 %v8097_v45, %v8092_v18  ;;  %v6488_v26 = vpack.c.bf16 %v8094_v22, %v8089_v0 }
 0x2cc   : > { %v8098_v60 = vpop.trf.xlu0 }
 0x2cd   : > { %6787 = vst [vmem:[#allocation2 + $0x70] sm:$0xff] %v6528_v1   ;;  %6780 = vst [vmem:[#allocation2 + $0x30] sm:$0xff] %v6488_v26   ;;  %v8102_v51 = vunpack.i.h.bf16 %v8098_v60  ;;  %v8099_v7 = vunpack.i.l.bf16 %v8098_v60  ;;  %v8195_v18 = vpop.trf.xlu1 }
 0x2ce   : > { %v8199_v43 = vunpack.i.h.bf16 %v8195_v18  ;;  %v8196_v8 = vunpack.i.l.bf16 %v8195_v18 }
 0x2d0   : > { %v8103_v10 = vpop.trf.xlu0  ;;  %v6563_v34 = vpack.c.bf16 %v8196_v8, %v8191_v36  ;;  %v6603_v53 = vpack.c.bf16 %v8199_v43, %v8194_v49 }
 0x2d1   : > { %v8107_v15 = vunpack.i.h.bf16 %v8103_v10  ;;  %v8104_v47 = vunpack.i.l.bf16 %v8103_v10  ;;  %v8200_v45 = vpop.trf.xlu1 }
 0x2d2   : > { %6793 = vst [vmem:[#allocation2 + $0xa8] sm:$0xff] %v6563_v34   ;;  %6800 = vst [vmem:[#allocation2 + $0xe8] sm:$0xff] %v6603_v53   ;;  %v8204_v60 = vunpack.i.h.bf16 %v8200_v45  ;;  %v8201_v61 = vunpack.i.l.bf16 %v8200_v45 }
 0x2d3   : > { %v6493_v6 = vpack.c.bf16 %v8104_v47, %v8099_v7  ;;  %v6533_v57 = vpack.c.bf16 %v8107_v15, %v8102_v51 }
 0x2d5   : > { %6781 = vst [vmem:[#allocation2 + $0x38] sm:$0xff] %v6493_v6   ;;  %6788 = vst [vmem:[#allocation2 + $0x78] sm:$0xff] %v6533_v57   ;;  %v8205_v51 = vpop.trf.xlu1 }
 0x2d6   : > { %v8209_v7 = vunpack.i.h.bf16 %v8205_v51  ;;  %v8206_v62 = vunpack.i.l.bf16 %v8205_v51 }
 0x2d8   : > { %v6568_v63 = vpack.c.bf16 %v8206_v62, %v8201_v61  ;;  %v6608_v15 = vpack.c.bf16 %v8209_v7, %v8204_v60 }
 0x2d9   : > { %v8210_v6 = vpop.trf.xlu1 }
 0x2da   : > { %6794 = vst [vmem:[#allocation2 + $0xb0] sm:$0xff] %v6568_v63   ;;  %6801 = vst [vmem:[#allocation2 + $0xf0] sm:$0xff] %v6608_v15   ;;  %v8214_v29 = vunpack.i.h.bf16 %v8210_v6  ;;  %v8211_v30 = vunpack.i.l.bf16 %v8210_v6 }
 0x2dc   : > { %v8252_v32 = vpop.trf.xlu0 }
 0x2dd   : > { %v8256_v11 = vunpack.i.h.bf16 %v8252_v32  ;;  %v8253_v37 = vunpack.i.l.bf16 %v8252_v32  ;;  %v8215_v33 = vpop.trf.xlu1 }
 0x2de   : > { %v8219_v35 = vunpack.i.h.bf16 %v8215_v33  ;;  %v8216_v19 = vunpack.i.l.bf16 %v8215_v33 }
 0x2e0   : > { %v8257_v40 = vpop.trf.xlu0  ;;  %v6573_v28 = vpack.c.bf16 %v8216_v19, %v8211_v30  ;;  %v6613_v39 = vpack.c.bf16 %v8219_v35, %v8214_v29 }
 0x2e1   : > { %v8261_v42 = vunpack.i.h.bf16 %v8257_v40  ;;  %v8258_v25 = vunpack.i.l.bf16 %v8257_v40 }
 0x2e2   : > { %6795 = vst [vmem:[#allocation2 + $0xb8] sm:$0xff] %v6573_v28   ;;  %6802 = vst [vmem:[#allocation2 + $0xf8] sm:$0xff] %v6613_v39  }
 0x2e3   : > { %v6618_v21 = vpack.c.bf16 %v8258_v25, %v8253_v37  ;;  %v6658_v48 = vpack.c.bf16 %v8261_v42, %v8256_v11 }
 0x2e4   : > { %v8262_v16 = vpop.trf.xlu0 }
 0x2e5   : > { %6619 = vst [vmem:[#allocation2 + $0x100] sm:$0xff] %v6618_v21   ;;  %6659 = vst [vmem:[#allocation2 + $0x140] sm:$0xff] %v6658_v48   ;;  %v8266_v55 = vunpack.i.h.bf16 %v8262_v16  ;;  %v8263_v0 = vunpack.i.l.bf16 %v8262_v16 }
 0x2e8   : > { %v8267_v56 = vpop.trf.xlu0 }
 0x2e9   : > { %v8271_v22 = vunpack.i.h.bf16 %v8267_v56  ;;  %v8268_v1 = vunpack.i.l.bf16 %v8267_v56 }
 0x2eb   : > { %v6623_v26 = vpack.c.bf16 %v8268_v1, %v8263_v0  ;;  %v6663_v58 = vpack.c.bf16 %v8271_v22, %v8266_v55 }
 0x2ec   : > { %v8272_v4 = vpop.trf.xlu0 }
 0x2ed   : > { %6803 = vst [vmem:[#allocation2 + $0x108] sm:$0xff] %v6623_v26   ;;  %6810 = vst [vmem:[#allocation2 + $0x148] sm:$0xff] %v6663_v58   ;;  %v8276_v10 = vunpack.i.h.bf16 %v8272_v4  ;;  %v8273_v52 = vunpack.i.l.bf16 %v8272_v4 }
 0x2f0   : > { %v8277_v47 = vpop.trf.xlu0 }
 0x2f1   : > { %v8281_v54 = vunpack.i.h.bf16 %v8277_v47  ;;  %v8278_v27 = vunpack.i.l.bf16 %v8277_v47 }
 0x2f3   : > { %v6628_v57 = vpack.c.bf16 %v8278_v27, %v8273_v52  ;;  %v6668_v50 = vpack.c.bf16 %v8281_v54, %v8276_v10 }
 0x2f4   : > { %v8282_v32 = vpop.trf.xlu0 }
 0x2f5   : > { %6804 = vst [vmem:[#allocation2 + $0x110] sm:$0xff] %v6628_v57   ;;  %6811 = vst [vmem:[#allocation2 + $0x150] sm:$0xff] %v6668_v50   ;;  %v8286_v11 = vunpack.i.h.bf16 %v8282_v32  ;;  %v8283_v37 = vunpack.i.l.bf16 %v8282_v32 }
 0x2f8   : > { %v8287_v40 = vpop.trf.xlu0 }
 0x2f9   : > { %v8291_v59 = vunpack.i.h.bf16 %v8287_v40  ;;  %v8288_v42 = vunpack.i.l.bf16 %v8287_v40  ;;  %v8364_v48 = vpop.trf.xlu1 }
 0x2fa   : > { %v8368_v36 = vunpack.i.h.bf16 %v8364_v48  ;;  %v8365_v16 = vunpack.i.l.bf16 %v8364_v48 }
 0x2fb   : > { %v6633_v25 = vpack.c.bf16 %v8288_v42, %v8283_v37  ;;  %v6673_v21 = vpack.c.bf16 %v8291_v59, %v8286_v11 }
 0x2fc   : > { %v8292_v49 = vpop.trf.xlu0 }
 0x2fd   : > { %6805 = vst [vmem:[#allocation2 + $0x118] sm:$0xff] %v6633_v25   ;;  %6812 = vst [vmem:[#allocation2 + $0x158] sm:$0xff] %v6673_v21   ;;  %v8296_v18 = vunpack.i.h.bf16 %v8292_v49  ;;  %v8293_v43 = vunpack.i.l.bf16 %v8292_v49  ;;  %v8369_v8 = vpop.trf.xlu1 }
 0x2fe   : > { %v8373_v0 = vunpack.i.h.bf16 %v8369_v8  ;;  %v8370_v34 = vunpack.i.l.bf16 %v8369_v8 }
 0x300   : > { %v8297_v55 = vpop.trf.xlu0  ;;  %v6698_v45 = vpack.c.bf16 %v8370_v34, %v8365_v16  ;;  %v6738_v22 = vpack.c.bf16 %v8373_v0, %v8368_v36 }
 0x301   : > { %v8301_v53 = vunpack.i.h.bf16 %v8297_v55  ;;  %v8298_v56 = vunpack.i.l.bf16 %v8297_v55  ;;  %v8374_v58 = vpop.trf.xlu1 }
 0x302   : > { %6699 = vst [vmem:[#allocation2 + $0x180] sm:$0xff] %v6698_v45   ;;  %6739 = vst [vmem:[#allocation2 + $0x1c0] sm:$0xff] %v6738_v22   ;;  %v8378_v61 = vunpack.i.h.bf16 %v8374_v58  ;;  %v8375_v4 = vunpack.i.l.bf16 %v8374_v58 }
 0x303   : > { %v6638_v1 = vpack.c.bf16 %v8298_v56, %v8293_v43  ;;  %v6678_v26 = vpack.c.bf16 %v8301_v53, %v8296_v18 }
 0x304   : > { %v8302_v60 = vpop.trf.xlu0 }
 0x305   : > { %6806 = vst [vmem:[#allocation2 + $0x120] sm:$0xff] %v6638_v1   ;;  %6813 = vst [vmem:[#allocation2 + $0x160] sm:$0xff] %v6678_v26   ;;  %v8306_v51 = vunpack.i.h.bf16 %v8302_v60  ;;  %v8303_v7 = vunpack.i.l.bf16 %v8302_v60  ;;  %v8379_v62 = vpop.trf.xlu1 }
 0x306   : > { %v8383_v52 = vunpack.i.h.bf16 %v8379_v62  ;;  %v8380_v63 = vunpack.i.l.bf16 %v8379_v62 }
 0x308   : > { %v8307_v10 = vpop.trf.xlu0  ;;  %v6703_v54 = vpack.c.bf16 %v8380_v63, %v8375_v4  ;;  %v6743_v27 = vpack.c.bf16 %v8383_v52, %v8378_v61 }
 0x309   : > { %v8311_v15 = vunpack.i.h.bf16 %v8307_v10  ;;  %v8308_v47 = vunpack.i.l.bf16 %v8307_v10  ;;  %v8384_v50 = vpop.trf.xlu1 }
 0x30a   : > { %6817 = vst [vmem:[#allocation2 + $0x188] sm:$0xff] %v6703_v54   ;;  %6824 = vst [vmem:[#allocation2 + $0x1c8] sm:$0xff] %v6743_v27   ;;  %v8388_v30 = vunpack.i.h.bf16 %v8384_v50  ;;  %v8385_v32 = vunpack.i.l.bf16 %v8384_v50 }
 0x30b   : > { %v6643_v6 = vpack.c.bf16 %v8308_v47, %v8303_v7  ;;  %v6683_v57 = vpack.c.bf16 %v8311_v15, %v8306_v51 }
 0x30c   : > { %v8312_v29 = vpop.trf.xlu0 }
 0x30d   : > { %6807 = vst [vmem:[#allocation2 + $0x128] sm:$0xff] %v6643_v6   ;;  %6814 = vst [vmem:[#allocation2 + $0x168] sm:$0xff] %v6683_v57   ;;  %v8316_v33 = vunpack.i.h.bf16 %v8312_v29  ;;  %v8313_v35 = vunpack.i.l.bf16 %v8312_v29  ;;  %v8389_v19 = vpop.trf.xlu1 }
 0x30e   : > { %v8393_v28 = vunpack.i.h.bf16 %v8389_v19  ;;  %v8390_v39 = vunpack.i.l.bf16 %v8389_v19 }
 0x310   : > { %v8317_v11 = vpop.trf.xlu0  ;;  %v6708_v25 = vpack.c.bf16 %v8390_v39, %v8385_v32  ;;  %v6748_v21 = vpack.c.bf16 %v8393_v28, %v8388_v30 }
 0x311   : > { %v8321_v40 = vunpack.i.h.bf16 %v8317_v11  ;;  %v8318_v59 = vunpack.i.l.bf16 %v8317_v11  ;;  %v8394_v36 = vpop.trf.xlu1 }
 0x312   : > { %6818 = vst [vmem:[#allocation2 + $0x190] sm:$0xff] %v6708_v25   ;;  %6825 = vst [vmem:[#allocation2 + $0x1d0] sm:$0xff] %v6748_v21   ;;  %v8398_v8 = vunpack.i.h.bf16 %v8394_v36  ;;  %v8395_v55 = vunpack.i.l.bf16 %v8394_v36 }
 0x313   : > { %v6648_v48 = vpack.c.bf16 %v8318_v59, %v8313_v35  ;;  %v6688_v49 = vpack.c.bf16 %v8321_v40, %v8316_v33 }
 0x314   : > { %v8322_v16 = vpop.trf.xlu0 }
 0x315   : > { %6808 = vst [vmem:[#allocation2 + $0x130] sm:$0xff] %v6648_v48   ;;  %6815 = vst [vmem:[#allocation2 + $0x170] sm:$0xff] %v6688_v49   ;;  %v8326_v0 = vunpack.i.h.bf16 %v8322_v16  ;;  %v8323_v34 = vunpack.i.l.bf16 %v8322_v16  ;;  %v8399_v53 = vpop.trf.xlu1 }
 0x316   : > { %v8403_v22 = vunpack.i.h.bf16 %v8399_v53  ;;  %v8400_v1 = vunpack.i.l.bf16 %v8399_v53 }
 0x318   : > { %v8327_v56 = vpop.trf.xlu0  ;;  %v6713_v61 = vpack.c.bf16 %v8400_v1, %v8395_v55  ;;  %v6753_v4 = vpack.c.bf16 %v8403_v22, %v8398_v8 }
 0x319   : > { %v8331_v26 = vunpack.i.h.bf16 %v8327_v56  ;;  %v8328_v58 = vunpack.i.l.bf16 %v8327_v56  ;;  %v8404_v62 = vpop.trf.xlu1 }
 0x31a   : > { %6819 = vst [vmem:[#allocation2 + $0x198] sm:$0xff] %v6713_v61   ;;  %6826 = vst [vmem:[#allocation2 + $0x1d8] sm:$0xff] %v6753_v4   ;;  %v8408_v63 = vunpack.i.h.bf16 %v8404_v62  ;;  %v8405_v15 = vunpack.i.l.bf16 %v8404_v62 }
 0x31b   : > { %v6653_v51 = vpack.c.bf16 %v8328_v58, %v8323_v34  ;;  %v6693_v7 = vpack.c.bf16 %v8331_v26, %v8326_v0 }
 0x31d   : > { %6809 = vst [vmem:[#allocation2 + $0x138] sm:$0xff] %v6653_v51   ;;  %6816 = vst [vmem:[#allocation2 + $0x178] sm:$0xff] %v6693_v7   ;;  %v8409_v47 = vpop.trf.xlu1 }
 0x31e   : > { %v8413_v27 = vunpack.i.h.bf16 %v8409_v47  ;;  %v8410_v6 = vunpack.i.l.bf16 %v8409_v47 }
 0x320   : > { %v6718_v50 = vpack.c.bf16 %v8410_v6, %v8405_v15  ;;  %v6758_v29 = vpack.c.bf16 %v8413_v27, %v8408_v63 }
 0x321   : > { %v8414_v30 = vpop.trf.xlu1 }
 0x322   : > { %6820 = vst [vmem:[#allocation2 + $0x1a0] sm:$0xff] %v6718_v50   ;;  %6827 = vst [vmem:[#allocation2 + $0x1e0] sm:$0xff] %v6758_v29   ;;  %v8418_v35 = vunpack.i.h.bf16 %v8414_v30  ;;  %v8415_v19 = vunpack.i.l.bf16 %v8414_v30  ;;  %v8470_v30 = vld [vmem:[#allocation2 + $0x8] sm:$0xff]  }
 0x325   : > { %v8419_v11 = vpop.trf.xlu1 }
 0x326   : > { %v8423_v39 = vunpack.i.h.bf16 %v8419_v11  ;;  %v8420_v40 = vunpack.i.l.bf16 %v8419_v11  ;;  %v8473_v11 = vld [vmem:[#allocation2 + $0x50] sm:$0xff]  }
 0x328   : > { %v6723_v25 = vpack.c.bf16 %v8420_v40, %v8415_v19  ;;  %v6763_v21 = vpack.c.bf16 %v8423_v39, %v8418_v35  ;;  %v8471_v35 = vld [vmem:[#allocation2 + $0x48] sm:$0xff]   ;;  %v8472_v19 = vld [vmem:[#allocation2 + $0x10] sm:$0xff]   ;;  %v8474_v39 = vld [vmem:[#allocation2 + $0x18] sm:$0xff]  }
 0x329   : > { %v8424_v48 = vpop.trf.xlu1  ;;  %v8475_v40 = vld [vmem:[#allocation2 + $0x58] sm:$0xff]  }
 0x32a   : > { %6821 = vst [vmem:[#allocation2 + $0x1a8] sm:$0xff] %v6723_v25   ;;  %6828 = vst [vmem:[#allocation2 + $0x1e8] sm:$0xff] %v6763_v21   ;;  %v8428_v8 = vunpack.i.h.bf16 %v8424_v48  ;;  %v8425_v55 = vunpack.i.l.bf16 %v8424_v48  ;;  %v8476_v25 = vld [vmem:[#allocation2 + $0x20] sm:$0xff]   ;;  %v8478_v48 = vld [vmem:[#allocation2 + $0x28] sm:$0xff]  }
 0x32b   : > { %v8477_v21 = vld [vmem:[#allocation2 + $0x60] sm:$0xff]  }
 0x32d   : > { %v8429_v34 = vpop.trf.xlu1 }
 0x32e   : > { %v8433_v53 = vunpack.i.h.bf16 %v8429_v34  ;;  %v8430_v56 = vunpack.i.l.bf16 %v8429_v34  ;;  %v8481_v34 = vld [vmem:[#allocation2 + $0x70] sm:$0xff]  }
 0x330   : > { %v6728_v22 = vpack.c.bf16 %v8430_v56, %v8425_v55  ;;  %v6768_v1 = vpack.c.bf16 %v8433_v53, %v8428_v8  ;;  %v8479_v8 = vld [vmem:[#allocation2 + $0x68] sm:$0xff]   ;;  %v8480_v55 = vld [vmem:[#allocation2 + $0x30] sm:$0xff]   ;;  %v8482_v53 = vld [vmem:[#allocation2 + $0x38] sm:$0xff]  }
 0x331   : > { %v8434_v58 = vpop.trf.xlu1  ;;  %v8483_v56 = vld [vmem:[#allocation2 + $0x78] sm:$0xff]  }
 0x332   : > { %6822 = vst [vmem:[#allocation2 + $0x1b0] sm:$0xff] %v6728_v22   ;;  %6829 = vst [vmem:[#allocation2 + $0x1f0] sm:$0xff] %v6768_v1   ;;  %v8438_v61 = vunpack.i.h.bf16 %v8434_v58  ;;  %v8435_v4 = vunpack.i.l.bf16 %v8434_v58  ;;  %v8484_v22 = vld [vmem:[#allocation2 + $0x80] sm:$0xff]   ;;  %v8486_v58 = vld [vmem:[#allocation2 + $0x88] sm:$0xff]  }
 0x333   : > { %v8485_v1 = vld [vmem:[#allocation2 + $0xc0] sm:$0xff]  }
 0x335   : > { %v8439_v7 = vpop.trf.xlu1 }
 0x336   : > { %v8443_v62 = vunpack.i.h.bf16 %v8439_v7  ;;  %v8440_v63 = vunpack.i.l.bf16 %v8439_v7  ;;  %v8489_v7 = vld [vmem:[#allocation2 + $0xd0] sm:$0xff]  }
 0x338   : > { %v6733_v15 = vpack.c.bf16 %v8440_v63, %v8435_v4  ;;  %v6773_v47 = vpack.c.bf16 %v8443_v62, %v8438_v61  ;;  %v8487_v61 = vld [vmem:[#allocation2 + $0xc8] sm:$0xff]   ;;  %v8488_v4 = vld [vmem:[#allocation2 + $0x90] sm:$0xff]   ;;  %v8490_v62 = vld [vmem:[#allocation2 + $0x98] sm:$0xff]  }
 0x339   : > { %v8491_v63 = vld [vmem:[#allocation2 + $0xd8] sm:$0xff]  }
 0x33a   : > { %6823 = vst [vmem:[#allocation2 + $0x1b8] sm:$0xff] %v6733_v15   ;;  %6830 = vst [vmem:[#allocation2 + $0x1f8] sm:$0xff] %v6773_v47   ;;  %v8492_v15 = vld [vmem:[#allocation2 + $0xa0] sm:$0xff]  }
 0x33b   : > { %v8493_v47 = vld [vmem:[#allocation2 + $0xe0] sm:$0xff]  }
 0x349   : > { %v10012_v37 = vpop.f32.mrf.mxu0 }
 0x34a   : > { %11638 = vst [vmem:[#allocation44_spill] sm:$0xff] %v10012_v37 }
 0x34b   : > { %v10014_v42 = vpop.f32.mrf.mxu0 }
 0x34c   : > { %11639 = vst [vmem:[#allocation45_spill] sm:$0xff] %v10014_v42 }
 0x34d   : > { %v10016_v18 = vpop.f32.mrf.mxu0 }
 0x34e   : > { %11640 = vst [vmem:[#allocation46_spill] sm:$0xff] %v10016_v18  ;;  %v10092_v50 = vpack.c.bf16 %v10016_v18, %v10012_v37 }
 0x34f   : > { %v10018_v43 = vpop.f32.mrf.mxu0 }
 0x350   : > { %11641 = vst [vmem:[#allocation47_spill] sm:$0xff] %v10018_v43  ;;  %v10100_v29 = vpack.c.bf16 %v10018_v43, %v10014_v42 }
 0x351   : > { %v10020_v45 = vpop.f32.mrf.mxu0 }
 0x352   : > { %11642 = vst [vmem:[#allocation48_spill] sm:$0xff] %v10020_v45 }
 0x353   : > { %v10022_v60 = vpop.f32.mrf.mxu0 }
 0x354   : > { %11643 = vst [vmem:[#allocation49_spill] sm:$0xff] %v10022_v60 }
 0x355   : > { %v10024_v10 = vpop.f32.mrf.mxu0 }
 0x356   : > { %11644 = vst [vmem:[#allocation50_spill] sm:$0xff] %v10024_v10  ;;  %v10076_v27 = vpack.c.bf16 %v10024_v10, %v10020_v45 }
 0x357   : > { %v10026_v52 = vpop.f32.mrf.mxu0 }
 0x358   : > { %11645 = vst [vmem:[#allocation51_spill] sm:$0xff] %v10026_v52  ;;  %v10084_v6 = vpack.c.bf16 %v10026_v52, %v10022_v60 }
 0x359   : > { %v10028_v54 = vpop.f32.mrf.mxu0 }
 0x35a   : > { %11646 = vst [vmem:[#allocation52_spill] sm:$0xff] %v10028_v54 }
 0x35b   : > { %v10030_v57 = vpop.f32.mrf.mxu0 }
 0x35c   : > { %11647 = vst [vmem:[#allocation53_spill] sm:$0xff] %v10030_v57 }
 0x35d   : > { %v10032_v32 = vpop.f32.mrf.mxu0 }
 0x35e   : > { %11648 = vst [vmem:[#allocation54_spill] sm:$0xff] %v10032_v32  ;;  %v10060_v26 = vpack.c.bf16 %v10032_v32, %v10028_v54 }
 0x35f   : > { %v10034_v33 = vpop.f32.mrf.mxu0 }
 0x360   : > { %11649 = vst [vmem:[#allocation55_spill] sm:$0xff] %v10034_v33  ;;  %v10068_v51 = vpack.c.bf16 %v10034_v33, %v10030_v57 }
 0x361   : > { %v10036_v28 = vpop.f32.mrf.mxu0 }
 0x362   : > { %11650 = vst [vmem:[#allocation56_spill] sm:$0xff] %v10036_v28 }
 0x363   : > { %v10038_v59 = vpop.f32.mrf.mxu0 }
 0x364   : > { %11651 = vst [vmem:[#allocation57_spill] sm:$0xff] %v10038_v59 }
 0x365   : > { %v10040_v49 = vpop.f32.mrf.mxu0 }
 0x366   : > { %11652 = vst [vmem:[#allocation58_spill] sm:$0xff] %v10040_v49  ;;  %v10044_v36 = vpack.c.bf16 %v10040_v49, %v10036_v28 }
 0x367   : > { %v10046_v16 = vpop.f32.mrf.mxu0 }
 0x368   : > { %11653 = vst [vmem:[#allocation59_spill] sm:$0xff] %v10046_v16  ;;  %v10050_v0 = vpack.c.bf16 %v10046_v16, %v10038_v59  ;;  %7279 = vmatprep.subr.bf16.mxu1 %v10044_v36  ;;  %7311 = vmatprep.subr.bf16.mxu0 %v10044_v36 }
 0x369   : > { %7280 = vmatpush3.bf16.msra.mxu1 %v10044_v36  ;;  %7312 = vmatpush3.bf16.msra.mxu0 %v10044_v36 }
 0x36a   : > { %7281 = vmatprep.subr.bf16.mxu1 %v10050_v0  ;;  %7313 = vmatprep.subr.bf16.mxu0 %v10050_v0 }
 0x36d   : > { %7282 = vmatpush3.bf16.msra.mxu1 %v10050_v0  ;;  %7314 = vmatpush3.bf16.msra.mxu0 %v10050_v0 }
 0x36e   : > { %7283 = vmatprep.subr.bf16.mxu1 %v10060_v26  ;;  %7315 = vmatprep.subr.bf16.mxu0 %v10060_v26 }
 0x371   : > { %7284 = vmatpush3.bf16.msra.mxu1 %v10060_v26  ;;  %7316 = vmatpush3.bf16.msra.mxu0 %v10060_v26 }
 0x372   : > { %7285 = vmatprep.subr.bf16.mxu1 %v10068_v51  ;;  %7317 = vmatprep.subr.bf16.mxu0 %v10068_v51 }
 0x375   : > { %7286 = vmatpush3.bf16.msra.mxu1 %v10068_v51  ;;  %7318 = vmatpush3.bf16.msra.mxu0 %v10068_v51 }
 0x376   : > { %7287 = vmatprep.subr.bf16.mxu1 %v10076_v27  ;;  %7319 = vmatprep.subr.bf16.mxu0 %v10076_v27 }
 0x379   : > { %7288 = vmatpush3.bf16.msra.mxu1 %v10076_v27  ;;  %7320 = vmatpush3.bf16.msra.mxu0 %v10076_v27 }
 0x37a   : > { %7289 = vmatprep.subr.bf16.mxu1 %v10084_v6  ;;  %7321 = vmatprep.subr.bf16.mxu0 %v10084_v6 }
 0x37d   : > { %7290 = vmatpush3.bf16.msra.mxu1 %v10084_v6  ;;  %7322 = vmatpush3.bf16.msra.mxu0 %v10084_v6 }
 0x37e   : > { %7291 = vmatprep.subr.bf16.mxu1 %v10092_v50  ;;  %7323 = vmatprep.subr.bf16.mxu0 %v10092_v50 }
 0x381   : > { %7292 = vmatpush3.bf16.msra.mxu1 %v10092_v50  ;;  %7324 = vmatpush3.bf16.msra.mxu0 %v10092_v50 }
 0x382   : > { %7293 = vmatprep.subr.bf16.mxu1 %v10100_v29  ;;  %7325 = vmatprep.subr.bf16.mxu0 %v10100_v29 }
 0x385   : > { %7294 = vmatpush3.bf16.msra.mxu1 %v10100_v29  ;;  %7326 = vmatpush3.bf16.msra.mxu0 %v10100_v29 }
 0x386   : > { %7343 = vmatprep.subr.bf16.mxu1 %v10044_v36  ;;  %7375 = vmatprep.subr.bf16.mxu0 %v10044_v36 }
 0x388   : > { %7296 = vmatmul.mubr.bf16.vlgmr.msra.gmra.mxu1 %v8470_v30  ;;  %7328 = vmatmul.mubr.bf16.vlgmr.msra.gmra.mxu0 %v8471_v35  ;;  %v8494_v30 = vld [vmem:[#allocation2 + $0xa8] sm:$0xff]  }
 0x389   : > { %7299 = vmatprep.mubr.bf16.mxu1 %v8472_v19  ;;  %7331 = vmatprep.mubr.bf16.mxu0 %v8473_v11  ;;  %v8495_v35 = vld [vmem:[#allocation2 + $0xe8] sm:$0xff]   ;;  %v8496_v19 = vld [vmem:[#allocation2 + $0xb0] sm:$0xff]  }
 0x38a   : > { %7344 = vmatpush3.bf16.msra.mxu1 %v10044_v36  ;;  %7376 = vmatpush3.bf16.msra.mxu0 %v10044_v36  ;;  %v8497_v11 = vld [vmem:[#allocation2 + $0xf0] sm:$0xff]  }
 0x38b   : > { %7345 = vmatprep.subr.bf16.mxu1 %v10050_v0  ;;  %7377 = vmatprep.subr.bf16.mxu0 %v10050_v0 }
 0x38e   : > { %7346 = vmatpush3.bf16.msra.mxu1 %v10050_v0  ;;  %7378 = vmatpush3.bf16.msra.mxu0 %v10050_v0 }
 0x38f   : > { %7347 = vmatprep.subr.bf16.mxu1 %v10060_v26  ;;  %7379 = vmatprep.subr.bf16.mxu0 %v10060_v26 }
 0x390   : > { %7300 = vmatmul.mubr.bf16.gmra.mxu1 %v8474_v39  ;;  %7332 = vmatmul.mubr.bf16.gmra.mxu0 %v8475_v40  ;;  %v8498_v39 = vld [vmem:[#allocation2 + $0xb8] sm:$0xff]  }
 0x391   : > { %7303 = vmatprep.mubr.bf16.mxu1 %v8476_v25  ;;  %7335 = vmatprep.mubr.bf16.mxu0 %v8477_v21  ;;  %v8499_v40 = vld [vmem:[#allocation2 + $0xf8] sm:$0xff]   ;;  %v8500_v25 = vld [vmem:[#allocation2 + $0x100] sm:$0xff]  }
 0x392   : > { %7348 = vmatpush3.bf16.msra.mxu1 %v10060_v26  ;;  %7380 = vmatpush3.bf16.msra.mxu0 %v10060_v26  ;;  %v8501_v21 = vld [vmem:[#allocation2 + $0x140] sm:$0xff]  }
 0x393   : > { %7349 = vmatprep.subr.bf16.mxu1 %v10068_v51  ;;  %7381 = vmatprep.subr.bf16.mxu0 %v10068_v51 }
 0x396   : > { %7350 = vmatpush3.bf16.msra.mxu1 %v10068_v51  ;;  %7382 = vmatpush3.bf16.msra.mxu0 %v10068_v51 }
 0x397   : > { %7351 = vmatprep.subr.bf16.mxu1 %v10076_v27  ;;  %7383 = vmatprep.subr.bf16.mxu0 %v10076_v27 }
 0x398   : > { %7304 = vmatmul.mubr.bf16.gmra.mxu1 %v8478_v48  ;;  %7336 = vmatmul.mubr.bf16.gmra.mxu0 %v8479_v8  ;;  %v8502_v48 = vld [vmem:[#allocation2 + $0x108] sm:$0xff]  }
 0x399   : > { %7307 = vmatprep.mubr.bf16.mxu1 %v8480_v55  ;;  %7339 = vmatprep.mubr.bf16.mxu0 %v8481_v34  ;;  %v8503_v8 = vld [vmem:[#allocation2 + $0x148] sm:$0xff]   ;;  %v8504_v55 = vld [vmem:[#allocation2 + $0x110] sm:$0xff]  }
 0x39a   : > { %7352 = vmatpush3.bf16.msra.mxu1 %v10076_v27  ;;  %7384 = vmatpush3.bf16.msra.mxu0 %v10076_v27  ;;  %v8505_v34 = vld [vmem:[#allocation2 + $0x150] sm:$0xff]  }
 0x39b   : > { %7353 = vmatprep.subr.bf16.mxu1 %v10084_v6  ;;  %7385 = vmatprep.subr.bf16.mxu0 %v10084_v6 }
 0x39e   : > { %7354 = vmatpush3.bf16.msra.mxu1 %v10084_v6  ;;  %7386 = vmatpush3.bf16.msra.mxu0 %v10084_v6 }
 0x39f   : > { %7355 = vmatprep.subr.bf16.mxu1 %v10092_v50  ;;  %7387 = vmatprep.subr.bf16.mxu0 %v10092_v50 }
 0x3a0   : > { %7308 = vmatmul.mubr.bf16.gmra.mxu1 %v8482_v53  ;;  %7340 = vmatmul.mubr.bf16.gmra.mxu0 %v8483_v56  ;;  %v8506_v53 = vld [vmem:[#allocation2 + $0x118] sm:$0xff]  }
 0x3a1   : > { %7359 = vmatprep.mubr.bf16.mxu1 %v8484_v22  ;;  %7391 = vmatprep.mubr.bf16.mxu0 %v8485_v1  ;;  %v8507_v56 = vld [vmem:[#allocation2 + $0x158] sm:$0xff]   ;;  %v8508_v22 = vld [vmem:[#allocation2 + $0x120] sm:$0xff]  }
 0x3a2   : > { %7356 = vmatpush3.bf16.msra.mxu1 %v10092_v50  ;;  %7388 = vmatpush3.bf16.msra.mxu0 %v10092_v50  ;;  %v8509_v1 = vld [vmem:[#allocation2 + $0x160] sm:$0xff]  }
 0x3a3   : > { %7357 = vmatprep.subr.bf16.mxu1 %v10100_v29  ;;  %7389 = vmatprep.subr.bf16.mxu0 %v10100_v29 }
 0x3a6   : > { %7358 = vmatpush3.bf16.msra.mxu1 %v10100_v29  ;;  %7390 = vmatpush3.bf16.msra.mxu0 %v10100_v29 }
 0x3a7   : > { %7407 = vmatprep.subr.bf16.mxu1 %v10044_v36  ;;  %7439 = vmatprep.subr.bf16.mxu0 %v10044_v36 }
 0x3a9   : > { %7360 = vmatmul.mubr.bf16.vlgmr.msra.gmra.mxu1 %v8486_v58  ;;  %7392 = vmatmul.mubr.bf16.vlgmr.msra.gmra.mxu0 %v8487_v61  ;;  %v8512_v58 = vld [vmem:[#allocation2 + $0x130] sm:$0xff]  }
 0x3aa   : > { %7363 = vmatprep.mubr.bf16.mxu1 %v8488_v4  ;;  %7395 = vmatprep.mubr.bf16.mxu0 %v8489_v7  ;;  %v8513_v61 = vld [vmem:[#allocation2 + $0x170] sm:$0xff]   ;;  %v8516_v4 = vld [vmem:[#allocation2 + $0x180] sm:$0xff]  }
 0x3ab   : > { %7408 = vmatpush3.bf16.msra.mxu1 %v10044_v36  ;;  %7440 = vmatpush3.bf16.msra.mxu0 %v10044_v36  ;;  %v8517_v7 = vld [vmem:[#allocation2 + $0x1c0] sm:$0xff]  }
 0x3ac   : > { %7409 = vmatprep.subr.bf16.mxu1 %v10050_v0  ;;  %7441 = vmatprep.subr.bf16.mxu0 %v10050_v0 }
 0x3af   : > { %7410 = vmatpush3.bf16.msra.mxu1 %v10050_v0  ;;  %7442 = vmatpush3.bf16.msra.mxu0 %v10050_v0 }
 0x3b0   : > { %7411 = vmatprep.subr.bf16.mxu1 %v10060_v26  ;;  %7443 = vmatprep.subr.bf16.mxu0 %v10060_v26 }
 0x3b1   : > { %7364 = vmatmul.mubr.bf16.gmra.mxu1 %v8490_v62  ;;  %7396 = vmatmul.mubr.bf16.gmra.mxu0 %v8491_v63  ;;  %v8520_v62 = vld [vmem:[#allocation2 + $0x190] sm:$0xff]  }
 0x3b2   : > { %7367 = vmatprep.mubr.bf16.mxu1 %v8492_v15  ;;  %7399 = vmatprep.mubr.bf16.mxu0 %v8493_v47  ;;  %v8521_v63 = vld [vmem:[#allocation2 + $0x1d0] sm:$0xff]   ;;  %v8522_v15 = vld [vmem:[#allocation2 + $0x198] sm:$0xff]  }
 0x3b3   : > { %7412 = vmatpush3.bf16.msra.mxu1 %v10060_v26  ;;  %7444 = vmatpush3.bf16.msra.mxu0 %v10060_v26  ;;  %v8523_v47 = vld [vmem:[#allocation2 + $0x1d8] sm:$0xff]  }
 0x3b4   : > { %7413 = vmatprep.subr.bf16.mxu1 %v10068_v51  ;;  %7445 = vmatprep.subr.bf16.mxu0 %v10068_v51 }
 0x3b7   : > { %7414 = vmatpush3.bf16.msra.mxu1 %v10068_v51  ;;  %7446 = vmatpush3.bf16.msra.mxu0 %v10068_v51 }
 0x3b8   : > { %7415 = vmatprep.subr.bf16.mxu1 %v10076_v27  ;;  %7447 = vmatprep.subr.bf16.mxu0 %v10076_v27 }
 0x3b9   : > { %7368 = vmatmul.mubr.bf16.gmra.mxu1 %v8494_v30  ;;  %7400 = vmatmul.mubr.bf16.gmra.mxu0 %v8495_v35  ;;  %v8524_v30 = vld [vmem:[#allocation2 + $0x1a0] sm:$0xff]   ;;  %v8526_v35 = vld [vmem:[#allocation2 + $0x1a8] sm:$0xff]  }
 0x3ba   : > { %7371 = vmatprep.mubr.bf16.mxu1 %v8496_v19  ;;  %7403 = vmatprep.mubr.bf16.mxu0 %v8497_v11  ;;  %v8527_v19 = vld [vmem:[#allocation2 + $0x1e8] sm:$0xff]   ;;  %v8528_v11 = vld [vmem:[#allocation2 + $0x1b0] sm:$0xff]  }
 0x3bb   : > { %7416 = vmatpush3.bf16.msra.mxu1 %v10076_v27  ;;  %7448 = vmatpush3.bf16.msra.mxu0 %v10076_v27 }
 0x3bc   : > { %7417 = vmatprep.subr.bf16.mxu1 %v10084_v6  ;;  %7449 = vmatprep.subr.bf16.mxu0 %v10084_v6 }
 0x3bf   : > { %7418 = vmatpush3.bf16.msra.mxu1 %v10084_v6  ;;  %7450 = vmatpush3.bf16.msra.mxu0 %v10084_v6 }
 0x3c0   : > { %7419 = vmatprep.subr.bf16.mxu1 %v10092_v50  ;;  %7451 = vmatprep.subr.bf16.mxu0 %v10092_v50 }
 0x3c1   : > { %7372 = vmatmul.mubr.bf16.gmra.mxu1 %v8498_v39  ;;  %7404 = vmatmul.mubr.bf16.gmra.mxu0 %v8499_v40  ;;  %v8530_v39 = vld [vmem:[#allocation2 + $0x1b8] sm:$0xff]  }
 0x3c2   : > { %7423 = vmatprep.mubr.bf16.mxu1 %v8500_v25  ;;  %7455 = vmatprep.mubr.bf16.mxu0 %v8501_v21  ;;  %v8531_v40 = vld [vmem:[#allocation2 + $0x1f8] sm:$0xff]   ;;  %v8636_v25 = vld [vmem:[#allocation2] sm:$0xff]   ;;  %v8532_v21 = vld [vmem:[#allocation11 + $0x78] sm:$0xff]  }
 0x3c3   : > { %7420 = vmatpush3.bf16.msra.mxu1 %v10092_v50  ;;  %7452 = vmatpush3.bf16.msra.mxu0 %v10092_v50 }
 0x3c4   : > { %7421 = vmatprep.subr.bf16.mxu1 %v10100_v29  ;;  %7453 = vmatprep.subr.bf16.mxu0 %v10100_v29 }
 0x3c7   : > { %7422 = vmatpush3.bf16.msra.mxu1 %v10100_v29  ;;  %7454 = vmatpush3.bf16.msra.mxu0 %v10100_v29 }
 0x3c8   : > { %7471 = vmatprep.subr.bf16.mxu1 %v10044_v36  ;;  %7503 = vmatprep.subr.bf16.mxu0 %v10044_v36 }
 0x3ca   : > { %7424 = vmatmul.mubr.bf16.vlgmr.msra.gmra.mxu1 %v8502_v48  ;;  %7456 = vmatmul.mubr.bf16.vlgmr.msra.gmra.mxu0 %v8503_v8  ;;  %v8533_v48 = vld [vmem:[#allocation11 + $0x70] sm:$0xff]   ;;  %v8534_v8 = vld [vmem:[#allocation11 + $0x68] sm:$0xff]  }
 0x3cb   : > { %7427 = vmatprep.mubr.bf16.mxu1 %v8504_v55  ;;  %7459 = vmatprep.mubr.bf16.mxu0 %v8505_v34  ;;  %v8535_v55 = vld [vmem:[#allocation11 + $0x60] sm:$0xff]   ;;  %v8536_v34 = vld [vmem:[#allocation11 + $0x58] sm:$0xff]  }
 0x3cc   : > { %7472 = vmatpush3.bf16.msra.mxu1 %v10044_v36  ;;  %7504 = vmatpush3.bf16.msra.mxu0 %v10044_v36  ;;  %v8510_v36 = vld [vmem:[#allocation2 + $0x128] sm:$0xff]  }
 0x3cd   : > { %7473 = vmatprep.subr.bf16.mxu1 %v10050_v0  ;;  %7505 = vmatprep.subr.bf16.mxu0 %v10050_v0 }
 0x3d0   : > { %7474 = vmatpush3.bf16.msra.mxu1 %v10050_v0  ;;  %7506 = vmatpush3.bf16.msra.mxu0 %v10050_v0  ;;  %v8511_v0 = vld [vmem:[#allocation2 + $0x168] sm:$0xff]  }
 0x3d1   : > { %7475 = vmatprep.subr.bf16.mxu1 %v10060_v26  ;;  %7507 = vmatprep.subr.bf16.mxu0 %v10060_v26 }
 0x3d2   : > { %7428 = vmatmul.mubr.bf16.gmra.mxu1 %v8506_v53  ;;  %7460 = vmatmul.mubr.bf16.gmra.mxu0 %v8507_v56  ;;  %v8537_v53 = vld [vmem:[#allocation11 + $0x50] sm:$0xff]   ;;  %v8538_v56 = vld [vmem:[#allocation11 + $0x48] sm:$0xff]  }
 0x3d3   : > { %7431 = vmatprep.mubr.bf16.mxu1 %v8508_v22  ;;  %7463 = vmatprep.mubr.bf16.mxu0 %v8509_v1  ;;  %v8539_v22 = vld [vmem:[#allocation11 + $0x40] sm:$0xff]  }
 0x3d4   : > { %7476 = vmatpush3.bf16.msra.mxu1 %v10060_v26  ;;  %7508 = vmatpush3.bf16.msra.mxu0 %v10060_v26  ;;  %v8514_v26 = vld [vmem:[#allocation2 + $0x138] sm:$0xff]  }
 0x3d5   : > { %7477 = vmatprep.subr.bf16.mxu1 %v10068_v51  ;;  %7509 = vmatprep.subr.bf16.mxu0 %v10068_v51 }
 0x3d8   : > { %7478 = vmatpush3.bf16.msra.mxu1 %v10068_v51  ;;  %7510 = vmatpush3.bf16.msra.mxu0 %v10068_v51  ;;  %v8515_v51 = vld [vmem:[#allocation2 + $0x178] sm:$0xff]  }
 0x3d9   : > { %7479 = vmatprep.subr.bf16.mxu1 %v10076_v27  ;;  %7511 = vmatprep.subr.bf16.mxu0 %v10076_v27 }
 0x3da   : > { %7432 = vmatmul.mubr.bf16.gmra.mxu1 %v8510_v36  ;;  %7464 = vmatmul.mubr.bf16.gmra.mxu0 %v8511_v0 }
 0x3db   : > { %7435 = vmatprep.mubr.bf16.mxu1 %v8512_v58  ;;  %7467 = vmatprep.mubr.bf16.mxu0 %v8513_v61 }
 0x3dc   : > { %7480 = vmatpush3.bf16.msra.mxu1 %v10076_v27  ;;  %7512 = vmatpush3.bf16.msra.mxu0 %v10076_v27  ;;  %v8518_v27 = vld [vmem:[#allocation2 + $0x188] sm:$0xff]  }
 0x3dd   : > { %7481 = vmatprep.subr.bf16.mxu1 %v10084_v6  ;;  %7513 = vmatprep.subr.bf16.mxu0 %v10084_v6 }
 0x3e0   : > { %7482 = vmatpush3.bf16.msra.mxu1 %v10084_v6  ;;  %7514 = vmatpush3.bf16.msra.mxu0 %v10084_v6  ;;  %v8519_v6 = vld [vmem:[#allocation2 + $0x1c8] sm:$0xff]  }
 0x3e1   : > { %7483 = vmatprep.subr.bf16.mxu1 %v10092_v50  ;;  %7515 = vmatprep.subr.bf16.mxu0 %v10092_v50 }
 0x3e2   : > { %7436 = vmatmul.mubr.bf16.gmra.mxu1 %v8514_v26  ;;  %7468 = vmatmul.mubr.bf16.gmra.mxu0 %v8515_v51 }
 0x3e3   : > { %7487 = vmatprep.mubr.bf16.mxu1 %v8516_v4  ;;  %7519 = vmatprep.mubr.bf16.mxu0 %v8517_v7 }
 0x3e4   : > { %7484 = vmatpush3.bf16.msra.mxu1 %v10092_v50  ;;  %7516 = vmatpush3.bf16.msra.mxu0 %v10092_v50  ;;  %v8525_v50 = vld [vmem:[#allocation2 + $0x1e0] sm:$0xff]  }
 0x3e5   : > { %7485 = vmatprep.subr.bf16.mxu1 %v10100_v29  ;;  %7517 = vmatprep.subr.bf16.mxu0 %v10100_v29 }
 0x3e8   : > { %7486 = vmatpush3.bf16.msra.mxu1 %v10100_v29  ;;  %7518 = vmatpush3.bf16.msra.mxu0 %v10100_v29  ;;  %v8529_v29 = vld [vmem:[#allocation2 + $0x1f0] sm:$0xff]  }
 0x3e9   : > { %7535 = vmatprep.subr.bf16.mxu1 %v8532_v21 }
 0x3eb   : > { %7488 = vmatmul.mubr.bf16.vlgmr.msra.gmra.mxu1 %v8518_v27  ;;  %7520 = vmatmul.mubr.bf16.vlgmr.msra.gmra.mxu0 %v8519_v6 }
 0x3ec   : > { %7491 = vmatprep.mubr.bf16.mxu1 %v8520_v62  ;;  %7523 = vmatprep.mubr.bf16.mxu0 %v8521_v63 }
 0x3ed   : > { %7536 = vmatpush3.bf16.msra.mxu1 %v8532_v21 }
 0x3ee   : > { %7537 = vmatprep.subr.bf16.mxu1 %v8533_v48 }
 0x3f1   : > { %7538 = vmatpush3.bf16.msra.mxu1 %v8533_v48 }
 0x3f2   : > { %7539 = vmatprep.subr.bf16.mxu1 %v8534_v8 }
 0x3f3   : > { %7492 = vmatmul.mubr.bf16.gmra.mxu1 %v8522_v15  ;;  %7524 = vmatmul.mubr.bf16.gmra.mxu0 %v8523_v47 }
 0x3f4   : > { %7495 = vmatprep.mubr.bf16.mxu1 %v8524_v30  ;;  %7527 = vmatprep.mubr.bf16.mxu0 %v8525_v50 }
 0x3f5   : > { %7540 = vmatpush3.bf16.msra.mxu1 %v8534_v8 }
 0x3f6   : > { %7541 = vmatprep.subr.bf16.mxu1 %v8535_v55 }
 0x3f9   : > { %7542 = vmatpush3.bf16.msra.mxu1 %v8535_v55 }
 0x3fa   : > { %7543 = vmatprep.subr.bf16.mxu1 %v8536_v34 }
 0x3fb   : > { %7496 = vmatmul.mubr.bf16.gmra.mxu1 %v8526_v35  ;;  %7528 = vmatmul.mubr.bf16.gmra.mxu0 %v8527_v19 }
 0x3fc   : > { %7499 = vmatprep.mubr.bf16.mxu1 %v8528_v11  ;;  %7531 = vmatprep.mubr.bf16.mxu0 %v8529_v29 }
 0x3fd   : > { %7544 = vmatpush3.bf16.msra.mxu1 %v8536_v34 }
 0x3fe   : > { %7545 = vmatprep.subr.bf16.mxu1 %v8537_v53 }
 0x401   : > { %7546 = vmatpush3.bf16.msra.mxu1 %v8537_v53 }
 0x402   : > { %7547 = vmatprep.subr.bf16.mxu1 %v8538_v56 }
 0x403   : > { %7500 = vmatmul.mubr.bf16.gmra.mxu1 %v8530_v39  ;;  %7532 = vmatmul.mubr.bf16.gmra.mxu0 %v8531_v40 }
 0x404   : > { %7583 = vmatprep.mubr.bf16.mxu0 %v8636_v25 }
 0x405   : > { %7548 = vmatpush3.bf16.msra.mxu1 %v8538_v56 }
 0x406   : > { %7549 = vmatprep.subr.bf16.mxu1 %v8539_v22 }
 0x409   : > { %7550 = vmatpush3.bf16.msra.mxu1 %v8539_v22 }
 0x448   : > { %v7297_v1 = vpop.f32.mrf.mxu1  ;;  %v7329_v36 = vpop.f32.mrf.mxu0 }
 0x449   : > { %v2935_v0 = vmax.f32 %v7297_v1, %v7329_v36 }
 0x44a   : > { %v10204_v58 = vpop.f32.mrf.mxu1  ;;  %v10206_v61 = vpop.f32.mrf.mxu0 }
 0x44c   : > { %v10210_v51 = vpop.f32.mrf.mxu1  ;;  %v10212_v4 = vpop.f32.mrf.mxu0 }
 0x44e   : > { %v10216_v27 = vpop.f32.mrf.mxu1  ;;  %v10218_v6 = vpop.f32.mrf.mxu0 }
 0x450   : > { %v7301_v62 = vpop.f32.mrf.mxu1  ;;  %v7333_v63 = vpop.f32.mrf.mxu0 }
 0x451   : > { %v2939_v15 = vmax.f32 %v7301_v62, %v7333_v63 }
 0x452   : > { %v10220_v47 = vpop.f32.mrf.mxu1  ;;  %v10222_v30 = vpop.f32.mrf.mxu0 }
 0x454   : > { %v10226_v35 = vpop.f32.mrf.mxu1  ;;  %v10228_v19 = vpop.f32.mrf.mxu0 }
 0x456   : > { %v10232_v29 = vpop.f32.mrf.mxu1  ;;  %v10234_v39 = vpop.f32.mrf.mxu0 }
 0x458   : > { %v7305_v40 = vpop.f32.mrf.mxu1  ;;  %v7337_v25 = vpop.f32.mrf.mxu0 }
 0x459   : > { %v2943_v21 = vmax.f32 %v7305_v40, %v7337_v25 }
 0x45a   : > { %v10236_v48 = vpop.f32.mrf.mxu1  ;;  %v10238_v8 = vpop.f32.mrf.mxu0 }
 0x45c   : > { %v10242_v34 = vpop.f32.mrf.mxu1  ;;  %v10244_v53 = vpop.f32.mrf.mxu0 }
 0x45e   : > { %v10248_v22 = vpop.f32.mrf.mxu1  ;;  %v10250_v1 = vpop.f32.mrf.mxu0 }
 0x460   : > { %v7309_v36 = vpop.f32.mrf.mxu1  ;;  %v7341_v62 = vpop.f32.mrf.mxu0 }
 0x461   : > { %v2947_v63 = vmax.f32 %v7309_v36, %v7341_v62 }
 0x462   : > { %v10252_v40 = vpop.f32.mrf.mxu1  ;;  %v10254_v25 = vpop.f32.mrf.mxu0 }
 0x464   : > { %v10258_v11 = vpop.f32.mrf.mxu1  ;;  %v10260_v50 = vpop.f32.mrf.mxu0 }
 0x466   : > { %v10264_v7 = vpop.f32.mrf.mxu1  ;;  %v10266_v26 = vpop.f32.mrf.mxu0 }
 0x469   : > { %v7361_v17 = vpop.f32.mrf.mxu1  ;;  %v10268_v36 = vpop.f32.mrf.mxu0 }
 0x46a   : > { %v10270_v62 = vmax.f32 %v2935_v0, %v7361_v17 }
 0x46b   : > { %v3047_v20 = vpop.f32.mrf.mxu1  ;;  %v10272_v14 = vpop.f32.mrf.mxu0 }
 0x46d   : > { %v7362_v5 = vpop.f32.mrf.mxu1  ;;  %v10276_v16 = vpop.f32.mrf.mxu0 }
 0x46f   : > { %v10278_v49 = vpop.f32.mrf.mxu1  ;;  %v10280_v56 = vpop.f32.mrf.mxu0 }
 0x471   : > { %v7365_v59 = vpop.f32.mrf.mxu1  ;;  %v10282_v28 = vpop.f32.mrf.mxu0 }
 0x472   : > { %11654 = vst [vmem:[#allocation60_spill] sm:$0xff] %v10282_v28  ;;  %v10284_v44 = vmax.f32 %v2939_v15, %v7365_v59 }
 0x473   : > { %v10286_v17 = vpop.f32.mrf.mxu1  ;;  %v10288_v0 = vpop.f32.mrf.mxu0 }
 0x474   : > { %11655 = vst [vmem:[#allocation61_spill] sm:$0xff] %v10284_v44 }
 0x475   : > { %v10292_v55 = vpop.f32.mrf.mxu1  ;;  %v10294_v46 = vpop.f32.mrf.mxu0 }
 0x477   : > { %v10296_v41 = vpop.f32.mrf.mxu1  ;;  %v10298_v33 = vpop.f32.mrf.mxu0 }
 0x479   : > { %v7369_v32 = vpop.f32.mrf.mxu1  ;;  %v10300_v57 = vpop.f32.mrf.mxu0 }
 0x47a   : > { %11656 = vst [vmem:[#allocation62_spill] sm:$0xff] %v10300_v57  ;;  %v10302_v59 = vmax.f32 %v2943_v21, %v7369_v32 }
 0x47b   : > { %v10304_v15 = vpop.f32.mrf.mxu1  ;;  %v10306_v9 = vpop.f32.mrf.mxu0 }
 0x47c   : > { %11657 = vst [vmem:[#allocation63_spill] sm:$0xff] %v10302_v59 }
 0x47d   : > { %v10310_v54 = vpop.f32.mrf.mxu1  ;;  %v10312_v2 = vpop.f32.mrf.mxu0 }
 0x47f   : > { %v10314_v3 = vpop.f32.mrf.mxu1  ;;  %v10316_v13 = vpop.f32.mrf.mxu0 }
 0x480   : > { %11658 = vst [vmem:[#allocation64_spill] sm:$0xff] %v10316_v13 }
 0x481   : > { %v7373_v52 = vpop.f32.mrf.mxu1  ;;  %v10318_v10 = vpop.f32.mrf.mxu0 }
 0x482   : > { %11659 = vst [vmem:[#allocation65_spill] sm:$0xff] %v10318_v10  ;;  %v10320_v32 = vmax.f32 %v2947_v63, %v7373_v52 }
 0x483   : > { %v10322_v21 = vpop.f32.mrf.mxu1  ;;  %v10324_v60 = vpop.f32.mrf.mxu0 }
 0x484   : > { %11660 = vst [vmem:[#allocation66_spill] sm:$0xff] %v10320_v32  ;;  %11661 = vst [vmem:[#allocation67_spill] sm:$0xff] %v10324_v60 }
 0x485   : > { %v10328_v38 = vpop.f32.mrf.mxu1  ;;  %v10330_v45 = vpop.f32.mrf.mxu0 }
 0x486   : > { %11662 = vst [vmem:[#allocation68_spill] sm:$0xff] %v10330_v45 }
 0x487   : > { %v10332_v12 = vpop.f32.mrf.mxu1  ;;  %v10334_v23 = vpop.f32.mrf.mxu0 }
 0x488   : > { %11663 = vst [vmem:[#allocation69_spill] sm:$0xff] %v10332_v12  ;;  %11664 = vst [vmem:[#allocation70_spill] sm:$0xff] %v10334_v23 }
 0x48a   : > { %v7425_v31 = vpop.f32.mrf.mxu1  ;;  %v7457_v43 = vpop.f32.mrf.mxu0 }
 0x48c   : > { %v3401_v18 = vpop.f32.mrf.mxu1  ;;  %v10336_v52 = vpop.f32.mrf.mxu0 }
 0x48e   : > { %v7426_v63 = vpop.f32.mrf.mxu1  ;;  %v10338_v57 = vpop.f32.mrf.mxu0 }
 0x490   : > { %v3404_v59 = vpop.f32.mrf.mxu1  ;;  %v10340_v42 = vpop.f32.mrf.mxu0 }
 0x491   : > { %11665 = vst [vmem:[#allocation71_spill] sm:$0xff] %v10340_v42 }
 0x492   : > { %v7429_v24 = vpop.f32.mrf.mxu1  ;;  %v10342_v10 = vpop.f32.mrf.mxu0 }
 0x493   : > { %11666 = vst [vmem:[#allocation72_spill] sm:$0xff] %v10342_v10 }
 0x494   : > { %v10344_v32 = vpop.f32.mrf.mxu1  ;;  %v10346_v45 = vpop.f32.mrf.mxu0 }
 0x495   : > { %11667 = vst [vmem:[#allocation73_spill] sm:$0xff] %v10344_v32  ;;  %11668 = vst [vmem:[#allocation74_spill] sm:$0xff] %v10346_v45 }
 0x496   : > { %v10348_v37 = vpop.f32.mrf.mxu1  ;;  %v10350_v23 = vpop.f32.mrf.mxu0 }
 0x497   : > { %11669 = vst [vmem:[#allocation75_spill] sm:$0xff] %v10348_v37  ;;  %11670 = vst [vmem:[#allocation76_spill] sm:$0xff] %v10350_v23  ;;  %v11680_v23 = vmax.f32 %v10204_v58, %v10206_v61 }
 0x498   : > { %v10352_v60 = vpop.f32.mrf.mxu1  ;;  %v10354_v13 = vpop.f32.mrf.mxu0 }
 0x499   : > { %11671 = vst [vmem:[#allocation77_spill] sm:$0xff] %v10352_v60  ;;  %11672 = vst [vmem:[#allocation78_spill] sm:$0xff] %v10354_v13  ;;  %v3110_v13 = vmax.f32 %v11680_v23, %v3047_v20  ;;  %v11683_v23 = vmax.f32 %v10270_v62, %v10268_v36 }
 0x49a   : > { %v10356_v12 = vpop.f32.mrf.mxu1  ;;  %v10358_v28 = vpop.f32.mrf.mxu0 }
 0x49b   : > { %11673 = vst [vmem:[#allocation79_spill] sm:$0xff] %v10356_v12  ;;  %11674 = vst [vmem:[#allocation80_spill] sm:$0xff] %v10358_v28  ;;  %v2934_v28 = vmax.f32 %v10216_v27, %v10218_v6  ;;  %v3466_v20 = vmax.f32 %v11683_v23, %v7425_v31  ;;  %v11685_v31 = vmax.f32 %v10226_v35, %v10228_v19 }
 0x49c   : > { %v10360_v42 = vpop.f32.mrf.mxu1  ;;  %v10362_v44 = vpop.f32.mrf.mxu0 }
 0x49d   : > { %11675 = vst [vmem:[#allocation81_spill] sm:$0xff] %v10362_v44  ;;  %v11682_v44 = vmax.f32 %v10210_v51, %v10212_v4  ;;  %v3111_v58 = vmax.f32 %v2934_v28, %v10278_v49  ;;  %v2938_v51 = vmax.f32 %v10232_v29, %v10234_v39  ;;  %v3117_v28 = vmax.f32 %v11685_v31, %v10292_v55  ;;  %v10465_v31 = vld [vmem:[%s11487_s7] ss:$0 sm:$0xff] }
 0x49e   : > { %v10364_v10 = vpop.f32.mrf.mxu1  ;;  %v10366_v32 = vpop.f32.mrf.mxu0 }
 0x49f   : > { %11676 = vst [vmem:[#allocation82_spill] sm:$0xff] %v10364_v10  ;;  %11677 = vst [vmem:[#allocation83_spill] sm:$0xff] %v10366_v32  ;;  %v3113_v10 = vmax.f32 %v11682_v44, %v7362_v5  ;;  %v3288_v49 = vmax.f32 %v3111_v58, %v10280_v56  ;;  %v3115_v6 = vmax.f32 %v2938_v51, %v10296_v41  ;;  %v11698_v51 = vld [vmem:[#allocation44_spill] sm:$0xff] }
 0x4a0   : > { %v10368_v45 = vpop.f32.mrf.mxu1  ;;  %v10370_v37 = vpop.f32.mrf.mxu0  ;;  %v2946_v41 = vmax.f32 %v10264_v7, %v10266_v26 }
 0x4a1   : > { %11678 = vst [vmem:[#allocation84_spill] sm:$0xff] %v10368_v45  ;;  %11679 = vst [vmem:[#allocation85_spill] sm:$0xff] %v10370_v37  ;;  %v3287_v37 = vmax.f32 %v3110_v13, %v10272_v14  ;;  %v3290_v44 = vmax.f32 %v3113_v10, %v10276_v16  ;;  %v11684_v13 = vmax.f32 %v10220_v47, %v10222_v30 }
 0x4a2   : > { %v10375_v60 = vpop.f32.mrf.mxu1  ;;  %v10377_v12 = vpop.f32.mrf.mxu0  ;;  %v3643_v10 = vmax.f32 %v3466_v20, %v7457_v43  ;;  %v11686_v16 = vmax.f32 %v10236_v48, %v10238_v8  ;;  %v11687_v30 = vmax.f32 %v10242_v34, %v10244_v53  ;;  %v3465_v39 = vmax.f32 %v3288_v49, %v3404_v59  ;;  %v11696_v20 = vld [vmem:[#allocation67_spill] sm:$0xff] }
 0x4a3   : > { %11681 = vst [vmem:[#allocation86_spill] sm:$0xff] %v10377_v12  ;;  %v3464_v5 = vmax.f32 %v3287_v37, %v3401_v18  ;;  %v3114_v14 = vmax.f32 %v11684_v13, %v10286_v17  ;;  %v3467_v37 = vmax.f32 %v3290_v44, %v7426_v63  ;;  %v2942_v18 = vmax.f32 %v10248_v22, %v10250_v1  ;;  %v11699_v13 = vld [vmem:[#allocation75_spill] sm:$0xff] }
 0x4a4   : > { %v10384_v32 = vpop.f32.mrf.mxu1  ;;  %v10386_v45 = vpop.f32.mrf.mxu0  ;;  %v3118_v47 = vmax.f32 %v11686_v16, %v10304_v15  ;;  %v3121_v35 = vmax.f32 %v11687_v30, %v10310_v54  ;;  %v3294_v22 = vmax.f32 %v3117_v28, %v10294_v46  ;;  %v11688_v54 = vmax.f32 %v10252_v40, %v10254_v25  ;;  %v11690_v40 = vld [vmem:[#allocation61_spill] sm:$0xff]  ;;  %v11691_v25 = vld [vmem:[#allocation60_spill] sm:$0xff] }
 0x4a5   : > { %v3641_v43 = vmax.f32 %v3464_v5, %v10336_v52  ;;  %v3291_v56 = vmax.f32 %v3114_v14, %v10288_v0  ;;  %v10430_v48 = vmax.f32 %v2942_v18, %v10314_v3  ;;  %v3292_v26 = vmax.f32 %v3115_v6, %v10298_v33  ;;  %v11694_v52 = vld [vmem:[#allocation71_spill] sm:$0xff]  ;;  %v11700_v28 = vld [vmem:[#allocation45_spill] sm:$0xff]  ;;  %v11702_v16 = vld [vmem:[#allocation72_spill] sm:$0xff] }
 0x4a6   : > { %v10393_v61 = vpop.f32.mrf.mxu1  ;;  %v10395_v12 = vpop.f32.mrf.mxu0  ;;  %v10436_v8 = vmax.f32 %v11688_v54, %v10322_v21  ;;  %v3644_v7 = vmax.f32 %v3467_v37, %v10338_v57  ;;  %v3295_v62 = vmax.f32 %v3118_v47, %v10306_v9  ;;  %v3298_v46 = vmax.f32 %v3121_v35, %v10312_v2  ;;  %v11693_v21 = vld [vmem:[#allocation69_spill] sm:$0xff]  ;;  %v11695_v2 = vld [vmem:[#allocation64_spill] sm:$0xff] }
 0x4a7   : > { %v11689_v3 = vmax.f32 %v10258_v11, %v10260_v50  ;;  %v11692_v0 = vmax.f32 %v11690_v40, %v11691_v25  ;;  %v10452_v57 = vmax.f32 %v2946_v41, %v11693_v21  ;;  %v3642_v63 = vmax.f32 %v3465_v39, %v11694_v52  ;;  %v11697_v50 = vld [vmem:[#allocation73_spill] sm:$0xff]  ;;  %v11701_v37 = vld [vmem:[#allocation68_spill] sm:$0xff]  ;;  %v11706_v41 = vld [vmem:[#allocation62_spill] sm:$0xff] }
 0x4a8   : > { %v10400_v4 = vpop.f32.mrf.mxu1  ;;  %v10402_v27 = vpop.f32.mrf.mxu0  ;;  %v3296_v23 = vmax.f32 %v10430_v48, %v11695_v2  ;;  %v3468_v11 = vmax.f32 %v3291_v56, %v11697_v50  ;;  %v3471_v14 = vmax.f32 %v3294_v22, %v11699_v13  ;;  %v11703_v30 = vld [vmem:[#allocation77_spill] sm:$0xff]  ;;  %v11708_v22 = vld [vmem:[#allocation70_spill] sm:$0xff]  ;;  %v3472_v54 = vmax.f32 %v3295_v62, %v10360_v42  ;;  %v11717_v13 = vld [vmem:[#allocation28_spill] sm:$0xff] }
 0x4a9   : > { %v10446_v17 = vmax.f32 %v11689_v3, %v10328_v38  ;;  %v3470_v59 = vmax.f32 %v11692_v0, %v7429_v24  ;;  %v3299_v38 = vmax.f32 %v10436_v8, %v11696_v20  ;;  %v3469_v35 = vmax.f32 %v3292_v26, %v11703_v30  ;;  %v11714_v62 = vld [vmem:[#allocation78_spill] sm:$0xff] }
 0x4aa   : > { %v3300_v48 = vmax.f32 %v10452_v57, %v11708_v22 }
 0x4ab   : > { %v7489_v19 = vpop.f32.mrf.mxu1  ;;  %v7521_v29 = vpop.f32.mrf.mxu0  ;;  %v3302_v18 = vmax.f32 %v10446_v17, %v11701_v37  ;;  %v3647_v47 = vmax.f32 %v3470_v59, %v11702_v16  ;;  %v11711_v59 = vld [vmem:[#allocation76_spill] sm:$0xff] }
 0x4ac   : > { %v3820_v55 = vmax.f32 %v3643_v10, %v7489_v19  ;;  %v11704_v19 = vld [vmem:[#allocation79_spill] sm:$0xff] }
 0x4ad   : > { %v3755_v34 = vpop.f32.mrf.mxu1  ;;  %v3932_v53 = vpop.f32.mrf.mxu0 }
 0x4ae   : > { %v3997_v1 = vmax.f32 %v3820_v55, %v7521_v29  ;;  %v3818_v36 = vmax.f32 %v3641_v43, %v3755_v34  ;;  %v11705_v29 = vld [vmem:[#allocation63_spill] sm:$0xff]  ;;  %v11709_v34 = vld [vmem:[#allocation46_spill] sm:$0xff] }
 0x4af   : > { %v7490_v15 = vpop.f32.mrf.mxu1  ;;  %v7522_v33 = vpop.f32.mrf.mxu0  ;;  %v11707_v43 = vmax.f32 %v11705_v29, %v11706_v41  ;;  %v11721_v41 = vld [vmem:[#allocation83_spill] sm:$0xff] }
 0x4b0   : > { %v3995_v9 = vmax.f32 %v3818_v36, %v3932_v53  ;;  %v3821_v58 = vmax.f32 %v3644_v7, %v7490_v15  ;;  %v4013_v44 = vsub.f32 %v3997_v1, %v11698_v51  ;;  %v11710_v1 = vld [vmem:[#allocation74_spill] sm:$0xff]  ;;  %v3648_v15 = vmax.f32 %v3471_v14, %v11711_v59 }
 0x4b1   : > { %v3758_v24 = vpop.f32.mrf.mxu1  ;;  %v3935_v5 = vpop.f32.mrf.mxu0  ;;  %v3474_v39 = vmax.f32 %v11707_v43, %v11704_v19  ;;  %v3645_v36 = vmax.f32 %v3468_v11, %v11710_v1  ;;  %v11724_v1 = vld [vmem:[#allocation66_spill] sm:$0xff] }
 0x4b2   : > { %v4011_v49 = vsub.f32 %v3995_v9, %v11700_v28  ;;  %v3998_v6 = vmax.f32 %v3821_v58, %v7522_v33  ;;  %v3819_v10 = vmax.f32 %v3642_v63, %v3758_v24  ;;  %v4036_v3 = vmul.f32 %v10465_v31, %v4013_v44  ;;  %v11712_v33 = vld [vmem:[#allocation82_spill] sm:$0xff]  ;;  %v11713_v63 = vld [vmem:[#allocation47_spill] sm:$0xff]  ;;  %v11715_v58 = vld [vmem:[#allocation80_spill] sm:$0xff] }
 0x4b3   : > { %v7493_v55 = vpop.f32.mrf.mxu1  ;;  %v7525_v56 = vpop.f32.mrf.mxu0  ;;  %v3475_v21 = vmax.f32 %v3298_v46, %v11712_v33  ;;  %v3646_v9 = vmax.f32 %v3469_v35, %v11714_v62  ;;  %v3651_v2 = vmax.f32 %v3474_v39, %v11715_v58  ;;  %v11716_v24 = vld [vmem:[#allocation81_spill] sm:$0xff]  ;;  %v11718_v46 = vld [vmem:[#allocation31_spill] sm:$0xff]  ;;  %v10499_v39 = vld [vmem:[%s11488_s8] ss:$0 sm:$0xff] }
 0x4b4   : > { %v4014_v53 = vsub.f32 %v3998_v6, %v11709_v34  ;;  %v3996_v7 = vmax.f32 %v3819_v10, %v3935_v5  ;;  %v4034_v26 = vmul.f32 %v10465_v31, %v4011_v49  ;;  %v3824_v40 = vmax.f32 %v3647_v47, %v7493_v55  ;;  %v11719_v10 = vld [vmem:[#allocation29_spill] sm:$0xff]  ;;  %v11720_v47 = vld [vmem:[#allocation48_spill] sm:$0xff]  ;;  %v11722_v55 = vld [vmem:[#allocation30_spill] sm:$0xff] }
 0x4b5   : > { %v3771_v25 = vpop.f32.mrf.mxu1  ;;  %v3948_v0 = vpop.f32.mrf.mxu0  ;;  %v3649_v5 = vmax.f32 %v3472_v54, %v11716_v24  ;;  %v4052_v6 = vadd.f32 %v4036_v3, %v11718_v46  ;;  %v3652_v43 = vmax.f32 %v3475_v21, %v11721_v41  ;;  %v11729_v21 = vld [vmem:[#allocation50_spill] sm:$0xff] }
 0x4b6   : > { %v4037_v52 = vmul.f32 %v10465_v31, %v4014_v53  ;;  %v4012_v42 = vsub.f32 %v3996_v7, %v11713_v63  ;;  %v4001_v50 = vmax.f32 %v3824_v40, %v7525_v56  ;;  %v3822_v11 = vmax.f32 %v3645_v36, %v3771_v25  ;;  %v11723_v53 = vld [vmem:[#allocation84_spill] sm:$0xff]  ;;  %v11725_v36 = vld [vmem:[#allocation65_spill] sm:$0xff] }
 0x4b7   : > { %v7494_v51 = vpop.f32.mrf.mxu1  ;;  %v7526_v44 = vpop.f32.mrf.mxu0  ;;  %v4050_v16 = vadd.f32 %v4034_v26, %v11719_v10  ;;  %v3473_v7 = vmax.f32 %v3296_v23, %v11723_v53  ;;  %v11726_v3 = vmax.f32 %v11724_v1, %v11725_v36  ;;  %v11728_v25 = vld [vmem:[#allocation49_spill] sm:$0xff]  ;;  %v10514_v23 = vadd.f32 %v10499_v39, %v4052_v6  ;;  %v11740_v53 = vld [vmem:[#allocation34_spill] sm:$0xff] }
 0x4b8   : > { %v4053_v28 = vadd.f32 %v4037_v52, %v11717_v13  ;;  %v4035_v14 = vmul.f32 %v10465_v31, %v4012_v42  ;;  %v3825_v49 = vmax.f32 %v3648_v15, %v7494_v51  ;;  %v4017_v30 = vsub.f32 %v4001_v50, %v11720_v47  ;;  %v11733_v51 = vld [vmem:[#allocation51_spill] sm:$0xff]  ;;  %v11741_v1 = vld [vmem:[#allocation53_spill] sm:$0xff] }
 0x4b9   : > { %v3999_v35 = vmax.f32 %v3822_v11, %v3948_v0  ;;  %v3774_v19 = vpop.f32.mrf.mxu1  ;;  %v3951_v29 = vpop.f32.mrf.mxu0  ;;  %v3478_v26 = vmax.f32 %v11726_v3, %v10375_v60  ;;  %11730 = vst [vmem:[#allocation60_spill] sm:$0xff] %v10514_v23  ;;  %v10518_v58 = vadd.f32 %v10499_v39, %v4050_v16  ;;  %v11735_v16 = vld [vmem:[#allocation35_spill] sm:$0xff] }
 0x4ba   : > { %v4051_v56 = vadd.f32 %v4035_v14, %v11722_v55  ;;  %v4002_v54 = vmax.f32 %v3825_v49, %v7526_v44  ;;  %v3823_v34 = vmax.f32 %v3646_v9, %v3774_v19  ;;  %v10508_v40 = vadd.f32 %v10499_v39, %v4053_v28  ;;  %v11738_v55 = vld [vmem:[#allocation33_spill] sm:$0xff] }
 0x4bb   : > { %v4015_v0 = vsub.f32 %v3999_v35, %v11728_v25  ;;  %v7497_v59 = vpop.f32.mrf.mxu1  ;;  %v7529_v15 = vpop.f32.mrf.mxu0  ;;  %v4040_v33 = vmul.f32 %v10465_v31, %v4017_v30  ;;  %11731 = vst [vmem:[#allocation69_spill] sm:$0xff] %v10518_v58  ;;  %v3476_v14 = vmax.f32 %v3299_v38, %v10384_v32  ;;  %v11736_v30 = vld [vmem:[#allocation32_spill] sm:$0xff] }
 0x4bc   : > { %11727 = vst [vmem:[#allocation61_spill] sm:$0xff] %v10508_v40  ;;  %v4018_v52 = vsub.f32 %v4002_v54, %v11729_v21  ;;  %v4000_v63 = vmax.f32 %v3823_v34, %v3951_v29  ;;  %v3828_v42 = vmax.f32 %v3651_v2, %v7497_v59  ;;  %v10521_v50 = vadd.f32 %v10499_v39, %v4051_v56  ;;  %v11734_v2 = vld [vmem:[#allocation85_spill] sm:$0xff]  ;;  %v11737_v29 = vld [vmem:[#allocation86_spill] sm:$0xff]  ;;  %v11739_v32 = vld [vmem:[#allocation52_spill] sm:$0xff] }
 0x4bd   : > { %v4038_v62 = vmul.f32 %v10465_v31, %v4015_v0  ;;  %v3787_v9 = vpop.f32.mrf.mxu1  ;;  %v3964_v60 = vpop.f32.mrf.mxu0  ;;  %v3650_v28 = vmax.f32 %v3473_v7, %v11734_v2  ;;  %v4090_v49 = vpack.c.bf16 %v10508_v40, %v10514_v23  ;;  %v4056_v47 = vadd.f32 %v4040_v33, %v11735_v16  ;;  %v11744_v33 = vld [vmem:[#allocation54_spill] sm:$0xff] }
 0x4be   : > { %11732 = vst [vmem:[#allocation71_spill] sm:$0xff] %v10521_v50  ;;  %v4041_v11 = vmul.f32 %v10465_v31, %v4018_v52  ;;  %v4016_v44 = vsub.f32 %v4000_v63, %v11733_v51  ;;  %v4005_v24 = vmax.f32 %v3828_v42, %v7529_v15  ;;  %v3826_v13 = vmax.f32 %v3649_v5, %v3787_v9  ;;  %v11747_v63 = vld [vmem:[#allocation55_spill] sm:$0xff] }
 0x4bf   : > { %v7498_v46 = vpop.f32.mrf.mxu1  ;;  %v7530_v6 = vpop.f32.mrf.mxu0  ;;  %v4089_v10 = vpack.c.bf16 %v10521_v50, %v10518_v58  ;;  %v3655_v41 = vmax.f32 %v3478_v26, %v11737_v29  ;;  %v4054_v8 = vadd.f32 %v4038_v62, %v11738_v55  ;;  %v3479_v34 = vmax.f32 %v3302_v18, %v10393_v61  ;;  %v11753_v29 = vld [vmem:[#allocation57_spill] sm:$0xff] }
 0x4c0   : > { %v4057_v35 = vadd.f32 %v4041_v11, %v11736_v30  ;;  %v4039_v5 = vmul.f32 %v10465_v31, %v4016_v44  ;;  %v4003_v19 = vmax.f32 %v3826_v13, %v3964_v60  ;;  %v4021_v20 = vsub.f32 %v4005_v24, %v11739_v32  ;;  %v11748_v24 = vld [vmem:[#allocation37_spill] sm:$0xff]  ;;  %v11751_v30 = vld [vmem:[#allocation38_spill] sm:$0xff] }
 0x4c1   : > { %v3829_v38 = vmax.f32 %v3652_v43, %v7498_v46  ;;  %7551 = vmatprep.mubr.bf16.mxu1 %v4089_v10  ;;  %v3790_v56 = vpop.f32.mrf.mxu1  ;;  %v3967_v54 = vpop.f32.mrf.mxu0  ;;  %v3653_v26 = vmax.f32 %v3476_v14, %v10386_v45  ;;  %v3477_v43 = vmax.f32 %v3300_v48, %v10400_v4  ;;  %v10556_v18 = vadd.f32 %v10499_v39, %v4056_v47  ;;  %v11749_v46 = vld [vmem:[#allocation39_spill] sm:$0xff]  ;;  %v11750_v10 = vld [vmem:[#allocation36_spill] sm:$0xff]  ;;  %v11754_v32 = vld [vmem:[#allocation58_spill] sm:$0xff] }
 0x4c2   : > { %v4055_v7 = vadd.f32 %v4039_v5, %v11740_v53  ;;  %v4019_v36 = vsub.f32 %v4003_v19, %v11741_v1  ;;  %v3827_v3 = vmax.f32 %v3650_v28, %v3790_v56  ;;  %7552 = vmatmul.mubr.bf16.vlgmr.msra.gmra.mxu1 %v4090_v49  ;;  %v10552_v15 = vadd.f32 %v10499_v39, %v4057_v35  ;;  %v11752_v5 = vld [vmem:[#allocation56_spill] sm:$0xff] }
 0x4c3   : > { %v4006_v25 = vmax.f32 %v3829_v38, %v7530_v6  ;;  %v7501_v0 = vpop.f32.mrf.mxu1  ;;  %v7533_v59 = vpop.f32.mrf.mxu0  ;;  %11743 = vst [vmem:[#allocation67_spill] sm:$0xff] %v10556_v18  ;;  %v4044_v45 = vmul.f32 %v10465_v31, %v4021_v20  ;;  %v10561_v4 = vadd.f32 %v10499_v39, %v4054_v8  ;;  %v3656_v48 = vmax.f32 %v3479_v34, %v10395_v12 }
 0x4c4   : > { %11742 = vst [vmem:[#allocation64_spill] sm:$0xff] %v10552_v15  ;;  %v4042_v61 = vmul.f32 %v10465_v31, %v4019_v36  ;;  %v4004_v17 = vmax.f32 %v3827_v3, %v3967_v54  ;;  %v3832_v37 = vmax.f32 %v3655_v41, %v7501_v0  ;;  %v10564_v22 = vadd.f32 %v10499_v39, %v4055_v7 }
 0x4c5   : > { %v4022_v21 = vsub.f32 %v4006_v25, %v11744_v33  ;;  %v3803_v52 = vpop.f32.mrf.mxu1  ;;  %v3980_v57 = vpop.f32.mrf.mxu0  ;;  %11745 = vst [vmem:[#allocation73_spill] sm:$0xff] %v10561_v4  ;;  %v4092_v44 = vpack.c.bf16 %v10552_v15, %v10556_v18  ;;  %v3654_v49 = vmax.f32 %v3477_v43, %v10402_v27  ;;  %v4060_v6 = vadd.f32 %v4044_v45, %v11749_v46  ;;  %v11760_v25 = vld [vmem:[#allocation40_spill] sm:$0xff]  ;;  %v11762_v45 = vld [vmem:[#allocation43_spill] sm:$0xff] }
 0x4c6   : > { %11746 = vst [vmem:[#allocation44_spill] sm:$0xff] %v10564_v22  ;;  %v4020_v42 = vsub.f32 %v4004_v17, %v11747_v63  ;;  %v4009_v62 = vmax.f32 %v3832_v37, %v7533_v59  ;;  %v3830_v9 = vmax.f32 %v3653_v26, %v3803_v52  ;;  %v4091_v51 = vpack.c.bf16 %v10564_v22, %v10561_v4  ;;  %v11759_v26 = vld [vmem:[#allocation59_spill] sm:$0xff] }
 0x4c7   : > { %v4045_v60 = vmul.f32 %v10465_v31, %v4022_v21  ;;  %v7502_v11 = vpop.f32.mrf.mxu1  ;;  %v4058_v13 = vadd.f32 %v4042_v61, %v11748_v24  ;;  %v7534_v12 = vpop.f32.mrf.mxu0  ;;  %v10597_v3 = vadd.f32 %v10499_v39, %v4060_v6  ;;  %v11761_v61 = vld [vmem:[#allocation41_spill] sm:$0xff]  ;;  %v11763_v21 = vld [vmem:[#allocation42_spill] sm:$0xff] }
 0x4c8   : > { %v4043_v2 = vmul.f32 %v10465_v31, %v4020_v42  ;;  %v4007_v28 = vmax.f32 %v3830_v9, %v3980_v57  ;;  %v3833_v14 = vmax.f32 %v3656_v48, %v7502_v11  ;;  %7555 = vmatprep.mubr.bf16.mxu1 %v4091_v51  ;;  %v4025_v19 = vsub.f32 %v4009_v62, %v11752_v5  ;;  %v8637_v9 = vld [vmem:[#allocation2 + $0x40] sm:$0xff]  }
 0x4c9   : > { %v4061_v16 = vadd.f32 %v4045_v60, %v11750_v10  ;;  %v3806_v47 = vpop.f32.mrf.mxu1  ;;  %v3983_v38 = vpop.f32.mrf.mxu0  ;;  %v10583_v27 = vadd.f32 %v10499_v39, %v4058_v13  ;;  %11758 = vst [vmem:[#allocation72_spill] sm:$0xff] %v10597_v3 }
 0x4ca   : > { %v4059_v35 = vadd.f32 %v4043_v2, %v11751_v30  ;;  %v4023_v41 = vsub.f32 %v4007_v28, %v11753_v29  ;;  %v4010_v55 = vmax.f32 %v3833_v14, %v7534_v12  ;;  %7556 = vmatmul.mubr.bf16.gmra.mxu1 %v4092_v44  ;;  %v3831_v8 = vmax.f32 %v3654_v49, %v3806_v47 }
 0x4cb   : > { %11755 = vst [vmem:[#allocation75_spill] sm:$0xff] %v10583_v27  ;;  %v10589_v54 = vadd.f32 %v10499_v39, %v4061_v16  ;;  %v4048_v7 = vmul.f32 %v10465_v31, %v4025_v19 }
 0x4cc   : > { %v4026_v20 = vsub.f32 %v4010_v55, %v11754_v32  ;;  %v10586_v56 = vadd.f32 %v10499_v39, %v4059_v35  ;;  %v4046_v34 = vmul.f32 %v10465_v31, %v4023_v41  ;;  %v4008_v53 = vmax.f32 %v3831_v8, %v3983_v38  ;;  %v8638_v8 = vld [vmem:[#allocation2 + $0x8] sm:$0xff]   ;;  %v8641_v38 = vld [vmem:[#allocation2 + $0x50] sm:$0xff]  }
 0x4cd   : > { %11757 = vst [vmem:[#allocation68_spill] sm:$0xff] %v10589_v54  ;;  %v4094_v59 = vpack.c.bf16 %v10589_v54, %v10597_v3  ;;  %v4064_v33 = vadd.f32 %v4048_v7, %v11762_v45  ;;  %v8639_v32 = vld [vmem:[#allocation2 + $0x48] sm:$0xff]   ;;  %v8644_v7 = vld [vmem:[#allocation2 + $0x20] sm:$0xff]  }
 0x4ce   : > { %11756 = vst [vmem:[#allocation45_spill] sm:$0xff] %v10586_v56  ;;  %v4049_v1 = vmul.f32 %v10465_v31, %v4026_v20  ;;  %v4093_v36 = vpack.c.bf16 %v10586_v56, %v10583_v27  ;;  %v4024_v43 = vsub.f32 %v4008_v53, %v11759_v26  ;;  %v4062_v17 = vadd.f32 %v4046_v34, %v11761_v61  ;;  %v8640_v20 = vld [vmem:[#allocation2 + $0x10] sm:$0xff]   ;;  %v8642_v34 = vld [vmem:[#allocation2 + $0x18] sm:$0xff]   ;;  %v8647_v26 = vld [vmem:[#allocation2 + $0x68] sm:$0xff]  }
 0x4cf   : > { %v10617_v42 = vadd.f32 %v10499_v39, %v4064_v33  ;;  %v8643_v53 = vld [vmem:[#allocation2 + $0x58] sm:$0xff]   ;;  %v8652_v61 = vld [vmem:[#allocation2 + $0x80] sm:$0xff]   ;;  %v8655_v45 = vld [vmem:[#allocation2 + $0xc8] sm:$0xff]  }
 0x4d0   : > { %v4065_v0 = vadd.f32 %v4049_v1, %v11760_v25  ;;  %7559 = vmatprep.mubr.bf16.mxu1 %v4093_v36  ;;  %v4047_v37 = vmul.f32 %v10465_v31, %v4024_v43  ;;  %v10611_v48 = vadd.f32 %v10499_v39, %v4062_v17  ;;  %v8645_v1 = vld [vmem:[#allocation2 + $0x60] sm:$0xff]   ;;  %v8646_v36 = vld [vmem:[#allocation2 + $0x28] sm:$0xff]   ;;  %v8648_v43 = vld [vmem:[#allocation2 + $0x30] sm:$0xff]  }
 0x4d1   : > { %11767 = vst [vmem:[#allocation62_spill] sm:$0xff] %v10617_v42  ;;  %v8649_v25 = vld [vmem:[#allocation2 + $0x70] sm:$0xff]   ;;  %v8653_v17 = vld [vmem:[#allocation2 + $0xc0] sm:$0xff]  }
 0x4d2   : > { %7560 = vmatmul.mubr.bf16.gmra.mxu1 %v4094_v59  ;;  %v4063_v52 = vadd.f32 %v4047_v37, %v11763_v21  ;;  %v10608_v57 = vadd.f32 %v10499_v39, %v4065_v0  ;;  %11765 = vst [vmem:[#allocation79_spill] sm:$0xff] %v10611_v48  ;;  %v8650_v0 = vld [vmem:[#allocation2 + $0x38] sm:$0xff]   ;;  %v8654_v37 = vld [vmem:[#allocation2 + $0x88] sm:$0xff]   ;;  %v8656_v33 = vld [vmem:[#allocation2 + $0x90] sm:$0xff]  }
 0x4d3   : > { %v8651_v59 = vld [vmem:[#allocation2 + $0x78] sm:$0xff]   ;;  %v8657_v21 = vld [vmem:[#allocation2 + $0xd0] sm:$0xff]  }
 0x4d4   : > { %11764 = vst [vmem:[#allocation77_spill] sm:$0xff] %v10608_v57  ;;  %v10614_v63 = vadd.f32 %v10499_v39, %v4063_v52  ;;  %v4096_v62 = vpack.c.bf16 %v10608_v57, %v10617_v42  ;;  %v8658_v52 = vld [vmem:[#allocation2 + $0x98] sm:$0xff]  }
 0x4d6   : > { %11766 = vst [vmem:[#allocation63_spill] sm:$0xff] %v10614_v63  ;;  %v4095_v31 = vpack.c.bf16 %v10614_v63, %v10611_v48 }
 0x4d8   : > { %7563 = vmatprep.mubr.bf16.mxu1 %v4095_v31  ;;  %v8659_v31 = vld [vmem:[#allocation2 + $0xd8] sm:$0xff]  }
 0x4da   : > { %7564 = vmatmul.mubr.bf16.gmra.mxu1 %v4096_v62  ;;  %v8660_v62 = vld [vmem:[#allocation2 + $0xa0] sm:$0xff]  }
 0x4db   : > { %7615 = vmatprep.mubr.bf16.mxu1 %v8637_v9  ;;  %v8661_v9 = vld [vmem:[#allocation2 + $0xe0] sm:$0xff]  }
 0x582   : > { %v10623_v60 = vpop.f32.mrf.mxu1 }
 0x583   : > { %11768 = vst [vmem:[#allocation70_spill] sm:$0xff] %v10623_v60 }
 0x584   : > { %v10625_v11 = vpop.f32.mrf.mxu1 }
 0x585   : > { %11769 = vst [vmem:[#allocation46_spill] sm:$0xff] %v10625_v11 }
 0x586   : > { %v10627_v51 = vpop.f32.mrf.mxu1 }
 0x587   : > { %11770 = vst [vmem:[#allocation74_spill] sm:$0xff] %v10627_v51  ;;  %v10703_v41 = vpack.c.bf16 %v10627_v51, %v10623_v60 }
 0x588   : > { %v10629_v44 = vpop.f32.mrf.mxu1 }
 0x589   : > { %11771 = vst [vmem:[#allocation76_spill] sm:$0xff] %v10629_v44  ;;  %v10711_v55 = vpack.c.bf16 %v10629_v44, %v10625_v11 }
 0x58a   : > { %v10631_v39 = vpop.f32.mrf.mxu1 }
 0x58b   : > { %11772 = vst [vmem:[#allocation82_spill] sm:$0xff] %v10631_v39 }
 0x58c   : > { %v10633_v24 = vpop.f32.mrf.mxu1 }
 0x58d   : > { %11773 = vst [vmem:[#allocation47_spill] sm:$0xff] %v10633_v24 }
 0x58e   : > { %v10635_v13 = vpop.f32.mrf.mxu1 }
 0x58f   : > { %11774 = vst [vmem:[#allocation78_spill] sm:$0xff] %v10635_v13  ;;  %v10687_v19 = vpack.c.bf16 %v10635_v13, %v10631_v39 }
 0x590   : > { %v10637_v2 = vpop.f32.mrf.mxu1 }
 0x591   : > { %11775 = vst [vmem:[#allocation80_spill] sm:$0xff] %v10637_v2  ;;  %v10695_v29 = vpack.c.bf16 %v10637_v2, %v10633_v24 }
 0x592   : > { %v10639_v28 = vpop.f32.mrf.mxu1 }
 0x593   : > { %11776 = vst [vmem:[#allocation81_spill] sm:$0xff] %v10639_v28 }
 0x594   : > { %v10641_v14 = vpop.f32.mrf.mxu1 }
 0x595   : > { %11777 = vst [vmem:[#allocation28_spill] sm:$0xff] %v10641_v14 }
 0x596   : > { %v10643_v12 = vpop.f32.mrf.mxu1 }
 0x597   : > { %11778 = vst [vmem:[#allocation31_spill] sm:$0xff] %v10643_v12  ;;  %v10671_v35 = vpack.c.bf16 %v10643_v12, %v10639_v28 }
 0x598   : > { %v10645_v49 = vpop.f32.mrf.mxu1 }
 0x599   : > { %11779 = vst [vmem:[#allocation29_spill] sm:$0xff] %v10645_v49  ;;  %v10679_v5 = vpack.c.bf16 %v10645_v49, %v10641_v14 }
 0x59a   : > { %v10647_v46 = vpop.f32.mrf.mxu1 }
 0x59b   : > { %11780 = vst [vmem:[#allocation48_spill] sm:$0xff] %v10647_v46 }
 0x59c   : > { %v10649_v6 = vpop.f32.mrf.mxu1 }
 0x59d   : > { %11781 = vst [vmem:[#allocation83_spill] sm:$0xff] %v10649_v6 }
 0x59e   : > { %v10651_v10 = vpop.f32.mrf.mxu1 }
 0x59f   : > { %11782 = vst [vmem:[#allocation30_spill] sm:$0xff] %v10651_v10  ;;  %v10655_v16 = vpack.c.bf16 %v10651_v10, %v10647_v46 }
 0x5a0   : > { %v10657_v47 = vpop.f32.mrf.mxu1 }
 0x5a1   : > { %11783 = vst [vmem:[#allocation84_spill] sm:$0xff] %v10657_v47  ;;  %v10661_v30 = vpack.c.bf16 %v10657_v47, %v10649_v6  ;;  %7567 = vmatprep.subr.bf16.mxu0 %v10655_v16  ;;  %7599 = vmatprep.subr.bf16.mxu1 %v10655_v16 }
 0x5a2   : > { %7568 = vmatpush3.bf16.msra.mxu0 %v10655_v16  ;;  %7600 = vmatpush3.bf16.msra.mxu1 %v10655_v16 }
 0x5a3   : > { %7569 = vmatprep.subr.bf16.mxu0 %v10661_v30  ;;  %7601 = vmatprep.subr.bf16.mxu1 %v10661_v30 }
 0x5a6   : > { %7570 = vmatpush3.bf16.msra.mxu0 %v10661_v30  ;;  %7602 = vmatpush3.bf16.msra.mxu1 %v10661_v30 }
 0x5a7   : > { %7571 = vmatprep.subr.bf16.mxu0 %v10671_v35  ;;  %7603 = vmatprep.subr.bf16.mxu1 %v10671_v35 }
 0x5aa   : > { %7572 = vmatpush3.bf16.msra.mxu0 %v10671_v35  ;;  %7604 = vmatpush3.bf16.msra.mxu1 %v10671_v35 }
 0x5ab   : > { %7573 = vmatprep.subr.bf16.mxu0 %v10679_v5  ;;  %7605 = vmatprep.subr.bf16.mxu1 %v10679_v5 }
 0x5ae   : > { %7574 = vmatpush3.bf16.msra.mxu0 %v10679_v5  ;;  %7606 = vmatpush3.bf16.msra.mxu1 %v10679_v5 }
 0x5af   : > { %7575 = vmatprep.subr.bf16.mxu0 %v10687_v19  ;;  %7607 = vmatprep.subr.bf16.mxu1 %v10687_v19 }
 0x5b2   : > { %7576 = vmatpush3.bf16.msra.mxu0 %v10687_v19  ;;  %7608 = vmatpush3.bf16.msra.mxu1 %v10687_v19 }
 0x5b3   : > { %7577 = vmatprep.subr.bf16.mxu0 %v10695_v29  ;;  %7609 = vmatprep.subr.bf16.mxu1 %v10695_v29 }
 0x5b6   : > { %7578 = vmatpush3.bf16.msra.mxu0 %v10695_v29  ;;  %7610 = vmatpush3.bf16.msra.mxu1 %v10695_v29 }
 0x5b7   : > { %7579 = vmatprep.subr.bf16.mxu0 %v10703_v41  ;;  %7611 = vmatprep.subr.bf16.mxu1 %v10703_v41 }
 0x5ba   : > { %7580 = vmatpush3.bf16.msra.mxu0 %v10703_v41  ;;  %7612 = vmatpush3.bf16.msra.mxu1 %v10703_v41 }
 0x5bb   : > { %7581 = vmatprep.subr.bf16.mxu0 %v10711_v55  ;;  %7613 = vmatprep.subr.bf16.mxu1 %v10711_v55 }
 0x5be   : > { %7582 = vmatpush3.bf16.msra.mxu0 %v10711_v55  ;;  %7614 = vmatpush3.bf16.msra.mxu1 %v10711_v55 }
 0x5bf   : > { %7631 = vmatprep.subr.bf16.mxu0 %v10655_v16  ;;  %7663 = vmatprep.subr.bf16.mxu1 %v10655_v16 }
 0x5c1   : > { %7584 = vmatmul.mubr.bf16.vlgmr.msra.gmra.mxu0 %v8638_v8  ;;  %7616 = vmatmul.mubr.bf16.vlgmr.msra.gmra.mxu1 %v8639_v32  ;;  %v8662_v8 = vld [vmem:[#allocation2 + $0xa8] sm:$0xff]  }
 0x5c2   : > { %7587 = vmatprep.mubr.bf16.mxu0 %v8640_v20  ;;  %7619 = vmatprep.mubr.bf16.mxu1 %v8641_v38  ;;  %v8663_v32 = vld [vmem:[#allocation2 + $0xe8] sm:$0xff]   ;;  %v8664_v20 = vld [vmem:[#allocation2 + $0xb0] sm:$0xff]  }
 0x5c3   : > { %7632 = vmatpush3.bf16.msra.mxu0 %v10655_v16  ;;  %7664 = vmatpush3.bf16.msra.mxu1 %v10655_v16  ;;  %v8665_v38 = vld [vmem:[#allocation2 + $0xf0] sm:$0xff]  }
 0x5c4   : > { %7633 = vmatprep.subr.bf16.mxu0 %v10661_v30  ;;  %7665 = vmatprep.subr.bf16.mxu1 %v10661_v30 }
 0x5c7   : > { %7634 = vmatpush3.bf16.msra.mxu0 %v10661_v30  ;;  %7666 = vmatpush3.bf16.msra.mxu1 %v10661_v30 }
 0x5c8   : > { %7635 = vmatprep.subr.bf16.mxu0 %v10671_v35  ;;  %7667 = vmatprep.subr.bf16.mxu1 %v10671_v35 }
 0x5c9   : > { %7588 = vmatmul.mubr.bf16.gmra.mxu0 %v8642_v34  ;;  %7620 = vmatmul.mubr.bf16.gmra.mxu1 %v8643_v53  ;;  %v8666_v34 = vld [vmem:[#allocation2 + $0xb8] sm:$0xff]  }
 0x5ca   : > { %7591 = vmatprep.mubr.bf16.mxu0 %v8644_v7  ;;  %7623 = vmatprep.mubr.bf16.mxu1 %v8645_v1  ;;  %v8667_v53 = vld [vmem:[#allocation2 + $0xf8] sm:$0xff]   ;;  %v8668_v7 = vld [vmem:[#allocation2 + $0x100] sm:$0xff]  }
 0x5cb   : > { %7636 = vmatpush3.bf16.msra.mxu0 %v10671_v35  ;;  %7668 = vmatpush3.bf16.msra.mxu1 %v10671_v35  ;;  %v8669_v1 = vld [vmem:[#allocation2 + $0x140] sm:$0xff]  }
 0x5cc   : > { %7637 = vmatprep.subr.bf16.mxu0 %v10679_v5  ;;  %7669 = vmatprep.subr.bf16.mxu1 %v10679_v5 }
 0x5cf   : > { %7638 = vmatpush3.bf16.msra.mxu0 %v10679_v5  ;;  %7670 = vmatpush3.bf16.msra.mxu1 %v10679_v5 }
 0x5d0   : > { %7639 = vmatprep.subr.bf16.mxu0 %v10687_v19  ;;  %7671 = vmatprep.subr.bf16.mxu1 %v10687_v19 }
 0x5d1   : > { %7592 = vmatmul.mubr.bf16.gmra.mxu0 %v8646_v36  ;;  %7624 = vmatmul.mubr.bf16.gmra.mxu1 %v8647_v26  ;;  %v8670_v36 = vld [vmem:[#allocation2 + $0x108] sm:$0xff]  }
 0x5d2   : > { %7595 = vmatprep.mubr.bf16.mxu0 %v8648_v43  ;;  %7627 = vmatprep.mubr.bf16.mxu1 %v8649_v25  ;;  %v8671_v26 = vld [vmem:[#allocation2 + $0x148] sm:$0xff]   ;;  %v8672_v43 = vld [vmem:[#allocation2 + $0x110] sm:$0xff]  }
 0x5d3   : > { %7640 = vmatpush3.bf16.msra.mxu0 %v10687_v19  ;;  %7672 = vmatpush3.bf16.msra.mxu1 %v10687_v19  ;;  %v8673_v25 = vld [vmem:[#allocation2 + $0x150] sm:$0xff]  }
 0x5d4   : > { %7641 = vmatprep.subr.bf16.mxu0 %v10695_v29  ;;  %7673 = vmatprep.subr.bf16.mxu1 %v10695_v29 }
 0x5d7   : > { %7642 = vmatpush3.bf16.msra.mxu0 %v10695_v29  ;;  %7674 = vmatpush3.bf16.msra.mxu1 %v10695_v29 }
 0x5d8   : > { %7643 = vmatprep.subr.bf16.mxu0 %v10703_v41  ;;  %7675 = vmatprep.subr.bf16.mxu1 %v10703_v41 }
 0x5d9   : > { %7596 = vmatmul.mubr.bf16.gmra.mxu0 %v8650_v0  ;;  %7628 = vmatmul.mubr.bf16.gmra.mxu1 %v8651_v59  ;;  %v8674_v0 = vld [vmem:[#allocation2 + $0x118] sm:$0xff]  }
 0x5da   : > { %7647 = vmatprep.mubr.bf16.mxu0 %v8652_v61  ;;  %7679 = vmatprep.mubr.bf16.mxu1 %v8653_v17  ;;  %v8675_v59 = vld [vmem:[#allocation2 + $0x158] sm:$0xff]   ;;  %v8676_v61 = vld [vmem:[#allocation2 + $0x120] sm:$0xff]  }
 0x5db   : > { %7644 = vmatpush3.bf16.msra.mxu0 %v10703_v41  ;;  %7676 = vmatpush3.bf16.msra.mxu1 %v10703_v41  ;;  %v8677_v17 = vld [vmem:[#allocation2 + $0x160] sm:$0xff]  }
 0x5dc   : > { %7645 = vmatprep.subr.bf16.mxu0 %v10711_v55  ;;  %7677 = vmatprep.subr.bf16.mxu1 %v10711_v55 }
 0x5df   : > { %7646 = vmatpush3.bf16.msra.mxu0 %v10711_v55  ;;  %7678 = vmatpush3.bf16.msra.mxu1 %v10711_v55 }
 0x5e0   : > { %7695 = vmatprep.subr.bf16.mxu0 %v10655_v16  ;;  %7727 = vmatprep.subr.bf16.mxu1 %v10655_v16 }
 0x5e2   : > { %7648 = vmatmul.mubr.bf16.vlgmr.msra.gmra.mxu0 %v8654_v37  ;;  %7680 = vmatmul.mubr.bf16.vlgmr.msra.gmra.mxu1 %v8655_v45  ;;  %v8680_v37 = vld [vmem:[#allocation2 + $0x130] sm:$0xff]  }
 0x5e3   : > { %7651 = vmatprep.mubr.bf16.mxu0 %v8656_v33  ;;  %7683 = vmatprep.mubr.bf16.mxu1 %v8657_v21  ;;  %v8681_v45 = vld [vmem:[#allocation2 + $0x170] sm:$0xff]   ;;  %v8684_v33 = vld [vmem:[#allocation2 + $0x180] sm:$0xff]  }
 0x5e4   : > { %7696 = vmatpush3.bf16.msra.mxu0 %v10655_v16  ;;  %7728 = vmatpush3.bf16.msra.mxu1 %v10655_v16  ;;  %v8685_v21 = vld [vmem:[#allocation2 + $0x1c0] sm:$0xff]  }
 0x5e5   : > { %7697 = vmatprep.subr.bf16.mxu0 %v10661_v30  ;;  %7729 = vmatprep.subr.bf16.mxu1 %v10661_v30 }
 0x5e8   : > { %7698 = vmatpush3.bf16.msra.mxu0 %v10661_v30  ;;  %7730 = vmatpush3.bf16.msra.mxu1 %v10661_v30 }
 0x5e9   : > { %7699 = vmatprep.subr.bf16.mxu0 %v10671_v35  ;;  %7731 = vmatprep.subr.bf16.mxu1 %v10671_v35 }
 0x5ea   : > { %7652 = vmatmul.mubr.bf16.gmra.mxu0 %v8658_v52  ;;  %7684 = vmatmul.mubr.bf16.gmra.mxu1 %v8659_v31  ;;  %v8688_v52 = vld [vmem:[#allocation2 + $0x190] sm:$0xff]  }
 0x5eb   : > { %7655 = vmatprep.mubr.bf16.mxu0 %v8660_v62  ;;  %7687 = vmatprep.mubr.bf16.mxu1 %v8661_v9  ;;  %v8689_v31 = vld [vmem:[#allocation2 + $0x1d0] sm:$0xff]   ;;  %v8690_v62 = vld [vmem:[#allocation2 + $0x198] sm:$0xff]  }
 0x5ec   : > { %7700 = vmatpush3.bf16.msra.mxu0 %v10671_v35  ;;  %7732 = vmatpush3.bf16.msra.mxu1 %v10671_v35  ;;  %v8691_v9 = vld [vmem:[#allocation2 + $0x1d8] sm:$0xff]  }
 0x5ed   : > { %7701 = vmatprep.subr.bf16.mxu0 %v10679_v5  ;;  %7733 = vmatprep.subr.bf16.mxu1 %v10679_v5 }
 0x5f0   : > { %7702 = vmatpush3.bf16.msra.mxu0 %v10679_v5  ;;  %7734 = vmatpush3.bf16.msra.mxu1 %v10679_v5 }
 0x5f1   : > { %7703 = vmatprep.subr.bf16.mxu0 %v10687_v19  ;;  %7735 = vmatprep.subr.bf16.mxu1 %v10687_v19 }
 0x5f2   : > { %7656 = vmatmul.mubr.bf16.gmra.mxu0 %v8662_v8  ;;  %7688 = vmatmul.mubr.bf16.gmra.mxu1 %v8663_v32  ;;  %v8693_v8 = vld [vmem:[#allocation2 + $0x1e0] sm:$0xff]   ;;  %v8694_v32 = vld [vmem:[#allocation2 + $0x1a8] sm:$0xff]  }
 0x5f3   : > { %7659 = vmatprep.mubr.bf16.mxu0 %v8664_v20  ;;  %7691 = vmatprep.mubr.bf16.mxu1 %v8665_v38  ;;  %v8695_v20 = vld [vmem:[#allocation2 + $0x1e8] sm:$0xff]   ;;  %v8697_v38 = vld [vmem:[#allocation2 + $0x1f0] sm:$0xff]  }
 0x5f4   : > { %7704 = vmatpush3.bf16.msra.mxu0 %v10687_v19  ;;  %7736 = vmatpush3.bf16.msra.mxu1 %v10687_v19 }
 0x5f5   : > { %7705 = vmatprep.subr.bf16.mxu0 %v10695_v29  ;;  %7737 = vmatprep.subr.bf16.mxu1 %v10695_v29 }
 0x5f8   : > { %7706 = vmatpush3.bf16.msra.mxu0 %v10695_v29  ;;  %7738 = vmatpush3.bf16.msra.mxu1 %v10695_v29 }
 0x5f9   : > { %7707 = vmatprep.subr.bf16.mxu0 %v10703_v41  ;;  %7739 = vmatprep.subr.bf16.mxu1 %v10703_v41 }
 0x5fa   : > { %7660 = vmatmul.mubr.bf16.gmra.mxu0 %v8666_v34  ;;  %7692 = vmatmul.mubr.bf16.gmra.mxu1 %v8667_v53  ;;  %v8698_v34 = vld [vmem:[#allocation2 + $0x1b8] sm:$0xff]  }
 0x5fb   : > { %7711 = vmatprep.mubr.bf16.mxu0 %v8668_v7  ;;  %7743 = vmatprep.mubr.bf16.mxu1 %v8669_v1  ;;  %v8699_v53 = vld [vmem:[#allocation2 + $0x1f8] sm:$0xff]   ;;  %v8540_v7 = vld [vmem:[#allocation12 + $0x38] sm:$0xff]   ;;  %v8541_v1 = vld [vmem:[#allocation12 + $0x30] sm:$0xff]  }
 0x5fc   : > { %7708 = vmatpush3.bf16.msra.mxu0 %v10703_v41  ;;  %7740 = vmatpush3.bf16.msra.mxu1 %v10703_v41 }
 0x5fd   : > { %7709 = vmatprep.subr.bf16.mxu0 %v10711_v55  ;;  %7741 = vmatprep.subr.bf16.mxu1 %v10711_v55 }
 0x600   : > { %7710 = vmatpush3.bf16.msra.mxu0 %v10711_v55  ;;  %7742 = vmatpush3.bf16.msra.mxu1 %v10711_v55 }
 0x601   : > { %7759 = vmatprep.subr.bf16.mxu0 %v10655_v16  ;;  %7791 = vmatprep.subr.bf16.mxu1 %v10655_v16 }
 0x603   : > { %7712 = vmatmul.mubr.bf16.vlgmr.msra.gmra.mxu0 %v8670_v36  ;;  %7744 = vmatmul.mubr.bf16.vlgmr.msra.gmra.mxu1 %v8671_v26  ;;  %v8542_v36 = vld [vmem:[#allocation12 + $0x28] sm:$0xff]   ;;  %v8543_v26 = vld [vmem:[#allocation12 + $0x20] sm:$0xff]  }
 0x604   : > { %7715 = vmatprep.mubr.bf16.mxu0 %v8672_v43  ;;  %7747 = vmatprep.mubr.bf16.mxu1 %v8673_v25  ;;  %v8544_v43 = vld [vmem:[#allocation12 + $0x18] sm:$0xff]   ;;  %v8545_v25 = vld [vmem:[#allocation12 + $0x10] sm:$0xff]  }
 0x605   : > { %7760 = vmatpush3.bf16.msra.mxu0 %v10655_v16  ;;  %7792 = vmatpush3.bf16.msra.mxu1 %v10655_v16  ;;  %v8678_v16 = vld [vmem:[#allocation2 + $0x128] sm:$0xff]  }
 0x606   : > { %7761 = vmatprep.subr.bf16.mxu0 %v10661_v30  ;;  %7793 = vmatprep.subr.bf16.mxu1 %v10661_v30 }
 0x609   : > { %7762 = vmatpush3.bf16.msra.mxu0 %v10661_v30  ;;  %7794 = vmatpush3.bf16.msra.mxu1 %v10661_v30  ;;  %v8679_v30 = vld [vmem:[#allocation2 + $0x168] sm:$0xff]  }
 0x60a   : > { %7763 = vmatprep.subr.bf16.mxu0 %v10671_v35  ;;  %7795 = vmatprep.subr.bf16.mxu1 %v10671_v35 }
 0x60b   : > { %7716 = vmatmul.mubr.bf16.gmra.mxu0 %v8674_v0  ;;  %7748 = vmatmul.mubr.bf16.gmra.mxu1 %v8675_v59  ;;  %v8546_v0 = vld [vmem:[#allocation12 + $0x8] sm:$0xff]   ;;  %v8547_v59 = vld [vmem:[#allocation12] sm:$0xff]  }
 0x60c   : > { %7719 = vmatprep.mubr.bf16.mxu0 %v8676_v61  ;;  %7751 = vmatprep.mubr.bf16.mxu1 %v8677_v17 }
 0x60d   : > { %7764 = vmatpush3.bf16.msra.mxu0 %v10671_v35  ;;  %7796 = vmatpush3.bf16.msra.mxu1 %v10671_v35  ;;  %v8682_v35 = vld [vmem:[#allocation2 + $0x138] sm:$0xff]  }
 0x60e   : > { %7765 = vmatprep.subr.bf16.mxu0 %v10679_v5  ;;  %7797 = vmatprep.subr.bf16.mxu1 %v10679_v5 }
 0x611   : > { %7766 = vmatpush3.bf16.msra.mxu0 %v10679_v5  ;;  %7798 = vmatpush3.bf16.msra.mxu1 %v10679_v5  ;;  %v8683_v5 = vld [vmem:[#allocation2 + $0x178] sm:$0xff]  }
 0x612   : > { %7767 = vmatprep.subr.bf16.mxu0 %v10687_v19  ;;  %7799 = vmatprep.subr.bf16.mxu1 %v10687_v19 }
 0x613   : > { %7720 = vmatmul.mubr.bf16.gmra.mxu0 %v8678_v16  ;;  %7752 = vmatmul.mubr.bf16.gmra.mxu1 %v8679_v30 }
 0x614   : > { %7723 = vmatprep.mubr.bf16.mxu0 %v8680_v37  ;;  %7755 = vmatprep.mubr.bf16.mxu1 %v8681_v45 }
 0x615   : > { %7768 = vmatpush3.bf16.msra.mxu0 %v10687_v19  ;;  %7800 = vmatpush3.bf16.msra.mxu1 %v10687_v19  ;;  %v8686_v19 = vld [vmem:[#allocation2 + $0x188] sm:$0xff]  }
 0x616   : > { %7769 = vmatprep.subr.bf16.mxu0 %v10695_v29  ;;  %7801 = vmatprep.subr.bf16.mxu1 %v10695_v29 }
 0x619   : > { %7770 = vmatpush3.bf16.msra.mxu0 %v10695_v29  ;;  %7802 = vmatpush3.bf16.msra.mxu1 %v10695_v29  ;;  %v8687_v29 = vld [vmem:[#allocation2 + $0x1c8] sm:$0xff]  }
 0x61a   : > { %7771 = vmatprep.subr.bf16.mxu0 %v10703_v41  ;;  %7803 = vmatprep.subr.bf16.mxu1 %v10703_v41 }
 0x61b   : > { %7724 = vmatmul.mubr.bf16.gmra.mxu0 %v8682_v35  ;;  %7756 = vmatmul.mubr.bf16.gmra.mxu1 %v8683_v5 }
 0x61c   : > { %7775 = vmatprep.mubr.bf16.mxu0 %v8684_v33  ;;  %7807 = vmatprep.mubr.bf16.mxu1 %v8685_v21 }
 0x61d   : > { %7772 = vmatpush3.bf16.msra.mxu0 %v10703_v41  ;;  %7804 = vmatpush3.bf16.msra.mxu1 %v10703_v41  ;;  %v8692_v41 = vld [vmem:[#allocation2 + $0x1a0] sm:$0xff]  }
 0x61e   : > { %7773 = vmatprep.subr.bf16.mxu0 %v10711_v55  ;;  %7805 = vmatprep.subr.bf16.mxu1 %v10711_v55 }
 0x621   : > { %7774 = vmatpush3.bf16.msra.mxu0 %v10711_v55  ;;  %7806 = vmatpush3.bf16.msra.mxu1 %v10711_v55  ;;  %v8696_v55 = vld [vmem:[#allocation2 + $0x1b0] sm:$0xff]  }
 0x622   : > { %7823 = vmatprep.subr.bf16.mxu0 %v8540_v7 }
 0x624   : > { %7776 = vmatmul.mubr.bf16.vlgmr.msra.gmra.mxu0 %v8686_v19  ;;  %7808 = vmatmul.mubr.bf16.vlgmr.msra.gmra.mxu1 %v8687_v29 }
 0x625   : > { %7779 = vmatprep.mubr.bf16.mxu0 %v8688_v52  ;;  %7811 = vmatprep.mubr.bf16.mxu1 %v8689_v31 }
 0x626   : > { %7824 = vmatpush3.bf16.msra.mxu0 %v8540_v7 }
 0x627   : > { %7825 = vmatprep.subr.bf16.mxu0 %v8541_v1 }
 0x62a   : > { %7826 = vmatpush3.bf16.msra.mxu0 %v8541_v1 }
 0x62b   : > { %7827 = vmatprep.subr.bf16.mxu0 %v8542_v36 }
 0x62c   : > { %7780 = vmatmul.mubr.bf16.gmra.mxu0 %v8690_v62  ;;  %7812 = vmatmul.mubr.bf16.gmra.mxu1 %v8691_v9 }
 0x62d   : > { %7783 = vmatprep.mubr.bf16.mxu0 %v8692_v41  ;;  %7815 = vmatprep.mubr.bf16.mxu1 %v8693_v8 }
 0x62e   : > { %7828 = vmatpush3.bf16.msra.mxu0 %v8542_v36 }
 0x62f   : > { %7829 = vmatprep.subr.bf16.mxu0 %v8543_v26 }
 0x632   : > { %7830 = vmatpush3.bf16.msra.mxu0 %v8543_v26 }
 0x633   : > { %7831 = vmatprep.subr.bf16.mxu0 %v8544_v43 }
 0x634   : > { %7784 = vmatmul.mubr.bf16.gmra.mxu0 %v8694_v32  ;;  %7816 = vmatmul.mubr.bf16.gmra.mxu1 %v8695_v20 }
 0x635   : > { %7787 = vmatprep.mubr.bf16.mxu0 %v8696_v55  ;;  %7819 = vmatprep.mubr.bf16.mxu1 %v8697_v38 }
 0x636   : > { %7832 = vmatpush3.bf16.msra.mxu0 %v8544_v43 }
 0x637   : > { %7833 = vmatprep.subr.bf16.mxu0 %v8545_v25 }
 0x63a   : > { %7834 = vmatpush3.bf16.msra.mxu0 %v8545_v25 }
 0x63b   : > { %7835 = vmatprep.subr.bf16.mxu0 %v8546_v0 }
 0x63c   : > { %7788 = vmatmul.mubr.bf16.gmra.mxu0 %v8698_v34  ;;  %7820 = vmatmul.mubr.bf16.gmra.mxu1 %v8699_v53 }
 0x63e   : > { %7836 = vmatpush3.bf16.msra.mxu0 %v8546_v0 }
 0x63f   : > { %7837 = vmatprep.subr.bf16.mxu0 %v8547_v59 }
 0x642   : > { %7838 = vmatpush3.bf16.msra.mxu0 %v8547_v59 }
 0x681   : > { %v7585_v61 = vpop.f32.mrf.mxu0  ;;  %v7617_v17 = vpop.f32.mrf.mxu1 }
 0x682   : > { %v4463_v16 = vmax.f32 %v7585_v61, %v7617_v17 }
 0x683   : > { %v10815_v30 = vpop.f32.mrf.mxu0  ;;  %v10817_v37 = vpop.f32.mrf.mxu1 }
 0x685   : > { %v10821_v35 = vpop.f32.mrf.mxu0  ;;  %v10823_v5 = vpop.f32.mrf.mxu1 }
 0x687   : > { %v10827_v21 = vpop.f32.mrf.mxu0  ;;  %v10829_v19 = vpop.f32.mrf.mxu1 }
 0x689   : > { %v7589_v52 = vpop.f32.mrf.mxu0  ;;  %v7621_v31 = vpop.f32.mrf.mxu1 }
 0x68a   : > { %v4467_v62 = vmax.f32 %v7589_v52, %v7621_v31 }
 0x68b   : > { %v10833_v9 = vpop.f32.mrf.mxu0  ;;  %v10835_v41 = vpop.f32.mrf.mxu1 }
 0x68d   : > { %v10839_v32 = vpop.f32.mrf.mxu0  ;;  %v10841_v20 = vpop.f32.mrf.mxu1 }
 0x68f   : > { %v10845_v38 = vpop.f32.mrf.mxu0  ;;  %v10847_v34 = vpop.f32.mrf.mxu1 }
 0x691   : > { %v7593_v7 = vpop.f32.mrf.mxu0  ;;  %v7625_v1 = vpop.f32.mrf.mxu1 }
 0x692   : > { %v4471_v36 = vmax.f32 %v7593_v7, %v7625_v1 }
 0x693   : > { %v10851_v26 = vpop.f32.mrf.mxu0  ;;  %v10853_v43 = vpop.f32.mrf.mxu1 }
 0x695   : > { %v10857_v0 = vpop.f32.mrf.mxu0  ;;  %v10859_v59 = vpop.f32.mrf.mxu1 }
 0x697   : > { %v10863_v17 = vpop.f32.mrf.mxu0  ;;  %v10865_v52 = vpop.f32.mrf.mxu1 }
 0x699   : > { %v7597_v7 = vpop.f32.mrf.mxu0  ;;  %v7629_v1 = vpop.f32.mrf.mxu1 }
 0x69a   : > { %v4475_v53 = vmax.f32 %v7597_v7, %v7629_v1 }
 0x69b   : > { %v10869_v55 = vpop.f32.mrf.mxu0  ;;  %v10871_v25 = vpop.f32.mrf.mxu1 }
 0x69d   : > { %v10875_v29 = vpop.f32.mrf.mxu0  ;;  %v10877_v61 = vpop.f32.mrf.mxu1 }
 0x69f   : > { %v10881_v45 = vpop.f32.mrf.mxu0  ;;  %v10883_v31 = vpop.f32.mrf.mxu1 }
 0x6a0   : > { %11784 = vst [vmem:[#allocation66_spill] sm:$0xff] %v10881_v45  ;;  %11785 = vst [vmem:[#allocation65_spill] sm:$0xff] %v10883_v31 }
 0x6a2   : > { %v7649_v1 = vpop.f32.mrf.mxu0  ;;  %v10887_v63 = vpop.f32.mrf.mxu1 }
 0x6a3   : > { %v10889_v42 = vmax.f32 %v4463_v16, %v7649_v1 }
 0x6a4   : > { %v4511_v8 = vpop.f32.mrf.mxu0  ;;  %v10891_v57 = vpop.f32.mrf.mxu1 }
 0x6a6   : > { %v7650_v47 = vpop.f32.mrf.mxu0  ;;  %v10895_v33 = vpop.f32.mrf.mxu1 }
 0x6a8   : > { %v10897_v10 = vpop.f32.mrf.mxu0  ;;  %v10899_v56 = vpop.f32.mrf.mxu1 }
 0x6aa   : > { %v7653_v6 = vpop.f32.mrf.mxu0  ;;  %v10901_v7 = vpop.f32.mrf.mxu1 }
 0x6ab   : > { %v10903_v46 = vmax.f32 %v4467_v62, %v7653_v6 }
 0x6ac   : > { %v10905_v16 = vpop.f32.mrf.mxu0  ;;  %v10907_v1 = vpop.f32.mrf.mxu1 }
 0x6ae   : > { %v10911_v48 = vpop.f32.mrf.mxu0  ;;  %v10913_v27 = vpop.f32.mrf.mxu1 }
 0x6b0   : > { %v10915_v3 = vpop.f32.mrf.mxu0  ;;  %v10917_v49 = vpop.f32.mrf.mxu1 }
 0x6b2   : > { %v7657_v12 = vpop.f32.mrf.mxu0  ;;  %v10919_v14 = vpop.f32.mrf.mxu1 }
 0x6b3   : > { %11786 = vst [vmem:[#allocation49_spill] sm:$0xff] %v10919_v14  ;;  %v10921_v6 = vmax.f32 %v4471_v36, %v7657_v12 }
 0x6b4   : > { %v4543_v62 = vpop.f32.mrf.mxu0  ;;  %v10923_v22 = vpop.f32.mrf.mxu1 }
 0x6b5   : > { %11787 = vst [vmem:[#allocation50_spill] sm:$0xff] %v10921_v6 }
 0x6b6   : > { %v10927_v54 = vpop.f32.mrf.mxu0  ;;  %v10929_v28 = vpop.f32.mrf.mxu1 }
 0x6b7   : > { %11788 = vst [vmem:[#allocation51_spill] sm:$0xff] %v10929_v28 }
 0x6b8   : > { %v10931_v15 = vpop.f32.mrf.mxu0  ;;  %v10933_v4 = vpop.f32.mrf.mxu1 }
 0x6b9   : > { %11789 = vst [vmem:[#allocation85_spill] sm:$0xff] %v10933_v4 }
 0x6ba   : > { %v7661_v2 = vpop.f32.mrf.mxu0  ;;  %v10935_v13 = vpop.f32.mrf.mxu1 }
 0x6bb   : > { %11790 = vst [vmem:[#allocation35_spill] sm:$0xff] %v10935_v13  ;;  %v10937_v24 = vmax.f32 %v4475_v53, %v7661_v2 }
 0x6bc   : > { %v10939_v12 = vpop.f32.mrf.mxu0  ;;  %v10941_v36 = vpop.f32.mrf.mxu1 }
 0x6bd   : > { %11791 = vst [vmem:[#allocation32_spill] sm:$0xff] %v10937_v24  ;;  %11792 = vst [vmem:[#allocation86_spill] sm:$0xff] %v10941_v36 }
 0x6be   : > { %v10945_v50 = vpop.f32.mrf.mxu0  ;;  %v10947_v39 = vpop.f32.mrf.mxu1 }
 0x6bf   : > { %11793 = vst [vmem:[#allocation33_spill] sm:$0xff] %v10947_v39 }
 0x6c0   : > { %v10949_v58 = vpop.f32.mrf.mxu0  ;;  %v10951_v40 = vpop.f32.mrf.mxu1 }
 0x6c1   : > { %11794 = vst [vmem:[#allocation52_spill] sm:$0xff] %v10949_v58  ;;  %11795 = vst [vmem:[#allocation34_spill] sm:$0xff] %v10951_v40 }
 0x6c3   : > { %v7713_v23 = vpop.f32.mrf.mxu0  ;;  %v7745_v44 = vpop.f32.mrf.mxu1 }
 0x6c5   : > { %v4737_v51 = vpop.f32.mrf.mxu0  ;;  %v4850_v2 = vpop.f32.mrf.mxu1 }
 0x6c7   : > { %v7714_v53 = vpop.f32.mrf.mxu0  ;;  %v10953_v14 = vpop.f32.mrf.mxu1 }
 0x6c9   : > { %v4740_v6 = vpop.f32.mrf.mxu0  ;;  %v10955_v36 = vpop.f32.mrf.mxu1 }
 0x6cb   : > { %v7717_v11 = vpop.f32.mrf.mxu0  ;;  %v10957_v18 = vpop.f32.mrf.mxu1 }
 0x6cc   : > { %11796 = vst [vmem:[#allocation53_spill] sm:$0xff] %v10957_v18 }
 0x6cd   : > { %v10959_v13 = vpop.f32.mrf.mxu0  ;;  %v10961_v24 = vpop.f32.mrf.mxu1 }
 0x6ce   : > { %11797 = vst [vmem:[#allocation54_spill] sm:$0xff] %v10959_v13  ;;  %11798 = vst [vmem:[#allocation55_spill] sm:$0xff] %v10961_v24 }
 0x6cf   : > { %v10963_v39 = vpop.f32.mrf.mxu0  ;;  %v10965_v40 = vpop.f32.mrf.mxu1 }
 0x6d0   : > { %11799 = vst [vmem:[#allocation37_spill] sm:$0xff] %v10963_v39  ;;  %11800 = vst [vmem:[#allocation39_spill] sm:$0xff] %v10965_v40  ;;  %v11810_v40 = vmax.f32 %v10815_v30, %v10817_v37 }
 0x6d1   : > { %v10967_v31 = vpop.f32.mrf.mxu0  ;;  %v10969_v45 = vpop.f32.mrf.mxu1 }
 0x6d2   : > { %11801 = vst [vmem:[#allocation36_spill] sm:$0xff] %v10967_v31  ;;  %11802 = vst [vmem:[#allocation38_spill] sm:$0xff] %v10969_v45  ;;  %v4574_v45 = vmax.f32 %v11810_v40, %v4511_v8  ;;  %v11814_v40 = vmax.f32 %v10889_v42, %v10887_v63 }
 0x6d3   : > { %v10971_v58 = vpop.f32.mrf.mxu0  ;;  %v10973_v4 = vpop.f32.mrf.mxu1 }
 0x6d4   : > { %11803 = vst [vmem:[#allocation56_spill] sm:$0xff] %v10971_v58  ;;  %11804 = vst [vmem:[#allocation57_spill] sm:$0xff] %v10973_v4  ;;  %v11812_v4 = vmax.f32 %v10821_v35, %v10823_v5  ;;  %v4802_v37 = vmax.f32 %v11814_v40, %v7713_v23  ;;  %v11816_v23 = vmax.f32 %v10839_v32, %v10841_v20  ;;  %v11829_v40 = vld [vmem:[#allocation65_spill] sm:$0xff] }
 0x6d5   : > { %v10975_v28 = vpop.f32.mrf.mxu0  ;;  %v10977_v60 = vpop.f32.mrf.mxu1  ;;  %v11819_v32 = vmax.f32 %v10857_v0, %v10859_v59 }
 0x6d6   : > { %11805 = vst [vmem:[#allocation58_spill] sm:$0xff] %v10975_v28  ;;  %11806 = vst [vmem:[#allocation59_spill] sm:$0xff] %v10977_v60  ;;  %v4577_v60 = vmax.f32 %v11812_v4, %v7650_v47  ;;  %v4581_v63 = vmax.f32 %v11816_v23, %v10911_v48  ;;  %v11833_v23 = vld [vmem:[#allocation46_spill] sm:$0xff] }
 0x6d7   : > { %v10979_v18 = vpop.f32.mrf.mxu0  ;;  %v10981_v13 = vpop.f32.mrf.mxu1 }
 0x6d8   : > { %11807 = vst [vmem:[#allocation40_spill] sm:$0xff] %v10979_v18  ;;  %11808 = vst [vmem:[#allocation41_spill] sm:$0xff] %v10981_v13  ;;  %v4687_v13 = vmax.f32 %v4574_v45, %v10891_v57  ;;  %v4690_v4 = vmax.f32 %v4577_v60, %v10895_v33  ;;  %v11815_v57 = vmax.f32 %v10833_v9, %v10835_v41 }
 0x6d9   : > { %v10983_v24 = vpop.f32.mrf.mxu0  ;;  %v10985_v39 = vpop.f32.mrf.mxu1  ;;  %v11817_v60 = vmax.f32 %v10845_v38, %v10847_v34  ;;  %v11818_v45 = vmax.f32 %v10851_v26, %v10853_v43 }
 0x6da   : > { %11809 = vst [vmem:[#allocation43_spill] sm:$0xff] %v10985_v39  ;;  %v11813_v39 = vmax.f32 %v10827_v21, %v10829_v19  ;;  %v4800_v47 = vmax.f32 %v4687_v13, %v4737_v51  ;;  %v4915_v13 = vmax.f32 %v4802_v37, %v7745_v44  ;;  %v11820_v44 = vmax.f32 %v10863_v17, %v10865_v52 }
 0x6db   : > { %v10990_v31 = vpop.f32.mrf.mxu0  ;;  %v10992_v58 = vpop.f32.mrf.mxu1  ;;  %v4579_v51 = vmax.f32 %v11817_v60, %v10915_v3  ;;  %v4582_v33 = vmax.f32 %v11818_v45, %v4543_v62  ;;  %v11040_v3 = vmax.f32 %v11819_v32, %v10927_v54  ;;  %v11821_v54 = vmax.f32 %v10869_v55, %v10871_v25  ;;  %v11824_v62 = vld [vmem:[#allocation70_spill] sm:$0xff]  ;;  %v11825_v25 = vld [vmem:[#allocation51_spill] sm:$0xff] }
 0x6dc   : > { %11811 = vst [vmem:[#allocation42_spill] sm:$0xff] %v10992_v58  ;;  %v4575_v30 = vmax.f32 %v11813_v39, %v10897_v10  ;;  %v4578_v39 = vmax.f32 %v11815_v57, %v10905_v16  ;;  %v4803_v10 = vmax.f32 %v4690_v4, %v7714_v53  ;;  %v4913_v9 = vmax.f32 %v4800_v47, %v4850_v2  ;;  %v11832_v57 = vld [vmem:[#allocation37_spill] sm:$0xff] }
 0x6dd   : > { %v10997_v28 = vpop.f32.mrf.mxu0  ;;  %v10999_v18 = vpop.f32.mrf.mxu1  ;;  %v11046_v20 = vmax.f32 %v11820_v44, %v10931_v15  ;;  %v4692_v26 = vmax.f32 %v4579_v51, %v10917_v49  ;;  %v11055_v0 = vmax.f32 %v11821_v54, %v10939_v12  ;;  %v11822_v15 = vmax.f32 %v10875_v29, %v10877_v61  ;;  %v11828_v61 = vld [vmem:[#allocation66_spill] sm:$0xff]  ;;  %v11841_v44 = vld [vmem:[#allocation33_spill] sm:$0xff] }
 0x6de   : > { %v4688_v42 = vmax.f32 %v4575_v30, %v10899_v56  ;;  %v4691_v48 = vmax.f32 %v4578_v39, %v10907_v1  ;;  %v4694_v56 = vmax.f32 %v4581_v63, %v10913_v27  ;;  %v4916_v43 = vmax.f32 %v4803_v10, %v10953_v14  ;;  %v11826_v30 = vld [vmem:[#allocation85_spill] sm:$0xff]  ;;  %v11834_v51 = vld [vmem:[#allocation86_spill] sm:$0xff] }
 0x6df   : > { %v11009_v8 = vpop.f32.mrf.mxu0  ;;  %v11011_v58 = vpop.f32.mrf.mxu1  ;;  %v11061_v59 = vmax.f32 %v11822_v15, %v10945_v50  ;;  %v11823_v49 = vmax.f32 %v10903_v46, %v10901_v7  ;;  %v4698_v12 = vmax.f32 %v11040_v3, %v11825_v25  ;;  %v4696_v29 = vmax.f32 %v11046_v20, %v11826_v30  ;;  %v11827_v50 = vld [vmem:[#allocation52_spill] sm:$0xff]  ;;  %v11835_v10 = vld [vmem:[#allocation53_spill] sm:$0xff]  ;;  %v11844_v54 = vld [vmem:[#allocation58_spill] sm:$0xff] }
 0x6e0   : > { %v4801_v41 = vmax.f32 %v4688_v42, %v4740_v6  ;;  %v4695_v6 = vmax.f32 %v4582_v33, %v10923_v22  ;;  %v11830_v37 = vmax.f32 %v11828_v61, %v11829_v40  ;;  %v4807_v39 = vmax.f32 %v4694_v56, %v11832_v57  ;;  %v11836_v33 = vld [vmem:[#allocation36_spill] sm:$0xff]  ;;  %v11848_v25 = vld [vmem:[#allocation38_spill] sm:$0xff] }
 0x6e1   : > { %v11014_v35 = vpop.f32.mrf.mxu0  ;;  %v11016_v5 = vpop.f32.mrf.mxu1  ;;  %v4806_v14 = vmax.f32 %v11823_v49, %v7717_v11  ;;  %v11831_v11 = vld [vmem:[#allocation54_spill] sm:$0xff]  ;;  %v4702_v56 = vmax.f32 %v11061_v59, %v11841_v44 }
 0x6e2   : > { %v4914_v22 = vmax.f32 %v4801_v41, %v10955_v36  ;;  %v11076_v46 = vmax.f32 %v11830_v37, %v11827_v50  ;;  %v4804_v7 = vmax.f32 %v4691_v48, %v11831_v11  ;;  %v11082_v36 = vld [vmem:[%s11487_s7 + $0x1] ss:$0 sm:$0xff]  ;;  %v11839_v41 = vld [vmem:[#allocation49_spill] sm:$0xff] }
 0x6e3   : > { %v4919_v45 = vmax.f32 %v4806_v14, %v11835_v10  ;;  %v11849_v50 = vld [vmem:[#allocation57_spill] sm:$0xff] }
 0x6e4   : > { %v7777_v21 = vpop.f32.mrf.mxu0  ;;  %v7809_v19 = vpop.f32.mrf.mxu1 }
 0x6e5   : > { %v5028_v16 = vmax.f32 %v4915_v13, %v7777_v21  ;;  %v4699_v13 = vmax.f32 %v11055_v0, %v11834_v51  ;;  %v4805_v21 = vmax.f32 %v4692_v26, %v11836_v33  ;;  %v4808_v0 = vmax.f32 %v4695_v6, %v11844_v54  ;;  %v11853_v51 = vld [vmem:[#allocation69_spill] sm:$0xff] }
 0x6e6   : > { %v4963_v38 = vpop.f32.mrf.mxu0  ;;  %v5076_v34 = vpop.f32.mrf.mxu1 }
 0x6e7   : > { %v5141_v1 = vmax.f32 %v5028_v16, %v7809_v19  ;;  %v5026_v27 = vmax.f32 %v4913_v9, %v4963_v38  ;;  %v11837_v19 = vld [vmem:[#allocation56_spill] sm:$0xff]  ;;  %v11838_v9 = vld [vmem:[#allocation50_spill] sm:$0xff]  ;;  %v4918_v30 = vmax.f32 %v4805_v21, %v11848_v25 }
 0x6e8   : > { %v7778_v17 = vpop.f32.mrf.mxu0  ;;  %v7810_v52 = vpop.f32.mrf.mxu1  ;;  %v11840_v16 = vmax.f32 %v11838_v9, %v11839_v41  ;;  %v11842_v38 = vld [vmem:[#allocation74_spill] sm:$0xff]  ;;  %v11855_v41 = vld [vmem:[#allocation40_spill] sm:$0xff] }
 0x6e9   : > { %v5157_v2 = vsub.f32 %v5141_v1, %v11824_v62  ;;  %v5139_v53 = vmax.f32 %v5026_v27, %v5076_v34  ;;  %v5029_v55 = vmax.f32 %v4916_v43, %v7778_v17  ;;  %v11843_v1 = vld [vmem:[#allocation55_spill] sm:$0xff]  ;;  %v11845_v17 = vld [vmem:[#allocation34_spill] sm:$0xff] }
 0x6ea   : > { %v4966_v4 = vpop.f32.mrf.mxu0  ;;  %v5079_v47 = vpop.f32.mrf.mxu1  ;;  %v4810_v48 = vmax.f32 %v11840_v16, %v11837_v19  ;;  %v4917_v27 = vmax.f32 %v4804_v7, %v11843_v1  ;;  %v11850_v7 = vld [vmem:[#allocation60_spill] sm:$0xff]  ;;  %v4811_v16 = vmax.f32 %v4698_v12, %v11855_v41 }
 0x6eb   : > { %v5155_v63 = vsub.f32 %v5139_v53, %v11833_v23  ;;  %v5142_v42 = vmax.f32 %v5029_v55, %v7810_v52  ;;  %v5027_v60 = vmax.f32 %v4914_v22, %v4966_v4  ;;  %v5181_v20 = vmul.f32 %v11082_v36, %v5157_v2  ;;  %v11846_v22 = vld [vmem:[#allocation39_spill] sm:$0xff]  ;;  %v11847_v2 = vld [vmem:[#allocation76_spill] sm:$0xff] }
 0x6ec   : > { %v7781_v32 = vpop.f32.mrf.mxu0  ;;  %v7813_v3 = vpop.f32.mrf.mxu1  ;;  %v4700_v52 = vmax.f32 %v11076_v46, %v11845_v17  ;;  %v4920_v62 = vmax.f32 %v4807_v39, %v11846_v22  ;;  %v4923_v61 = vmax.f32 %v4810_v48, %v11849_v50  ;;  %v11852_v39 = vld [vmem:[#allocation59_spill] sm:$0xff]  ;;  %v11862_v50 = vld [vmem:[#allocation80_spill] sm:$0xff] }
 0x6ed   : > { %v5158_v34 = vsub.f32 %v5142_v42, %v11842_v38  ;;  %v5140_v43 = vmax.f32 %v5027_v60, %v5079_v47  ;;  %v5179_v26 = vmul.f32 %v11082_v36, %v5155_v63  ;;  %v5032_v15 = vmax.f32 %v4919_v45, %v7781_v32  ;;  %v11851_v47 = vld [vmem:[#allocation61_spill] sm:$0xff]  ;;  %v11115_v60 = vld [vmem:[%s11488_s8 + $0x1] ss:$0 sm:$0xff]  ;;  %v11856_v48 = vld [vmem:[#allocation71_spill] sm:$0xff] }
 0x6ee   : > { %v4979_v49 = vpop.f32.mrf.mxu0  ;;  %v5092_v14 = vpop.f32.mrf.mxu1  ;;  %v5197_v4 = vadd.f32 %v5181_v20, %v11850_v7  ;;  %v4921_v42 = vmax.f32 %v4808_v0, %v11852_v39  ;;  %v11854_v45 = vld [vmem:[#allocation82_spill] sm:$0xff]  ;;  %v4809_v38 = vmax.f32 %v4696_v29, %v10983_v24  ;;  %v11860_v0 = vld [vmem:[#allocation47_spill] sm:$0xff]  ;;  %v4812_v7 = vmax.f32 %v4699_v13, %v10997_v28  ;;  %v11868_v28 = vld [vmem:[#allocation81_spill] sm:$0xff] }
 0x6ef   : > { %v5182_v53 = vmul.f32 %v11082_v36, %v5158_v34  ;;  %v5156_v55 = vsub.f32 %v5140_v43, %v11847_v2  ;;  %v5145_v40 = vmax.f32 %v5032_v15, %v7813_v3  ;;  %v5030_v6 = vmax.f32 %v4917_v27, %v4979_v49  ;;  %v11857_v34 = vld [vmem:[#allocation32_spill] sm:$0xff]  ;;  %v11858_v43 = vld [vmem:[#allocation35_spill] sm:$0xff] }
 0x6f0   : > { %v7782_v37 = vpop.f32.mrf.mxu0  ;;  %v7814_v11 = vpop.f32.mrf.mxu1  ;;  %v5195_v10 = vadd.f32 %v5179_v26, %v11853_v51  ;;  %v11859_v1 = vmax.f32 %v11857_v34, %v11858_v43  ;;  %v11131_v12 = vadd.f32 %v11115_v60, %v5197_v4  ;;  %v11865_v51 = vld [vmem:[#allocation64_spill] sm:$0xff]  ;;  %v11872_v46 = vld [vmem:[#allocation31_spill] sm:$0xff] }
 0x6f1   : > { %v5198_v57 = vadd.f32 %v5182_v53, %v11851_v47  ;;  %v5180_v23 = vmul.f32 %v11082_v36, %v5156_v55  ;;  %v5033_v63 = vmax.f32 %v4920_v62, %v7782_v37  ;;  %v5161_v33 = vsub.f32 %v5145_v40, %v11854_v45  ;;  %v11870_v34 = vld [vmem:[#allocation44_spill] sm:$0xff] }
 0x6f2   : > { %v5143_v21 = vmax.f32 %v5030_v6, %v5092_v14  ;;  %v4982_v19 = vpop.f32.mrf.mxu0  ;;  %v5095_v9 = vpop.f32.mrf.mxu1  ;;  %v4814_v27 = vmax.f32 %v11859_v1, %v10990_v31  ;;  %v11861_v14 = vld [vmem:[#allocation78_spill] sm:$0xff]  ;;  %v11137_v55 = vadd.f32 %v11115_v60, %v5195_v10  ;;  %v11871_v1 = vld [vmem:[#allocation28_spill] sm:$0xff] }
 0x6f3   : > { %v5196_v32 = vadd.f32 %v5180_v23, %v11856_v48  ;;  %v5146_v3 = vmax.f32 %v5033_v63, %v7814_v11  ;;  %v5031_v20 = vmax.f32 %v4918_v30, %v4982_v19  ;;  %v11127_v54 = vadd.f32 %v11115_v60, %v5198_v57  ;;  %v11863_v11 = vld [vmem:[#allocation41_spill] sm:$0xff]  ;;  %v11867_v19 = vld [vmem:[#allocation42_spill] sm:$0xff] }
 0x6f4   : > { %v5159_v26 = vsub.f32 %v5143_v21, %v11860_v0  ;;  %v7785_v15 = vpop.f32.mrf.mxu0  ;;  %v7817_v49 = vpop.f32.mrf.mxu1  ;;  %v5185_v24 = vmul.f32 %v11082_v36, %v5161_v33  ;;  %v11864_v63 = vld [vmem:[#allocation73_spill] sm:$0xff] }
 0x6f5   : > { %v5162_v22 = vsub.f32 %v5146_v3, %v11861_v14  ;;  %v5144_v62 = vmax.f32 %v5031_v20, %v5095_v9  ;;  %v5036_v53 = vmax.f32 %v4923_v61, %v7785_v15  ;;  %v11140_v25 = vadd.f32 %v11115_v60, %v5196_v32  ;;  %v11869_v3 = vld [vmem:[#allocation67_spill] sm:$0xff] }
 0x6f6   : > { %v5183_v29 = vmul.f32 %v11082_v36, %v5159_v26  ;;  %v4995_v2 = vpop.f32.mrf.mxu0  ;;  %v5108_v31 = vpop.f32.mrf.mxu1  ;;  %v4924_v61 = vmax.f32 %v4811_v16, %v11863_v11  ;;  %v5236_v4 = vpack.c.bf16 %v11127_v54, %v11131_v12  ;;  %v4927_v9 = vmax.f32 %v4814_v27, %v11867_v19 }
 0x6f7   : > { %v5186_v30 = vmul.f32 %v11082_v36, %v5162_v22  ;;  %v5160_v40 = vsub.f32 %v5144_v62, %v11862_v50  ;;  %v5149_v6 = vmax.f32 %v5036_v53, %v7817_v49  ;;  %v5034_v37 = vmax.f32 %v4921_v42, %v4995_v2  ;;  %v11866_v42 = vld [vmem:[#allocation43_spill] sm:$0xff] }
 0x6f8   : > { %v7786_v47 = vpop.f32.mrf.mxu0  ;;  %v7818_v57 = vpop.f32.mrf.mxu1  ;;  %v5235_v23 = vpack.c.bf16 %v11140_v25, %v11137_v55  ;;  %v5199_v39 = vadd.f32 %v5183_v29, %v11864_v63  ;;  %v4922_v21 = vmax.f32 %v4809_v38, %v11866_v42  ;;  %v4815_v32 = vmax.f32 %v4702_v56, %v11009_v8  ;;  %v11876_v63 = vld [vmem:[#allocation68_spill] sm:$0xff]  ;;  %v11878_v42 = vld [vmem:[#allocation83_spill] sm:$0xff] }
 0x6f9   : > { %v5202_v10 = vadd.f32 %v5186_v30, %v11865_v51  ;;  %v5184_v45 = vmul.f32 %v11082_v36, %v5160_v40  ;;  %v5147_v33 = vmax.f32 %v5034_v37, %v5108_v31  ;;  %v5165_v13 = vsub.f32 %v5149_v6, %v11868_v28  ;;  %v11873_v30 = vld [vmem:[#allocation29_spill] sm:$0xff] }
 0x6fa   : > { %v5037_v41 = vmax.f32 %v4924_v61, %v7786_v47  ;;  %7839 = vmatprep.mubr.bf16.mxu0 %v5235_v23  ;;  %v4998_v16 = vpop.f32.mrf.mxu0  ;;  %v5111_v48 = vpop.f32.mrf.mxu1  ;;  %v5201_v20 = vadd.f32 %v5185_v24, %v11869_v3  ;;  %v4925_v38 = vmax.f32 %v4812_v7, %v10999_v18  ;;  %v4813_v27 = vmax.f32 %v4700_v52, %v11014_v35 }
 0x6fb   : > { %v5200_v43 = vadd.f32 %v5184_v45, %v11870_v34  ;;  %v5163_v0 = vsub.f32 %v5147_v33, %v11871_v1  ;;  %7840 = vmatmul.mubr.bf16.vlgmr.msra.gmra.mxu0 %v5236_v4  ;;  %v5035_v15 = vmax.f32 %v4922_v21, %v4998_v16  ;;  %v11169_v8 = vadd.f32 %v11115_v60, %v5202_v10  ;;  %v11874_v4 = vld [vmem:[#allocation72_spill] sm:$0xff] }
 0x6fc   : > { %v5150_v26 = vmax.f32 %v5037_v41, %v7818_v57  ;;  %v7789_v49 = vpop.f32.mrf.mxu0  ;;  %v7821_v14 = vpop.f32.mrf.mxu1  ;;  %v11172_v44 = vadd.f32 %v11115_v60, %v5199_v39  ;;  %v5189_v18 = vmul.f32 %v11082_v36, %v5165_v13  ;;  %v4928_v53 = vmax.f32 %v4815_v32, %v11011_v58  ;;  %v11875_v57 = vld [vmem:[#allocation75_spill] sm:$0xff]  ;;  %v11877_v45 = vld [vmem:[#allocation48_spill] sm:$0xff] }
 0x6fd   : > { %v5040_v59 = vmax.f32 %v4927_v9, %v7789_v49  ;;  %v11175_v56 = vadd.f32 %v11115_v60, %v5200_v43  ;;  %v5187_v22 = vmul.f32 %v11082_v36, %v5163_v0  ;;  %v5148_v17 = vmax.f32 %v5035_v15, %v5111_v48  ;;  %v11879_v9 = vld [vmem:[#allocation45_spill] sm:$0xff]  ;;  %v11880_v48 = vld [vmem:[#allocation30_spill] sm:$0xff]  ;;  %v11882_v15 = vld [vmem:[#allocation79_spill] sm:$0xff] }
 0x6fe   : > { %v5166_v35 = vsub.f32 %v5150_v26, %v11872_v46  ;;  %v5011_v52 = vpop.f32.mrf.mxu0  ;;  %v5124_v62 = vpop.f32.mrf.mxu1  ;;  %v11182_v24 = vadd.f32 %v11115_v60, %v5201_v20  ;;  %v4926_v11 = vmax.f32 %v4813_v27, %v11016_v5  ;;  %v5205_v47 = vadd.f32 %v5189_v18, %v11874_v4  ;;  %v11884_v46 = vld [vmem:[#allocation62_spill] sm:$0xff] }
 0x6ff   : > { %v5153_v29 = vmax.f32 %v5040_v59, %v7821_v14  ;;  %v5038_v2 = vmax.f32 %v4925_v38, %v5011_v52  ;;  %v5164_v50 = vsub.f32 %v5148_v17, %v11873_v30  ;;  %v5237_v37 = vpack.c.bf16 %v11175_v56, %v11172_v44  ;;  %v11881_v38 = vld [vmem:[#allocation84_spill] sm:$0xff]  ;;  %v11883_v14 = vld [vmem:[#allocation77_spill] sm:$0xff]  ;;  %v11885_v17 = vld [vmem:[#allocation63_spill] sm:$0xff] }
 0x700   : > { %v5190_v31 = vmul.f32 %v11082_v36, %v5166_v35  ;;  %v7790_v40 = vpop.f32.mrf.mxu0  ;;  %v7822_v6 = vpop.f32.mrf.mxu1  ;;  %v5238_v58 = vpack.c.bf16 %v11169_v8, %v11182_v24  ;;  %v5203_v23 = vadd.f32 %v5187_v22, %v11875_v57  ;;  %v11210_v43 = vadd.f32 %v11115_v60, %v5205_v47  ;;  %v8548_v30 = vld [vmem:[#allocation14 + $0x38] sm:$0xff]  }
 0x701   : > { %v5151_v61 = vmax.f32 %v5038_v2, %v5124_v62  ;;  %v5041_v7 = vmax.f32 %v4928_v53, %v7790_v40  ;;  %v5188_v51 = vmul.f32 %v11082_v36, %v5164_v50  ;;  %7843 = vmatprep.mubr.bf16.mxu0 %v5237_v37  ;;  %v5169_v33 = vsub.f32 %v5153_v29, %v11877_v45  ;;  %v8549_v50 = vld [vmem:[#allocation14 + $0x30] sm:$0xff]   ;;  %v8550_v40 = vld [vmem:[#allocation14 + $0x28] sm:$0xff]  }
 0x702   : > { %v5206_v39 = vadd.f32 %v5190_v31, %v11876_v63  ;;  %v5014_v10 = vpop.f32.mrf.mxu0  ;;  %v5127_v13 = vpop.f32.mrf.mxu1  ;;  %v11204_v20 = vadd.f32 %v11115_v60, %v5203_v23  ;;  %7855 = vmatprep.subr.bf16.mxu1 %v8548_v30  ;;  %v8553_v37 = vld [vmem:[#allocation14 + $0x10] sm:$0xff]  }
 0x703   : > { %v5167_v21 = vsub.f32 %v5151_v61, %v11878_v42  ;;  %v5154_v5 = vmax.f32 %v5041_v7, %v7822_v6  ;;  %v5039_v19 = vmax.f32 %v4926_v11, %v5014_v10  ;;  %7844 = vmatmul.mubr.bf16.gmra.mxu0 %v5238_v58  ;;  %v5204_v28 = vadd.f32 %v5188_v51, %v11879_v9  ;;  %v8551_v6 = vld [vmem:[#allocation14 + $0x20] sm:$0xff]   ;;  %v8554_v11 = vld [vmem:[#allocation14 + $0x8] sm:$0xff]   ;;  %v11243_v7 = vld [vmem:[%s11490_s10] ss:$0 sm:$0xff] }
 0x704   : > { %v11199_v41 = vadd.f32 %v11115_v60, %v5206_v39  ;;  %v5193_v1 = vmul.f32 %v11082_v36, %v5169_v33  ;;  %7856 = vmatpush3.bf16.msra.mxu1 %v8548_v30  ;;  %v8555_v61 = vld [vmem:[#allocation14] sm:$0xff]  }
 0x705   : > { %v5191_v16 = vmul.f32 %v11082_v36, %v5167_v21  ;;  %v5170_v32 = vsub.f32 %v5154_v5, %v11880_v48  ;;  %v5152_v3 = vmax.f32 %v5039_v19, %v5127_v13  ;;  %v11207_v34 = vadd.f32 %v11115_v60, %v5204_v28  ;;  %7857 = vmatprep.subr.bf16.mxu1 %v8549_v50 }
 0x706   : > { %v5240_v22 = vpack.c.bf16 %v11199_v41, %v11210_v43  ;;  %v5209_v35 = vadd.f32 %v5193_v1, %v11884_v46 }
 0x707   : > { %v5194_v0 = vmul.f32 %v11082_v36, %v5170_v32  ;;  %v5168_v27 = vsub.f32 %v5152_v3, %v11881_v38  ;;  %v5239_v26 = vpack.c.bf16 %v11207_v34, %v11204_v20  ;;  %v5207_v49 = vadd.f32 %v5191_v16, %v11882_v15 }
 0x708   : > { %7858 = vmatpush3.bf16.msra.mxu1 %v8549_v50 }
 0x709   : > { %v5210_v59 = vadd.f32 %v5194_v0, %v11883_v14  ;;  %v5192_v18 = vmul.f32 %v11082_v36, %v5168_v27  ;;  %7847 = vmatprep.mubr.bf16.mxu0 %v5239_v26  ;;  %v11228_v53 = vadd.f32 %v11115_v60, %v5207_v49  ;;  %v11234_v36 = vadd.f32 %v11115_v60, %v5209_v35 }
 0x70a   : > { %7859 = vmatprep.subr.bf16.mxu1 %v8550_v40 }
 0x70b   : > { %v5208_v52 = vadd.f32 %v5192_v18, %v11885_v17  ;;  %7848 = vmatmul.mubr.bf16.gmra.mxu0 %v5240_v22  ;;  %v11225_v62 = vadd.f32 %v11115_v60, %v5210_v59 }
 0x70c   : > { %7860 = vmatpush3.bf16.msra.mxu1 %v8550_v40 }
 0x70d   : > { %v11231_v29 = vadd.f32 %v11115_v60, %v5208_v52  ;;  %v5242_v31 = vpack.c.bf16 %v11225_v62, %v11234_v36  ;;  %7861 = vmatprep.subr.bf16.mxu1 %v8551_v6  ;;  %v8552_v60 = vld [vmem:[#allocation14 + $0x18] sm:$0xff]  }
 0x70f   : > { %v5241_v2 = vpack.c.bf16 %v11231_v29, %v11228_v53 }
 0x710   : > { %7862 = vmatpush3.bf16.msra.mxu1 %v8551_v6 }
 0x711   : > { %7851 = vmatprep.mubr.bf16.mxu0 %v5241_v2  ;;  %7863 = vmatprep.subr.bf16.mxu1 %v8552_v60 }
 0x713   : > { %7852 = vmatmul.mubr.bf16.gmra.mxu0 %v5242_v31 }
 0x714   : > { %7864 = vmatpush3.bf16.msra.mxu1 %v8552_v60 }
 0x715   : > { %7865 = vmatprep.subr.bf16.mxu1 %v8553_v37 }
 0x718   : > { %7866 = vmatpush3.bf16.msra.mxu1 %v8553_v37 }
 0x719   : > { %7867 = vmatprep.subr.bf16.mxu1 %v8554_v11 }
 0x71c   : > { %7868 = vmatpush3.bf16.msra.mxu1 %v8554_v11 }
 0x71d   : > { %7869 = vmatprep.subr.bf16.mxu1 %v8555_v61 }
 0x720   : > { %7870 = vmatpush3.bf16.msra.mxu1 %v8555_v61 }
 0x7bb   : > { %v7841_v58 = vpop.f32.mrf.mxu0 }
 0x7bc   : > { %v11246_v4 = vadd.f32 %v7841_v58, %v11243_v7 }
 0x7bd   : > { %v5365_v47 = vpop.f32.mrf.mxu0 }
 0x7be   : > { %v5430_v57 = vmul.f32 %v11246_v4, %v11246_v4  ;;  %v11251_v23 = vadd.f32 %v11243_v7, %v5365_v47 }
 0x7bf   : > { %v7842_v63 = vpop.f32.mrf.mxu0 }
 0x7c0   : > { %v5446_v39 = vmul.f32 %v5430_v57, %v11246_v4  ;;  %v5428_v51 = vmul.f32 %v11251_v23, %v11251_v23  ;;  %v11257_v10 = vadd.f32 %v7842_v63, %v11243_v7 }
 0x7c1   : > { %v5368_v45 = vpop.f32.mrf.mxu0 }
 0x7c2   : > { %v5462_v33 = vmul.f32 0.044715, %v5446_v39  ;;  %v5444_v42 = vmul.f32 %v5428_v51, %v11251_v23  ;;  %v5431_v21 = vmul.f32 %v11257_v10, %v11257_v10  ;;  %v11263_v5 = vadd.f32 %v11243_v7, %v5368_v45 }
 0x7c3   : > { %v7845_v19 = vpop.f32.mrf.mxu0 }
 0x7c4   : > { %v5478_v9 = vadd.f32 %v5462_v33, %v11246_v4  ;;  %v5460_v28 = vmul.f32 0.044715, %v5444_v42  ;;  %v5447_v13 = vmul.f32 %v5431_v21, %v11257_v10  ;;  %v5429_v16 = vmul.f32 %v11263_v5, %v11263_v5 }
 0x7c5   : > { %v11270_v48 = vadd.f32 %v7845_v19, %v11243_v7  ;;  %v5381_v32 = vpop.f32.mrf.mxu0 }
 0x7c6   : > { %v5494_v3 = vmul.f32 0.7978846, %v5478_v9  ;;  %v5476_v1 = vadd.f32 %v5460_v28, %v11251_v23  ;;  %v5463_v0 = vmul.f32 0.044715, %v5447_v13  ;;  %v5445_v38 = vmul.f32 %v5429_v16, %v11263_v5 }
 0x7c7   : > { %v5434_v27 = vmul.f32 %v11270_v48, %v11270_v48  ;;  %v11277_v26 = vadd.f32 %v11243_v7, %v5381_v32  ;;  %v7846_v15 = vpop.f32.mrf.mxu0 }
 0x7c8   : > { %8588 = vtanh.f32 %v5494_v3  ;;  %v5492_v49 = vmul.f32 0.7978846, %v5476_v1  ;;  %v5479_v14 = vadd.f32 %v5463_v0, %v11257_v10  ;;  %v5461_v59 = vmul.f32 0.044715, %v5445_v38 }
 0x7c9   : > { %v5450_v18 = vmul.f32 %v5434_v27, %v11270_v48  ;;  %v5432_v22 = vmul.f32 %v11277_v26, %v11277_v26  ;;  %v11284_v46 = vadd.f32 %v7846_v15, %v11243_v7  ;;  %v5384_v35 = vpop.f32.mrf.mxu0 }
 0x7ca   : > { %v5495_v17 = vmul.f32 0.7978846, %v5479_v14  ;;  %v5477_v52 = vadd.f32 %v5461_v59, %v11263_v5  ;;  %v11288_v2 = vadd.f32 %v11243_v7, %v5384_v35  ;;  %8590 = vtanh.f32 %v5492_v49 }
 0x7cb   : > { %v5466_v31 = vmul.f32 0.044715, %v5450_v18  ;;  %v5448_v30 = vmul.f32 %v5432_v22, %v11277_v26  ;;  %v5435_v50 = vmul.f32 %v11284_v46, %v11284_v46  ;;  %v7849_v40 = vpop.f32.mrf.mxu0 }
 0x7cc   : > { %8592 = vtanh.f32 %v5495_v17  ;;  %v5493_v6 = vmul.f32 0.7978846, %v5477_v52  ;;  %v5433_v60 = vmul.f32 %v11288_v2, %v11288_v2  ;;  %v11296_v37 = vadd.f32 %v7849_v40, %v11243_v7 }
 0x7cd   : > { %v5482_v11 = vadd.f32 %v5466_v31, %v11270_v48  ;;  %v5464_v61 = vmul.f32 0.044715, %v5448_v30  ;;  %v5451_v58 = vmul.f32 %v5435_v50, %v11284_v46  ;;  %v5397_v47 = vpop.f32.mrf.mxu0 }
 0x7ce   : > { %8594 = vtanh.f32 %v5493_v6  ;;  %v5449_v57 = vmul.f32 %v5433_v60, %v11288_v2  ;;  %v5438_v63 = vmul.f32 %v11296_v37, %v11296_v37  ;;  %v11304_v39 = vadd.f32 %v11243_v7, %v5397_v47 }
 0x7cf   : > { %v5498_v51 = vmul.f32 0.7978846, %v5482_v11  ;;  %v5480_v45 = vadd.f32 %v5464_v61, %v11277_v26  ;;  %v5467_v33 = vmul.f32 0.044715, %v5451_v58  ;;  %v7850_v42 = vpop.f32.mrf.mxu0 }
 0x7d0   : > { %v5465_v21 = vmul.f32 0.044715, %v5449_v57  ;;  %v5454_v19 = vmul.f32 %v5438_v63, %v11296_v37  ;;  %v5436_v9 = vmul.f32 %v11304_v39, %v11304_v39  ;;  %v11311_v28 = vadd.f32 %v7850_v42, %v11243_v7 }
 0x7d1   : > { %8596 = vtanh.f32 %v5498_v51  ;;  %v5496_v13 = vmul.f32 0.7978846, %v5480_v45  ;;  %v5483_v16 = vadd.f32 %v5467_v33, %v11284_v46  ;;  %v5400_v32 = vpop.f32.mrf.mxu0 }
 0x7d2   : > { %v5481_v3 = vadd.f32 %v5465_v21, %v11288_v2  ;;  %v5470_v1 = vmul.f32 0.044715, %v5454_v19  ;;  %v5452_v0 = vmul.f32 %v5436_v9, %v11304_v39  ;;  %v5439_v38 = vmul.f32 %v11311_v28, %v11311_v28 }
 0x7d3   : > { %8598 = vtanh.f32 %v5496_v13  ;;  %v5499_v27 = vmul.f32 0.7978846, %v5483_v16  ;;  %v11319_v15 = vadd.f32 %v11243_v7, %v5400_v32  ;;  %v7853_v49 = vpop.f32.mrf.mxu0 }
 0x7d4   : > { %v5497_v14 = vmul.f32 0.7978846, %v5481_v3  ;;  %v5486_v59 = vadd.f32 %v5470_v1, %v11296_v37  ;;  %v5468_v18 = vmul.f32 0.044715, %v5452_v0  ;;  %v5455_v22 = vmul.f32 %v5439_v38, %v11311_v28 }
 0x7d5   : > { %v8589_v35 = vpop.eup %8588  ;;  %8600 = vtanh.f32 %v5499_v27  ;;  %v5437_v17 = vmul.f32 %v11319_v15, %v11319_v15  ;;  %v11326_v52 = vadd.f32 %v7853_v49, %v11243_v7  ;;  %v5413_v31 = vpop.f32.mrf.mxu0 }
 0x7d6   : > { %v5526_v30 = vadd.f32 1.0, %v8589_v35  ;;  %8602 = vtanh.f32 %v5497_v14  ;;  %v5502_v50 = vmul.f32 0.7978846, %v5486_v59  ;;  %v5484_v40 = vadd.f32 %v5468_v18, %v11304_v39 }
 0x7d7   : > { %v5471_v6 = vmul.f32 0.044715, %v5455_v22  ;;  %v5453_v60 = vmul.f32 %v5437_v17, %v11319_v15  ;;  %v5442_v11 = vmul.f32 %v11326_v52, %v11326_v52  ;;  %v11333_v61 = vadd.f32 %v11243_v7, %v5413_v31  ;;  %v7854_v58 = vpop.f32.mrf.mxu0  ;;  %v8591_v47 = vpop.eup %8590 }
 0x7d8   : > { %8604 = vtanh.f32 %v5502_v50  ;;  %v5500_v57 = vmul.f32 0.7978846, %v5484_v40  ;;  %v11336_v63 = vadd.f32 %v7854_v58, %v11243_v7  ;;  %v5542_v9 = vmul.f32 0.5, %v5526_v30 }
 0x7d9   : > { %v8593_v51 = vpop.eup %8592  ;;  %v5487_v45 = vadd.f32 %v5471_v6, %v11311_v28  ;;  %v5469_v33 = vmul.f32 0.044715, %v5453_v60  ;;  %v5458_v42 = vmul.f32 %v5442_v11, %v11326_v52  ;;  %v5440_v21 = vmul.f32 %v11333_v61, %v11333_v61  ;;  %v5416_v19 = vpop.f32.mrf.mxu0 }
 0x7da   : > { %v5527_v13 = vadd.f32 1.0, %v8593_v51  ;;  %8606 = vtanh.f32 %v5500_v57  ;;  %v5443_v16 = vmul.f32 %v11336_v63, %v11336_v63  ;;  %v11348_v14 = vadd.f32 %v11243_v7, %v5416_v19 }
 0x7db   : > { %v8595_v32 = vpop.eup %8594  ;;  %v5503_v3 = vmul.f32 0.7978846, %v5487_v45  ;;  %v5485_v1 = vadd.f32 %v5469_v33, %v11319_v15  ;;  %v5474_v0 = vmul.f32 0.044715, %v5458_v42  ;;  %v5456_v38 = vmul.f32 %v5440_v21, %v11333_v61 }
 0x7dc   : > { %v5543_v27 = vmul.f32 0.5, %v5527_v13  ;;  %v5459_v49 = vmul.f32 %v5443_v16, %v11336_v63  ;;  %v5524_v59 = vadd.f32 1.0, %v8591_v47  ;;  %v5441_v30 = vmul.f32 %v11348_v14, %v11348_v14 }
 0x7dd   : > { %8608 = vtanh.f32 %v5503_v3  ;;  %v5501_v18 = vmul.f32 0.7978846, %v5485_v1  ;;  %v5490_v22 = vadd.f32 %v5474_v0, %v11326_v52  ;;  %v5472_v35 = vmul.f32 0.044715, %v5456_v38 }
 0x7de   : > { %v8597_v17 = vpop.eup %8596  ;;  %v5475_v31 = vmul.f32 0.044715, %v5459_v49  ;;  %v5525_v50 = vadd.f32 1.0, %v8595_v32  ;;  %v5558_v7 = vmul.f32 %v5542_v9, %v11246_v4  ;;  %v5457_v58 = vmul.f32 %v5441_v30, %v11348_v14 }
 0x7df   : > { %8610 = vtanh.f32 %v5501_v18  ;;  %v5506_v40 = vmul.f32 0.7978846, %v5490_v22  ;;  %v5488_v6 = vadd.f32 %v5472_v35, %v11333_v61  ;;  %v5540_v47 = vmul.f32 0.5, %v5524_v59 }
 0x7e0   : > { %v8599_v60 = vpop.eup %8598  ;;  %v5491_v11 = vadd.f32 %v5475_v31, %v11336_v63  ;;  %v5559_v57 = vmul.f32 %v5543_v27, %v11257_v10  ;;  %v5530_v51 = vadd.f32 1.0, %v8597_v17  ;;  %v5541_v33 = vmul.f32 0.5, %v5525_v50 }
 0x7e1   : > { %v5504_v45 = vmul.f32 0.7978846, %v5488_v6  ;;  %8612 = vtanh.f32 %v5506_v40  ;;  %v5473_v19 = vmul.f32 0.044715, %v5457_v58  ;;  %v5528_v13 = vadd.f32 1.0, %v8599_v60 }
 0x7e2   : > { %v8601_v42 = vpop.eup %8600  ;;  %v5507_v21 = vmul.f32 0.7978846, %v5491_v11  ;;  %v5556_v4 = vmul.f32 %v5540_v47, %v11251_v23  ;;  %v5557_v9 = vmul.f32 %v5541_v33, %v11263_v5  ;;  %v5573_v27 = vpack.c.bf16 %v5559_v57, %v5558_v7 }
 0x7e3   : > { %v8603_v16 = vpop.eup %8602  ;;  %v5531_v32 = vadd.f32 1.0, %v8601_v42  ;;  %8614 = vtanh.f32 %v5504_v45  ;;  %v5489_v3 = vadd.f32 %v5473_v19, %v11348_v14  ;;  %v5544_v10 = vmul.f32 0.5, %v5528_v13 }
 0x7e4   : > { %8616 = vtanh.f32 %v5507_v21  ;;  %v5529_v1 = vadd.f32 1.0, %v8603_v16  ;;  %v5572_v38 = vpack.c.bf16 %v5557_v9, %v5556_v4  ;;  %v5546_v35 = vmul.f32 0.5, %v5530_v51 }
 0x7e5   : > { %v8605_v0 = vpop.eup %8604  ;;  %v5547_v49 = vmul.f32 0.5, %v5531_v32  ;;  %v5505_v59 = vmul.f32 0.7978846, %v5489_v3  ;;  %v5560_v23 = vmul.f32 %v5544_v10, %v11277_v26 }
 0x7e6   : > { %v5545_v18 = vmul.f32 0.5, %v5529_v1  ;;  %7871 = vmatprep.mubr.bf16.mxu1 %v5572_v38  ;;  %v5562_v60 = vmul.f32 %v5546_v35, %v11270_v48  ;;  %v5534_v7 = vadd.f32 1.0, %v8605_v0 }
 0x7e7   : > { %v8607_v22 = vpop.eup %8606  ;;  %8618 = vtanh.f32 %v5505_v59  ;;  %7872 = vmatmul.mubr.bf16.vlgmr.msra.gmra.mxu1 %v5573_v27  ;;  %v5563_v30 = vmul.f32 %v5547_v49, %v11284_v46  ;;  %v11376_v59 = vld [vmem:[%s11492_s12] ss:$0 sm:$0xff] }
 0x7e8   : > { %v5561_v5 = vmul.f32 %v5545_v18, %v11288_v2  ;;  %v5532_v17 = vadd.f32 1.0, %v8607_v22  ;;  %v5550_v33 = vmul.f32 0.5, %v5534_v7 }
 0x7e9   : > { %v5575_v57 = vpack.c.bf16 %v5563_v30, %v5562_v60 }
 0x7ea   : > { %v8609_v31 = vpop.eup %8608  ;;  %v5574_v50 = vpack.c.bf16 %v5561_v5, %v5560_v23  ;;  %v5548_v58 = vmul.f32 0.5, %v5532_v17  ;;  %v5566_v16 = vmul.f32 %v5550_v33, %v11296_v37 }
 0x7eb   : > { %v5535_v40 = vadd.f32 1.0, %v8609_v31 }
 0x7ec   : > { %v8611_v6 = vpop.eup %8610  ;;  %7875 = vmatprep.mubr.bf16.mxu1 %v5574_v50  ;;  %v5564_v42 = vmul.f32 %v5548_v58, %v11304_v39 }
 0x7ed   : > { %v5533_v11 = vadd.f32 1.0, %v8611_v6  ;;  %v5551_v47 = vmul.f32 0.5, %v5535_v40 }
 0x7ee   : > { %v8613_v51 = vpop.eup %8612 }
 0x7ef   : > { %v5549_v45 = vmul.f32 0.5, %v5533_v11  ;;  %7876 = vmatmul.mubr.bf16.gmra.mxu1 %v5575_v57  ;;  %v5567_v21 = vmul.f32 %v5551_v47, %v11311_v28  ;;  %v5538_v32 = vadd.f32 1.0, %v8613_v51 }
 0x7f0   : > { %v8615_v26 = vpop.eup %8614 }
 0x7f1   : > { %v8617_v2 = vpop.eup %8616  ;;  %v5565_v46 = vmul.f32 %v5549_v45, %v11319_v15  ;;  %v5536_v48 = vadd.f32 1.0, %v8615_v26  ;;  %v5577_v3 = vpack.c.bf16 %v5567_v21, %v5566_v16  ;;  %v5554_v0 = vmul.f32 0.5, %v5538_v32 }
 0x7f2   : > { %v5539_v19 = vadd.f32 1.0, %v8617_v2 }
 0x7f3   : > { %v5576_v13 = vpack.c.bf16 %v5565_v46, %v5564_v42  ;;  %v5552_v10 = vmul.f32 0.5, %v5536_v48  ;;  %v5570_v27 = vmul.f32 %v5554_v0, %v11326_v52 }
 0x7f4   : > { %v8619_v4 = vpop.eup %8618  ;;  %v5555_v9 = vmul.f32 0.5, %v5539_v19 }
 0x7f5   : > { %7879 = vmatprep.mubr.bf16.mxu1 %v5576_v13  ;;  %v5537_v1 = vadd.f32 1.0, %v8619_v4  ;;  %v5568_v28 = vmul.f32 %v5552_v10, %v11333_v61 }
 0x7f6   : > { %v5571_v39 = vmul.f32 %v5555_v9, %v11336_v63 }
 0x7f7   : > { %7880 = vmatmul.mubr.bf16.gmra.mxu1 %v5577_v3  ;;  %v5553_v38 = vmul.f32 0.5, %v5537_v1 }
 0x7f8   : > { %v5579_v49 = vpack.c.bf16 %v5571_v39, %v5570_v27 }
 0x7f9   : > { %v5569_v15 = vmul.f32 %v5553_v38, %v11348_v14 }
 0x7fb   : > { %v5578_v37 = vpack.c.bf16 %v5569_v15, %v5568_v28 }
 0x7fd   : > { %7883 = vmatprep.mubr.bf16.mxu1 %v5578_v37 }
 0x7ff   : > { %7884 = vmatmul.mubr.bf16.gmra.mxu1 %v5579_v49 }
 0x8a7   : > { %v7873_v18 = vpop.f32.mrf.mxu1 }
 0x8a8   : > { %v5677_v22 = vadd.f32 %v7873_v18, %v11376_v59 }
 0x8a9   : > { %v5668_v35 = vpop.f32.mrf.mxu1 }
 0x8aa   : > { %v5733_v63 = vadd.f32 %v5677_v22, %v11131_v12  ;;  %v5669_v61 = vadd.f32 %v11376_v59, %v5668_v35 }
 0x8ab   : > { %v7874_v14 = vpop.f32.mrf.mxu1 }
 0x8ac   : > { %5749 = vst [vmem:[%s11383_s15 + $0x10] sm:$0xff] %v5733_v63  ;;  %v5731_v52 = vadd.f32 %v5669_v61, %v11137_v55  ;;  %v5680_v23 = vadd.f32 %v7874_v14, %v11376_v59 }
 0x8ad   : > { %v5671_v5 = vpop.f32.mrf.mxu1 }
 0x8ae   : > { %5747 = vst [vmem:[%s11383_s15] sm:$0xff] %v5731_v52  ;;  %v5734_v12 = vadd.f32 %v5680_v23, %v11127_v54  ;;  %v5672_v17 = vadd.f32 %v11376_v59, %v5671_v5 }
 0x8af   : > { %v7877_v31 = vpop.f32.mrf.mxu1 }
 0x8b0   : > { %5750 = vst [vmem:[%s11383_s15 + $0x18] sm:$0xff] %v5734_v12  ;;  %v5732_v30 = vadd.f32 %v5672_v17, %v11140_v25  ;;  %v5693_v50 = vadd.f32 %v7877_v31, %v11376_v59 }
 0x8b1   : > { %v5684_v40 = vpop.f32.mrf.mxu1 }
 0x8b2   : > { %5748 = vst [vmem:[%s11383_s15 + $0x8] sm:$0xff] %v5732_v30  ;;  %v5737_v55 = vadd.f32 %v5693_v50, %v11182_v24  ;;  %v5685_v6 = vadd.f32 %v11376_v59, %v5684_v40 }
 0x8b3   : > { %v7878_v60 = vpop.f32.mrf.mxu1 }
 0x8b4   : > { %5753 = vst [vmem:[%s11383_s15 + $0x30] sm:$0xff] %v5737_v55  ;;  %v5735_v54 = vadd.f32 %v5685_v6, %v11172_v44  ;;  %v5696_v7 = vadd.f32 %v7878_v60, %v11376_v59 }
 0x8b5   : > { %v5687_v11 = vpop.f32.mrf.mxu1 }
 0x8b6   : > { %5751 = vst [vmem:[%s11383_s15 + $0x20] sm:$0xff] %v5735_v54  ;;  %v5738_v25 = vadd.f32 %v5696_v7, %v11169_v8  ;;  %v5688_v58 = vadd.f32 %v11376_v59, %v5687_v11 }
 0x8b7   : > { %v7881_v47 = vpop.f32.mrf.mxu1 }
 0x8b8   : > { %5754 = vst [vmem:[%s11383_s15 + $0x38] sm:$0xff] %v5738_v25  ;;  %v5736_v24 = vadd.f32 %v5688_v58, %v11175_v56  ;;  %v5709_v57 = vadd.f32 %v7881_v47, %v11376_v59 }
 0x8b9   : > { %v5700_v51 = vpop.f32.mrf.mxu1 }
 0x8ba   : > { %5752 = vst [vmem:[%s11383_s15 + $0x28] sm:$0xff] %v5736_v24  ;;  %v5741_v44 = vadd.f32 %v5709_v57, %v11210_v43  ;;  %v5701_v45 = vadd.f32 %v11376_v59, %v5700_v51 }
 0x8bb   : > { %v7882_v26 = vpop.f32.mrf.mxu1 }
 0x8bc   : > { %5757 = vst [vmem:[%s11383_s15 + $0x50] sm:$0xff] %v5741_v44  ;;  %v5739_v8 = vadd.f32 %v5701_v45, %v11204_v20  ;;  %v5712_v33 = vadd.f32 %v7882_v26, %v11376_v59 }
 0x8bd   : > { %v5703_v2 = vpop.f32.mrf.mxu1 }
 0x8be   : > { %5755 = vst [vmem:[%s11383_s15 + $0x40] sm:$0xff] %v5739_v8  ;;  %v5742_v56 = vadd.f32 %v5712_v33, %v11199_v41  ;;  %v5704_v42 = vadd.f32 %v11376_v59, %v5703_v2 }
 0x8bf   : > { %v7885_v46 = vpop.f32.mrf.mxu1 }
 0x8c0   : > { %5758 = vst [vmem:[%s11383_s15 + $0x58] sm:$0xff] %v5742_v56  ;;  %v5740_v43 = vadd.f32 %v5704_v42, %v11207_v34  ;;  %v5725_v21 = vadd.f32 %v7885_v46, %v11376_v59 }
 0x8c1   : > { %v5716_v19 = vpop.f32.mrf.mxu1 }
 0x8c2   : > { %5756 = vst [vmem:[%s11383_s15 + $0x48] sm:$0xff] %v5740_v43  ;;  %v5745_v20 = vadd.f32 %v5725_v21, %v11234_v36  ;;  %v5717_v48 = vadd.f32 %v11376_v59, %v5716_v19 }
 0x8c3   : > { %v7886_v13 = vpop.f32.mrf.mxu1 }
 0x8c4   : > { %5761 = vst [vmem:[%s11383_s15 + $0x70] sm:$0xff] %v5745_v20  ;;  %v5743_v41 = vadd.f32 %v5717_v48, %v11228_v53  ;;  %v5728_v16 = vadd.f32 %v7886_v13, %v11376_v59 }
 0x8c5   : > { %v5719_v34 = vpop.f32.mrf.mxu1 }
 0x8c6   : > { %5759 = vst [vmem:[%s11383_s15 + $0x60] sm:$0xff] %v5743_v41  ;;  %v5746_v32 = vadd.f32 %v5728_v16, %v11225_v62  ;;  %v5720_v4 = vadd.f32 %v11376_v59, %v5719_v34 }
 0x8c8   : > { %5762 = vst [vmem:[%s11383_s15 + $0x78] sm:$0xff] %v5746_v32  ;;  %v5744_v53 = vadd.f32 %v5720_v4, %v11231_v29 }
 0x8ca   : > { %5760 = vst [vmem:[%s11383_s15 + $0x68] sm:$0xff] %v5744_v53 }
 0x8cb   : > { %8899 = shalt.err (!%p8896_p8)
}
 0x8cc   : > { %s8900_s30 = scalar_lea.hbm %s11432_s19, 2048  ;;  %s8904_s11 = scalar_lea.hbm %s11887_s17, 4096 }
 0x8cd   : > { %p8901_p3 = scmp.ne.s32.totalorder %s11432_s19, %s8900_s30  ;;  %p8905_p2 = scmp.lt.s32.totalorder %s11432_s19, %s11887_s17 }
 0x8ce   : > { %p8906_p10 = scmp.lt.s32.totalorder %s8904_s11, %s8900_s30 }
 0x8cf   : > { %p8902_p7 = pnand %p8901_p3, %p11888_p5 }
 0x8d0   : > { %p8907_p0 = por %p8906_p10, %p8905_p2 }
 0x8d1   : > { %p8903_p6 = pneg %p8902_p7 }
 0x8d3   : > { %p8908_p13 = pnand %p8907_p0, %p8903_p6 }
 0x8d5   : > { %8911 = shalt.err (!%p8908_p13)
}
 0x8d6   : > { %s8981_s22 = smov 128   ;;  %s8982_s6 = smov 8  }
 0x8d7   : > { %7911 = dma.vmem_to_hbm [thread:$0]  (%p11888_p5), %s11434_s24, 2048, %s11432_s19, %s5764_s14, %s8981_s22, %s8981_s22, %s8982_s6  }
 0x8d8 PF: > { %s11889_s15 = sld [smem:[#allocation22_spill]]  ;;  %p11892_p11 = scmp.ge.s32.totalorder %s8966_s28, 2 }
 0x8d9   : > { %s11890_s21 = sld [smem:[#allocation27_spill]] }
 0x8de   : > { %s5792_s16 = sand.u32 1, %s11889_s15  }
 0x8df   : > { %p11891_p9 = scmp.ne.s32.totalorder %s11890_s21, 0  ;;  %s5793_s18 = scalar_lea.sflag [#allocation5], %s5792_s16 }
 0x8e1   : > { %p7937_p1 = pnand %p11892_p11, %p11891_p9 }
 0x8e3   : > { %p7938_p4 = pneg %p7937_p1 }
 0x8e5   : > { %8949 = dma.done.wait (%p7938_p4), %s5793_s18, 2048  }
 0x8e6   : > { %8951 = vsyncadd (%p7938_p4), %s5793_s18, 4294965248  ;;  %s11893_s28 = sld [smem:[#allocation24_spill]]  ;;  %s11896_s25 = smov %s8958_s26 }
 0x8e7   : > { %s11894_s9 = sld [smem:[#allocation23_spill]] }
 0x8e8   : > { %s11895_s27 = sld [smem:[#allocation25_spill]] }
 0x8ec   : > { %p31_p12 = scmp.ge.s32.totalorder %s11893_s28, 4  }
 0x8ed   : > { %s11897_s26 = smov %s11894_s9 }
 0x8ee   :  { %33 = sbr.rel (!%p31_p12) target bundleno = 17 (0x11), region = 160 }
 0x8f3   :  { %5798 = vsyncpa [#allocation4], 1 }
 0x8f4   :  { %5800 = vsyncpa [#allocation4 + $0x1], 1 }
 0x8f5   :  { %5801 = vsyncpa [#allocation7], 1 }
 0x8f6   :  { %5803 = vsyncpa [#allocation7 + $0x1], 1 }
 0x8f7   :  { %5804 = vsyncpa [#allocation10], 1 }
 0x8f8   :  { %5805 = vsyncpa [#allocation13], 1 }
 0x8f9   :  { %5806 = vsyncpa [#allocation5], 1 }
 0x8fa   :  { %5808 = vsyncpa [#allocation5 + $0x1], 1 }

</bundles_post_ra>
